<compile_context>
chip_gen: v5e
topology: v5e:2x2
jax: 0.10.0
libtpu: 0.0.40
codegen_flags: <defaults>
</compile_context>

<pallas_src>
import math

import jax
import jax.numpy as jnp
from jax.experimental import pallas as pl
from jax.experimental.pallas import tpu as pltpu  # noqa: F401  (TPU backend)

D_MODEL = 32
N_HEADS = 4
D_K = D_MODEL // N_HEADS
D_FF = 64
EPS = 1e-6
NEG_INF = -1e9


def decoder_layer_kernel(x_ref, mem_ref, trg_mask_ref, src_mask_ref,
                         w_qkv_ref, b_qkv_ref, w_o_ref, b_o_ref,
                         w1_ref, b1_ref, w2_ref, b2_ref,
                         ln_g_ref, ln_b_ref, o_ref):
    B, St, _ = trg_mask_ref.shape          # target (decoder) length
    Ss = src_mask_ref.shape[-1]            # source (memory) length
    H, Dk, D = w_o_ref.shape
    inv_sqrt_dk = 1.0 / math.sqrt(Dk)

    x = x_ref[...]                         # (B*St, D) f32 decoder tokens
    mem = mem_ref[...]                     # (B*Ss, D) f32 encoder memory tokens

    # Additive mask biases, computed once and reused by every head/batch.
    trg_bias = jnp.where(trg_mask_ref[...] < 0.5, NEG_INF, 0.0)   # (B, St, St)
    src_bias = jnp.where(src_mask_ref[...] < 0.5, NEG_INF, 0.0)   # (B, 1, Ss)

    b_o = b_o_ref[...]                     # (1, D) f32

    def layer_norm(v, g, b):               # f32 math
        mu = jnp.mean(v, axis=-1, keepdims=True)
        var = jnp.mean((v - mu) * (v - mu), axis=-1, keepdims=True)
        return g * (v - mu) * jax.lax.rsqrt(var + EPS) + b

    def mha(q_tok, kv_tok, Sq, Sk, bias):
        """Shared multi-head attention. q_tok (B*Sq, D), kv_tok (B*Sk, D) f32."""
        q_bf = q_tok.astype(jnp.bfloat16)
        kv_bf = kv_tok.astype(jnp.bfloat16)
        out = None
        for h in range(H):                              # static, unrolled
            wq = w_qkv_ref[h]                           # (D, Dk) bf16 per-head slab
            wk = w_qkv_ref[H + h]
            wv = w_qkv_ref[2 * H + h]
            bq = b_qkv_ref[h]                           # (1, Dk) f32
            bk = b_qkv_ref[H + h]
            bv = b_qkv_ref[2 * H + h]
            qh = (jnp.dot(q_bf, wq, preferred_element_type=jnp.float32)
                  + bq).astype(jnp.bfloat16)            # (B*Sq, Dk)
            kh = (jnp.dot(kv_bf, wk, preferred_element_type=jnp.float32)
                  + bk).astype(jnp.bfloat16)            # (B*Sk, Dk)
            vh = (jnp.dot(kv_bf, wv, preferred_element_type=jnp.float32)
                  + bv).astype(jnp.bfloat16)            # (B*Sk, Dk)
            ctx_rows = []
            for b in range(B):                          # static per-batch masked softmax
                qb = qh[b * Sq:(b + 1) * Sq]            # aligned sublane row slices
                kb = kh[b * Sk:(b + 1) * Sk]
                vb = vh[b * Sk:(b + 1) * Sk]
                s = jax.lax.dot_general(qb, kb, (((1,), (1,)), ((), ())),
                                        preferred_element_type=jnp.float32)
                s = s * inv_sqrt_dk + bias[b]
                s = s - jnp.max(s, axis=-1, keepdims=True)
                p = jnp.exp(s)
                p = p * pl.reciprocal(jnp.sum(p, axis=-1, keepdims=True),
                                      approx=True)
                ctx_rows.append(jnp.dot(p.astype(jnp.bfloat16), vb,
                                        preferred_element_type=jnp.float32))
            ctx = jnp.concatenate(ctx_rows, axis=0).astype(jnp.bfloat16)  # (B*Sq, Dk)
            # per-head accumulation through the matching row slab of W_o
            contrib = jnp.dot(ctx, w_o_ref[h], preferred_element_type=jnp.float32)
            out = contrib if out is None else out + contrib
        return out + b_o

    # ---- sublayer_connection[0]: masked self-attention, post-norm residual ----
    x = layer_norm(x + mha(x, x, St, St, trg_bias), ln_g_ref[0], ln_b_ref[0])
    # ---- sublayer_connection[1]: cross-attention over encoder memory ----
    x = layer_norm(x + mha(x, mem, St, Ss, src_bias), ln_g_ref[1], ln_b_ref[1])
    # TODO(synk): optional r2l_memory cross-attention sublayer not exercised
    # (this kernel implements the r2l_memory=None path of DecoderLayer.forward).
    # ---- sublayer_connection[-1]: position-wise feed-forward ----
    hdn = jnp.dot(x.astype(jnp.bfloat16), w1_ref[...],
                  preferred_element_type=jnp.float32) + b1_ref[...]
    hdn = jnp.maximum(hdn, 0.0)
    ff = jnp.dot(hdn.astype(jnp.bfloat16), w2_ref[...],
                 preferred_element_type=jnp.float32) + b2_ref[...]
    x = layer_norm(x + ff, ln_g_ref[2], ln_b_ref[2])

    o_ref[...] = x


def decoder_layer_forward(x, memory, src_mask, trg_mask, params):
    """DecoderLayer.forward(x, memory, src_mask, trg_mask) as one fused kernel."""
    B, St, D = x.shape
    _, Ss, _ = memory.shape
    x_tok = x.reshape(B * St, D)           # fold batch into tokens (free in XLA)
    mem_tok = memory.reshape(B * Ss, D)
    out_tok = pl.pallas_call(
        decoder_layer_kernel,
        out_shape=jax.ShapeDtypeStruct((B * St, D), jnp.float32),
    )(x_tok, mem_tok, trg_mask, src_mask, *params)
    return out_tok.reshape(B, St, D)


def init_params(key):
    ks = jax.random.split(key, 12)
    scale = 0.02

    def w(k, shape):
        return scale * jax.random.normal(k, shape, jnp.float32)

    # One shared attention module (Q/K/V/O), exactly like `self.attn`.
    wq, wk, wv, wo = (w(ks[i], (D_MODEL, D_MODEL)) for i in range(4))
    bq, bk, bv = (w(ks[4 + i], (D_MODEL,)) for i in range(3))
    bo = w(ks[7], (D_MODEL,))
    w1 = w(ks[8], (D_MODEL, D_FF)); b1 = w(ks[9], (D_FF,))
    w2 = w(ks[10], (D_FF, D_MODEL)); b2 = w(ks[11], (D_MODEL,))

    # Pack per head wrapper-side so the kernel never lane-slices activations:
    #   Wq[:, h*Dk:(h+1)*Dk] -> w_qkv[h],  Wo[h*Dk:(h+1)*Dk, :] -> w_o[h]
    def split_cols(m):                                   # (D, D) -> (H, D, Dk)
        return m.reshape(D_MODEL, N_HEADS, D_K).transpose(1, 0, 2)

    w_qkv = jnp.concatenate(
        [split_cols(wq), split_cols(wk), split_cols(wv)], axis=0
    ).astype(jnp.bfloat16)                               # (3H, D, Dk)
    b_qkv = jnp.concatenate(
        [bq.reshape(N_HEADS, 1, D_K),
         bk.reshape(N_HEADS, 1, D_K),
         bv.reshape(N_HEADS, 1, D_K)], axis=0)           # (3H, 1, Dk) f32
    w_o = wo.reshape(N_HEADS, D_K, D_MODEL).astype(jnp.bfloat16)   # (H, Dk, D)
    b_o = bo.reshape(1, D_MODEL)

    # Three SublayerConnections -> three LayerNorm parameter sets (cloned init).
    ln_g = jnp.ones((3, 1, D_MODEL), jnp.float32)
    ln_b = jnp.zeros((3, 1, D_MODEL), jnp.float32)

    return (w_qkv, b_qkv, w_o, b_o,
            w1.astype(jnp.bfloat16), b1.reshape(1, D_FF),
            w2.astype(jnp.bfloat16), b2.reshape(1, D_MODEL),
            ln_g, ln_b)


if __name__ == "__main__":
    B, S_TRG, S_SRC = 2, 8, 8
    key = jax.random.PRNGKey(0)
    kx, km, kp = jax.random.split(key, 3)

    x = jax.random.normal(kx, (B, S_TRG, D_MODEL), jnp.float32)
    memory = jax.random.normal(km, (B, S_SRC, D_MODEL), jnp.float32)

    # trg_mask: causal (subsequent-position) mask, 1.0 = attend
    trg_mask = jnp.tril(jnp.ones((B, S_TRG, S_TRG), jnp.float32))
    # src_mask: key-padding mask; mask out the last 2 source positions of batch 1
    src_mask = jnp.ones((B, 1, S_SRC), jnp.float32)
    src_mask = src_mask.at[1, 0, S_SRC - 2:].set(0.0)

    params = init_params(kp)

    out = decoder_layer_forward(x, memory, src_mask, trg_mask, params)
    out = jax.block_until_ready(out)

    assert out.shape == (B, S_TRG, D_MODEL), out.shape
    assert bool(jnp.all(jnp.isfinite(out)))
    print("KERNEL_OK")
</pallas_src>

<mosaic_0001>
module attributes {stable_mosaic.version = 11 : i64} {
  func.func @decoder_layer_kernel(%arg0: memref<16x32xf32, #tpu.memory_space<vmem>>, %arg1: memref<16x32xf32, #tpu.memory_space<vmem>>, %arg2: memref<2x8x8xf32, #tpu.memory_space<vmem>>, %arg3: memref<2x1x8xf32, #tpu.memory_space<vmem>>, %arg4: memref<12x32x8xbf16, #tpu.memory_space<vmem>>, %arg5: memref<12x1x8xf32, #tpu.memory_space<vmem>>, %arg6: memref<4x8x32xbf16, #tpu.memory_space<vmem>>, %arg7: memref<1x32xf32, #tpu.memory_space<vmem>>, %arg8: memref<32x64xbf16, #tpu.memory_space<vmem>>, %arg9: memref<1x64xf32, #tpu.memory_space<vmem>>, %arg10: memref<64x32xbf16, #tpu.memory_space<vmem>>, %arg11: memref<1x32xf32, #tpu.memory_space<vmem>>, %arg12: memref<3x1x32xf32, #tpu.memory_space<vmem>>, %arg13: memref<3x1x32xf32, #tpu.memory_space<vmem>>, %arg14: memref<16x32xf32, #tpu.memory_space<vmem>>) attributes {dimension_semantics = [], scalar_prefetch = 0 : i64, scratch_operands = 0 : i64, tpu.core_type = #tpu.core_type<tc>} {
    %c0 = arith.constant 0 : index
    %c0_0 = arith.constant 0 : index
    %0 = vector.load %arg0[%c0, %c0_0] : memref<16x32xf32, #tpu.memory_space<vmem>>, vector<16x32xf32>
    %c0_1 = arith.constant 0 : index
    %c0_2 = arith.constant 0 : index
    %1 = vector.load %arg1[%c0_1, %c0_2] : memref<16x32xf32, #tpu.memory_space<vmem>>, vector<16x32xf32>
    %c0_3 = arith.constant 0 : index
    %c0_4 = arith.constant 0 : index
    %c0_5 = arith.constant 0 : index
    %2 = vector.load %arg2[%c0_3, %c0_4, %c0_5] : memref<2x8x8xf32, #tpu.memory_space<vmem>>, vector<2x8x8xf32>
    %cst = arith.constant 5.000000e-01 : f32
    %3 = vector.broadcast %cst : f32 to vector<2x8x8xf32>
    %4 = arith.cmpf olt, %2, %3 : vector<2x8x8xf32>
    %cst_6 = arith.constant -1.000000e+09 : f32
    %cst_7 = arith.constant 0.000000e+00 : f32
    %5 = vector.broadcast %cst_6 : f32 to vector<2x8x8xf32>
    %6 = vector.broadcast %cst_7 : f32 to vector<2x8x8xf32>
    %7 = arith.select %4, %5, %6 : vector<2x8x8xi1>, vector<2x8x8xf32>
    %c0_8 = arith.constant 0 : index
    %c0_9 = arith.constant 0 : index
    %c0_10 = arith.constant 0 : index
    %8 = vector.load %arg3[%c0_8, %c0_9, %c0_10] : memref<2x1x8xf32, #tpu.memory_space<vmem>>, vector<2x1x8xf32>
    %cst_11 = arith.constant 5.000000e-01 : f32
    %9 = vector.broadcast %cst_11 : f32 to vector<2x1x8xf32>
    %10 = arith.cmpf olt, %8, %9 : vector<2x1x8xf32>
    %cst_12 = arith.constant -1.000000e+09 : f32
    %cst_13 = arith.constant 0.000000e+00 : f32
    %11 = vector.broadcast %cst_12 : f32 to vector<2x1x8xf32>
    %12 = vector.broadcast %cst_13 : f32 to vector<2x1x8xf32>
    %13 = arith.select %10, %11, %12 : vector<2x1x8xi1>, vector<2x1x8xf32>
    %c0_14 = arith.constant 0 : index
    %c0_15 = arith.constant 0 : index
    %14 = vector.load %arg7[%c0_14, %c0_15] : memref<1x32xf32, #tpu.memory_space<vmem>>, vector<1x32xf32>
    %15 = arith.truncf %0 : vector<16x32xf32> to vector<16x32xbf16>
    %16 = arith.truncf %0 : vector<16x32xf32> to vector<16x32xbf16>
    %c0_16 = arith.constant 0 : index
    %c0_17 = arith.constant 0 : index
    %c0_18 = arith.constant 0 : index
    %17 = vector.load %arg4[%c0_16, %c0_17, %c0_18] : memref<12x32x8xbf16, #tpu.memory_space<vmem>>, vector<1x32x8xbf16>
    %18 = vector.shape_cast %17 : vector<1x32x8xbf16> to vector<32x8xbf16>
    %c4 = arith.constant 4 : index
    %c0_19 = arith.constant 0 : index
    %c0_20 = arith.constant 0 : index
    %19 = vector.load %arg4[%c4, %c0_19, %c0_20] : memref<12x32x8xbf16, #tpu.memory_space<vmem>>, vector<1x32x8xbf16>
    %20 = vector.shape_cast %19 : vector<1x32x8xbf16> to vector<32x8xbf16>
    %c8 = arith.constant 8 : index
    %c0_21 = arith.constant 0 : index
    %c0_22 = arith.constant 0 : index
    %21 = vector.load %arg4[%c8, %c0_21, %c0_22] : memref<12x32x8xbf16, #tpu.memory_space<vmem>>, vector<1x32x8xbf16>
    %22 = vector.shape_cast %21 : vector<1x32x8xbf16> to vector<32x8xbf16>
    %c0_23 = arith.constant 0 : index
    %c0_24 = arith.constant 0 : index
    %c0_25 = arith.constant 0 : index
    %23 = vector.load %arg5[%c0_23, %c0_24, %c0_25] : memref<12x1x8xf32, #tpu.memory_space<vmem>>, vector<1x1x8xf32>
    %24 = vector.shape_cast %23 : vector<1x1x8xf32> to vector<1x8xf32>
    %c4_26 = arith.constant 4 : index
    %c0_27 = arith.constant 0 : index
    %c0_28 = arith.constant 0 : index
    %25 = vector.load %arg5[%c4_26, %c0_27, %c0_28] : memref<12x1x8xf32, #tpu.memory_space<vmem>>, vector<1x1x8xf32>
    %26 = vector.shape_cast %25 : vector<1x1x8xf32> to vector<1x8xf32>
    %c8_29 = arith.constant 8 : index
    %c0_30 = arith.constant 0 : index
    %c0_31 = arith.constant 0 : index
    %27 = vector.load %arg5[%c8_29, %c0_30, %c0_31] : memref<12x1x8xf32, #tpu.memory_space<vmem>>, vector<1x1x8xf32>
    %28 = vector.shape_cast %27 : vector<1x1x8xf32> to vector<1x8xf32>
    %cst_32 = arith.constant dense<0.000000e+00> : vector<16x8xf32>
    %29 = tpu.matmul %15, %18, %cst_32 {dimension_numbers = #tpu.dot_dimension_numbers<[1], [0], [0], [1], [0, 0, 1, 1], [], []>} : vector<16x32xbf16>, vector<32x8xbf16>, vector<16x8xf32> -> vector<16x8xf32>
    %30 = vector.broadcast %24 : vector<1x8xf32> to vector<16x8xf32>
    %31 = arith.addf %29, %30 : vector<16x8xf32>
    %32 = arith.truncf %31 : vector<16x8xf32> to vector<16x8xbf16>
    %cst_33 = arith.constant dense<0.000000e+00> : vector<16x8xf32>
    %33 = tpu.matmul %16, %20, %cst_33 {dimension_numbers = #tpu.dot_dimension_numbers<[1], [0], [0], [1], [0, 0, 1, 1], [], []>} : vector<16x32xbf16>, vector<32x8xbf16>, vector<16x8xf32> -> vector<16x8xf32>
    %34 = vector.broadcast %26 : vector<1x8xf32> to vector<16x8xf32>
    %35 = arith.addf %33, %34 : vector<16x8xf32>
    %36 = arith.truncf %35 : vector<16x8xf32> to vector<16x8xbf16>
    %cst_34 = arith.constant dense<0.000000e+00> : vector<16x8xf32>
    %37 = tpu.matmul %16, %22, %cst_34 {dimension_numbers = #tpu.dot_dimension_numbers<[1], [0], [0], [1], [0, 0, 1, 1], [], []>} : vector<16x32xbf16>, vector<32x8xbf16>, vector<16x8xf32> -> vector<16x8xf32>
    %38 = vector.broadcast %28 : vector<1x8xf32> to vector<16x8xf32>
    %39 = arith.addf %37, %38 : vector<16x8xf32>
    %40 = arith.truncf %39 : vector<16x8xf32> to vector<16x8xbf16>
    %41 = vector.extract_strided_slice %32 {offsets = [0, 0], sizes = [8, 8], strides = [1, 1]} : vector<16x8xbf16> to vector<8x8xbf16>
    %42 = vector.extract_strided_slice %36 {offsets = [0, 0], sizes = [8, 8], strides = [1, 1]} : vector<16x8xbf16> to vector<8x8xbf16>
    %43 = vector.extract_strided_slice %40 {offsets = [0, 0], sizes = [8, 8], strides = [1, 1]} : vector<16x8xbf16> to vector<8x8xbf16>
    %cst_35 = arith.constant dense<0.000000e+00> : vector<8x8xf32>
    %44 = tpu.matmul %41, %42, %cst_35 {dimension_numbers = #tpu.dot_dimension_numbers<[1], [1], [0], [0], [0, 0, 1, 0], [], []>} : vector<8x8xbf16>, vector<8x8xbf16>, vector<8x8xf32> -> vector<8x8xf32>
    %cst_36 = arith.constant 0.353553385 : f32
    %45 = vector.broadcast %cst_36 : f32 to vector<8x8xf32>
    %46 = arith.mulf %44, %45 : vector<8x8xf32>
    %47 = vector.extract_strided_slice %7 {offsets = [0, 0, 0], sizes = [1, 8, 8], strides = [1, 1, 1]} : vector<2x8x8xf32> to vector<1x8x8xf32>
    %48 = vector.shape_cast %47 : vector<1x8x8xf32> to vector<8x8xf32>
    %49 = arith.addf %46, %48 : vector<8x8xf32>
    %cst_37 = arith.constant dense<0xFF800000> : vector<8xf32>
    %50 = vector.multi_reduction <maximumf>, %49, %cst_37 [1] : vector<8x8xf32> to vector<8xf32>
    %51 = vector.shape_cast %50 : vector<8xf32> to vector<8x1xf32>
    %52 = vector.broadcast %51 : vector<8x1xf32> to vector<8x8xf32>
    %53 = arith.subf %49, %52 : vector<8x8xf32>
    %54 = math.exp %53 : vector<8x8xf32>
    %cst_38 = arith.constant dense<0.000000e+00> : vector<8xf32>
    %55 = vector.multi_reduction <add>, %54, %cst_38 [1] : vector<8x8xf32> to vector<8xf32>
    %56 = vector.shape_cast %55 : vector<8xf32> to vector<8x1xf32>
    %57 = tpu.reciprocal %56 {approx = true} : vector<8x1xf32> -> vector<8x1xf32>
    %58 = vector.broadcast %57 : vector<8x1xf32> to vector<8x8xf32>
    %59 = arith.mulf %54, %58 : vector<8x8xf32>
    %60 = arith.truncf %59 : vector<8x8xf32> to vector<8x8xbf16>
    %cst_39 = arith.constant dense<0.000000e+00> : vector<8x8xf32>
    %61 = tpu.matmul %60, %43, %cst_39 {dimension_numbers = #tpu.dot_dimension_numbers<[1], [0], [0], [1], [0, 0, 1, 1], [], []>} : vector<8x8xbf16>, vector<8x8xbf16>, vector<8x8xf32> -> vector<8x8xf32>
    %62 = vector.extract_strided_slice %32 {offsets = [8, 0], sizes = [8, 8], strides = [1, 1]} : vector<16x8xbf16> to vector<8x8xbf16>
    %63 = vector.extract_strided_slice %36 {offsets = [8, 0], sizes = [8, 8], strides = [1, 1]} : vector<16x8xbf16> to vector<8x8xbf16>
    %64 = vector.extract_strided_slice %40 {offsets = [8, 0], sizes = [8, 8], strides = [1, 1]} : vector<16x8xbf16> to vector<8x8xbf16>
    %cst_40 = arith.constant dense<0.000000e+00> : vector<8x8xf32>
    %65 = tpu.matmul %62, %63, %cst_40 {dimension_numbers = #tpu.dot_dimension_numbers<[1], [1], [0], [0], [0, 0, 1, 0], [], []>} : vector<8x8xbf16>, vector<8x8xbf16>, vector<8x8xf32> -> vector<8x8xf32>
    %cst_41 = arith.constant 0.353553385 : f32
    %66 = vector.broadcast %cst_41 : f32 to vector<8x8xf32>
    %67 = arith.mulf %65, %66 : vector<8x8xf32>
    %68 = vector.extract_strided_slice %7 {offsets = [1, 0, 0], sizes = [1, 8, 8], strides = [1, 1, 1]} : vector<2x8x8xf32> to vector<1x8x8xf32>
    %69 = vector.shape_cast %68 : vector<1x8x8xf32> to vector<8x8xf32>
    %70 = arith.addf %67, %69 : vector<8x8xf32>
    %cst_42 = arith.constant dense<0xFF800000> : vector<8xf32>
    %71 = vector.multi_reduction <maximumf>, %70, %cst_42 [1] : vector<8x8xf32> to vector<8xf32>
    %72 = vector.shape_cast %71 : vector<8xf32> to vector<8x1xf32>
    %73 = vector.broadcast %72 : vector<8x1xf32> to vector<8x8xf32>
    %74 = arith.subf %70, %73 : vector<8x8xf32>
    %75 = math.exp %74 : vector<8x8xf32>
    %cst_43 = arith.constant dense<0.000000e+00> : vector<8xf32>
    %76 = vector.multi_reduction <add>, %75, %cst_43 [1] : vector<8x8xf32> to vector<8xf32>
    %77 = vector.shape_cast %76 : vector<8xf32> to vector<8x1xf32>
    %78 = tpu.reciprocal %77 {approx = true} : vector<8x1xf32> -> vector<8x1xf32>
    %79 = vector.broadcast %78 : vector<8x1xf32> to vector<8x8xf32>
    %80 = arith.mulf %75, %79 : vector<8x8xf32>
    %81 = arith.truncf %80 : vector<8x8xf32> to vector<8x8xbf16>
    %cst_44 = arith.constant dense<0.000000e+00> : vector<8x8xf32>
    %82 = tpu.matmul %81, %64, %cst_44 {dimension_numbers = #tpu.dot_dimension_numbers<[1], [0], [0], [1], [0, 0, 1, 1], [], []>} : vector<8x8xbf16>, vector<8x8xbf16>, vector<8x8xf32> -> vector<8x8xf32>
    %83 = tpu.concatenate %61, %82 in 0 : vector<8x8xf32>, vector<8x8xf32> -> vector<16x8xf32>
    %84 = arith.truncf %83 : vector<16x8xf32> to vector<16x8xbf16>
    %c0_45 = arith.constant 0 : index
    %c0_46 = arith.constant 0 : index
    %c0_47 = arith.constant 0 : index
    %85 = vector.load %arg6[%c0_45, %c0_46, %c0_47] : memref<4x8x32xbf16, #tpu.memory_space<vmem>>, vector<1x8x32xbf16>
    %86 = vector.shape_cast %85 : vector<1x8x32xbf16> to vector<8x32xbf16>
    %cst_48 = arith.constant dense<0.000000e+00> : vector<16x32xf32>
    %87 = tpu.matmul %84, %86, %cst_48 {dimension_numbers = #tpu.dot_dimension_numbers<[1], [0], [0], [1], [0, 0, 1, 1], [], []>} : vector<16x8xbf16>, vector<8x32xbf16>, vector<16x32xf32> -> vector<16x32xf32>
    %c1 = arith.constant 1 : index
    %c0_49 = arith.constant 0 : index
    %c0_50 = arith.constant 0 : index
    %88 = vector.load %arg4[%c1, %c0_49, %c0_50] : memref<12x32x8xbf16, #tpu.memory_space<vmem>>, vector<1x32x8xbf16>
    %89 = vector.shape_cast %88 : vector<1x32x8xbf16> to vector<32x8xbf16>
    %c5 = arith.constant 5 : index
    %c0_51 = arith.constant 0 : index
    %c0_52 = arith.constant 0 : index
    %90 = vector.load %arg4[%c5, %c0_51, %c0_52] : memref<12x32x8xbf16, #tpu.memory_space<vmem>>, vector<1x32x8xbf16>
    %91 = vector.shape_cast %90 : vector<1x32x8xbf16> to vector<32x8xbf16>
    %c9 = arith.constant 9 : index
    %c0_53 = arith.constant 0 : index
    %c0_54 = arith.constant 0 : index
    %92 = vector.load %arg4[%c9, %c0_53, %c0_54] : memref<12x32x8xbf16, #tpu.memory_space<vmem>>, vector<1x32x8xbf16>
    %93 = vector.shape_cast %92 : vector<1x32x8xbf16> to vector<32x8xbf16>
    %c1_55 = arith.constant 1 : index
    %c0_56 = arith.constant 0 : index
    %c0_57 = arith.constant 0 : index
    %94 = vector.load %arg5[%c1_55, %c0_56, %c0_57] : memref<12x1x8xf32, #tpu.memory_space<vmem>>, vector<1x1x8xf32>
    %95 = vector.shape_cast %94 : vector<1x1x8xf32> to vector<1x8xf32>
    %c5_58 = arith.constant 5 : index
    %c0_59 = arith.constant 0 : index
    %c0_60 = arith.constant 0 : index
    %96 = vector.load %arg5[%c5_58, %c0_59, %c0_60] : memref<12x1x8xf32, #tpu.memory_space<vmem>>, vector<1x1x8xf32>
    %97 = vector.shape_cast %96 : vector<1x1x8xf32> to vector<1x8xf32>
    %c9_61 = arith.constant 9 : index
    %c0_62 = arith.constant 0 : index
    %c0_63 = arith.constant 0 : index
    %98 = vector.load %arg5[%c9_61, %c0_62, %c0_63] : memref<12x1x8xf32, #tpu.memory_space<vmem>>, vector<1x1x8xf32>
    %99 = vector.shape_cast %98 : vector<1x1x8xf32> to vector<1x8xf32>
    %cst_64 = arith.constant dense<0.000000e+00> : vector<16x8xf32>
    %100 = tpu.matmul %15, %89, %cst_64 {dimension_numbers = #tpu.dot_dimension_numbers<[1], [0], [0], [1], [0, 0, 1, 1], [], []>} : vector<16x32xbf16>, vector<32x8xbf16>, vector<16x8xf32> -> vector<16x8xf32>
    %101 = vector.broadcast %95 : vector<1x8xf32> to vector<16x8xf32>
    %102 = arith.addf %100, %101 : vector<16x8xf32>
    %103 = arith.truncf %102 : vector<16x8xf32> to vector<16x8xbf16>
    %cst_65 = arith.constant dense<0.000000e+00> : vector<16x8xf32>
    %104 = tpu.matmul %16, %91, %cst_65 {dimension_numbers = #tpu.dot_dimension_numbers<[1], [0], [0], [1], [0, 0, 1, 1], [], []>} : vector<16x32xbf16>, vector<32x8xbf16>, vector<16x8xf32> -> vector<16x8xf32>
    %105 = vector.broadcast %97 : vector<1x8xf32> to vector<16x8xf32>
    %106 = arith.addf %104, %105 : vector<16x8xf32>
    %107 = arith.truncf %106 : vector<16x8xf32> to vector<16x8xbf16>
    %cst_66 = arith.constant dense<0.000000e+00> : vector<16x8xf32>
    %108 = tpu.matmul %16, %93, %cst_66 {dimension_numbers = #tpu.dot_dimension_numbers<[1], [0], [0], [1], [0, 0, 1, 1], [], []>} : vector<16x32xbf16>, vector<32x8xbf16>, vector<16x8xf32> -> vector<16x8xf32>
    %109 = vector.broadcast %99 : vector<1x8xf32> to vector<16x8xf32>
    %110 = arith.addf %108, %109 : vector<16x8xf32>
    %111 = arith.truncf %110 : vector<16x8xf32> to vector<16x8xbf16>
    %112 = vector.extract_strided_slice %103 {offsets = [0, 0], sizes = [8, 8], strides = [1, 1]} : vector<16x8xbf16> to vector<8x8xbf16>
    %113 = vector.extract_strided_slice %107 {offsets = [0, 0], sizes = [8, 8], strides = [1, 1]} : vector<16x8xbf16> to vector<8x8xbf16>
    %114 = vector.extract_strided_slice %111 {offsets = [0, 0], sizes = [8, 8], strides = [1, 1]} : vector<16x8xbf16> to vector<8x8xbf16>
    %cst_67 = arith.constant dense<0.000000e+00> : vector<8x8xf32>
    %115 = tpu.matmul %112, %113, %cst_67 {dimension_numbers = #tpu.dot_dimension_numbers<[1], [1], [0], [0], [0, 0, 1, 0], [], []>} : vector<8x8xbf16>, vector<8x8xbf16>, vector<8x8xf32> -> vector<8x8xf32>
    %cst_68 = arith.constant 0.353553385 : f32
    %116 = vector.broadcast %cst_68 : f32 to vector<8x8xf32>
    %117 = arith.mulf %115, %116 : vector<8x8xf32>
    %118 = vector.extract_strided_slice %7 {offsets = [0, 0, 0], sizes = [1, 8, 8], strides = [1, 1, 1]} : vector<2x8x8xf32> to vector<1x8x8xf32>
    %119 = vector.shape_cast %118 : vector<1x8x8xf32> to vector<8x8xf32>
    %120 = arith.addf %117, %119 : vector<8x8xf32>
    %cst_69 = arith.constant dense<0xFF800000> : vector<8xf32>
    %121 = vector.multi_reduction <maximumf>, %120, %cst_69 [1] : vector<8x8xf32> to vector<8xf32>
    %122 = vector.shape_cast %121 : vector<8xf32> to vector<8x1xf32>
    %123 = vector.broadcast %122 : vector<8x1xf32> to vector<8x8xf32>
    %124 = arith.subf %120, %123 : vector<8x8xf32>
    %125 = math.exp %124 : vector<8x8xf32>
    %cst_70 = arith.constant dense<0.000000e+00> : vector<8xf32>
    %126 = vector.multi_reduction <add>, %125, %cst_70 [1] : vector<8x8xf32> to vector<8xf32>
    %127 = vector.shape_cast %126 : vector<8xf32> to vector<8x1xf32>
    %128 = tpu.reciprocal %127 {approx = true} : vector<8x1xf32> -> vector<8x1xf32>
    %129 = vector.broadcast %128 : vector<8x1xf32> to vector<8x8xf32>
    %130 = arith.mulf %125, %129 : vector<8x8xf32>
    %131 = arith.truncf %130 : vector<8x8xf32> to vector<8x8xbf16>
    %cst_71 = arith.constant dense<0.000000e+00> : vector<8x8xf32>
    %132 = tpu.matmul %131, %114, %cst_71 {dimension_numbers = #tpu.dot_dimension_numbers<[1], [0], [0], [1], [0, 0, 1, 1], [], []>} : vector<8x8xbf16>, vector<8x8xbf16>, vector<8x8xf32> -> vector<8x8xf32>
    %133 = vector.extract_strided_slice %103 {offsets = [8, 0], sizes = [8, 8], strides = [1, 1]} : vector<16x8xbf16> to vector<8x8xbf16>
    %134 = vector.extract_strided_slice %107 {offsets = [8, 0], sizes = [8, 8], strides = [1, 1]} : vector<16x8xbf16> to vector<8x8xbf16>
    %135 = vector.extract_strided_slice %111 {offsets = [8, 0], sizes = [8, 8], strides = [1, 1]} : vector<16x8xbf16> to vector<8x8xbf16>
    %cst_72 = arith.constant dense<0.000000e+00> : vector<8x8xf32>
    %136 = tpu.matmul %133, %134, %cst_72 {dimension_numbers = #tpu.dot_dimension_numbers<[1], [1], [0], [0], [0, 0, 1, 0], [], []>} : vector<8x8xbf16>, vector<8x8xbf16>, vector<8x8xf32> -> vector<8x8xf32>
    %cst_73 = arith.constant 0.353553385 : f32
    %137 = vector.broadcast %cst_73 : f32 to vector<8x8xf32>
    %138 = arith.mulf %136, %137 : vector<8x8xf32>
    %139 = vector.extract_strided_slice %7 {offsets = [1, 0, 0], sizes = [1, 8, 8], strides = [1, 1, 1]} : vector<2x8x8xf32> to vector<1x8x8xf32>
    %140 = vector.shape_cast %139 : vector<1x8x8xf32> to vector<8x8xf32>
    %141 = arith.addf %138, %140 : vector<8x8xf32>
    %cst_74 = arith.constant dense<0xFF800000> : vector<8xf32>
    %142 = vector.multi_reduction <maximumf>, %141, %cst_74 [1] : vector<8x8xf32> to vector<8xf32>
    %143 = vector.shape_cast %142 : vector<8xf32> to vector<8x1xf32>
    %144 = vector.broadcast %143 : vector<8x1xf32> to vector<8x8xf32>
    %145 = arith.subf %141, %144 : vector<8x8xf32>
    %146 = math.exp %145 : vector<8x8xf32>
    %cst_75 = arith.constant dense<0.000000e+00> : vector<8xf32>
    %147 = vector.multi_reduction <add>, %146, %cst_75 [1] : vector<8x8xf32> to vector<8xf32>
    %148 = vector.shape_cast %147 : vector<8xf32> to vector<8x1xf32>
    %149 = tpu.reciprocal %148 {approx = true} : vector<8x1xf32> -> vector<8x1xf32>
    %150 = vector.broadcast %149 : vector<8x1xf32> to vector<8x8xf32>
    %151 = arith.mulf %146, %150 : vector<8x8xf32>
    %152 = arith.truncf %151 : vector<8x8xf32> to vector<8x8xbf16>
    %cst_76 = arith.constant dense<0.000000e+00> : vector<8x8xf32>
    %153 = tpu.matmul %152, %135, %cst_76 {dimension_numbers = #tpu.dot_dimension_numbers<[1], [0], [0], [1], [0, 0, 1, 1], [], []>} : vector<8x8xbf16>, vector<8x8xbf16>, vector<8x8xf32> -> vector<8x8xf32>
    %154 = tpu.concatenate %132, %153 in 0 : vector<8x8xf32>, vector<8x8xf32> -> vector<16x8xf32>
    %155 = arith.truncf %154 : vector<16x8xf32> to vector<16x8xbf16>
    %c1_77 = arith.constant 1 : index
    %c0_78 = arith.constant 0 : index
    %c0_79 = arith.constant 0 : index
    %156 = vector.load %arg6[%c1_77, %c0_78, %c0_79] : memref<4x8x32xbf16, #tpu.memory_space<vmem>>, vector<1x8x32xbf16>
    %157 = vector.shape_cast %156 : vector<1x8x32xbf16> to vector<8x32xbf16>
    %cst_80 = arith.constant dense<0.000000e+00> : vector<16x32xf32>
    %158 = tpu.matmul %155, %157, %cst_80 {dimension_numbers = #tpu.dot_dimension_numbers<[1], [0], [0], [1], [0, 0, 1, 1], [], []>} : vector<16x8xbf16>, vector<8x32xbf16>, vector<16x32xf32> -> vector<16x32xf32>
    %159 = arith.addf %87, %158 : vector<16x32xf32>
    %c2 = arith.constant 2 : index
    %c0_81 = arith.constant 0 : index
    %c0_82 = arith.constant 0 : index
    %160 = vector.load %arg4[%c2, %c0_81, %c0_82] : memref<12x32x8xbf16, #tpu.memory_space<vmem>>, vector<1x32x8xbf16>
    %161 = vector.shape_cast %160 : vector<1x32x8xbf16> to vector<32x8xbf16>
    %c6 = arith.constant 6 : index
    %c0_83 = arith.constant 0 : index
    %c0_84 = arith.constant 0 : index
    %162 = vector.load %arg4[%c6, %c0_83, %c0_84] : memref<12x32x8xbf16, #tpu.memory_space<vmem>>, vector<1x32x8xbf16>
    %163 = vector.shape_cast %162 : vector<1x32x8xbf16> to vector<32x8xbf16>
    %c10 = arith.constant 10 : index
    %c0_85 = arith.constant 0 : index
    %c0_86 = arith.constant 0 : index
    %164 = vector.load %arg4[%c10, %c0_85, %c0_86] : memref<12x32x8xbf16, #tpu.memory_space<vmem>>, vector<1x32x8xbf16>
    %165 = vector.shape_cast %164 : vector<1x32x8xbf16> to vector<32x8xbf16>
    %c2_87 = arith.constant 2 : index
    %c0_88 = arith.constant 0 : index
    %c0_89 = arith.constant 0 : index
    %166 = vector.load %arg5[%c2_87, %c0_88, %c0_89] : memref<12x1x8xf32, #tpu.memory_space<vmem>>, vector<1x1x8xf32>
    %167 = vector.shape_cast %166 : vector<1x1x8xf32> to vector<1x8xf32>
    %c6_90 = arith.constant 6 : index
    %c0_91 = arith.constant 0 : index
    %c0_92 = arith.constant 0 : index
    %168 = vector.load %arg5[%c6_90, %c0_91, %c0_92] : memref<12x1x8xf32, #tpu.memory_space<vmem>>, vector<1x1x8xf32>
    %169 = vector.shape_cast %168 : vector<1x1x8xf32> to vector<1x8xf32>
    %c10_93 = arith.constant 10 : index
    %c0_94 = arith.constant 0 : index
    %c0_95 = arith.constant 0 : index
    %170 = vector.load %arg5[%c10_93, %c0_94, %c0_95] : memref<12x1x8xf32, #tpu.memory_space<vmem>>, vector<1x1x8xf32>
    %171 = vector.shape_cast %170 : vector<1x1x8xf32> to vector<1x8xf32>
    %cst_96 = arith.constant dense<0.000000e+00> : vector<16x8xf32>
    %172 = tpu.matmul %15, %161, %cst_96 {dimension_numbers = #tpu.dot_dimension_numbers<[1], [0], [0], [1], [0, 0, 1, 1], [], []>} : vector<16x32xbf16>, vector<32x8xbf16>, vector<16x8xf32> -> vector<16x8xf32>
    %173 = vector.broadcast %167 : vector<1x8xf32> to vector<16x8xf32>
    %174 = arith.addf %172, %173 : vector<16x8xf32>
    %175 = arith.truncf %174 : vector<16x8xf32> to vector<16x8xbf16>
    %cst_97 = arith.constant dense<0.000000e+00> : vector<16x8xf32>
    %176 = tpu.matmul %16, %163, %cst_97 {dimension_numbers = #tpu.dot_dimension_numbers<[1], [0], [0], [1], [0, 0, 1, 1], [], []>} : vector<16x32xbf16>, vector<32x8xbf16>, vector<16x8xf32> -> vector<16x8xf32>
    %177 = vector.broadcast %169 : vector<1x8xf32> to vector<16x8xf32>
    %178 = arith.addf %176, %177 : vector<16x8xf32>
    %179 = arith.truncf %178 : vector<16x8xf32> to vector<16x8xbf16>
    %cst_98 = arith.constant dense<0.000000e+00> : vector<16x8xf32>
    %180 = tpu.matmul %16, %165, %cst_98 {dimension_numbers = #tpu.dot_dimension_numbers<[1], [0], [0], [1], [0, 0, 1, 1], [], []>} : vector<16x32xbf16>, vector<32x8xbf16>, vector<16x8xf32> -> vector<16x8xf32>
    %181 = vector.broadcast %171 : vector<1x8xf32> to vector<16x8xf32>
    %182 = arith.addf %180, %181 : vector<16x8xf32>
    %183 = arith.truncf %182 : vector<16x8xf32> to vector<16x8xbf16>
    %184 = vector.extract_strided_slice %175 {offsets = [0, 0], sizes = [8, 8], strides = [1, 1]} : vector<16x8xbf16> to vector<8x8xbf16>
    %185 = vector.extract_strided_slice %179 {offsets = [0, 0], sizes = [8, 8], strides = [1, 1]} : vector<16x8xbf16> to vector<8x8xbf16>
    %186 = vector.extract_strided_slice %183 {offsets = [0, 0], sizes = [8, 8], strides = [1, 1]} : vector<16x8xbf16> to vector<8x8xbf16>
    %cst_99 = arith.constant dense<0.000000e+00> : vector<8x8xf32>
    %187 = tpu.matmul %184, %185, %cst_99 {dimension_numbers = #tpu.dot_dimension_numbers<[1], [1], [0], [0], [0, 0, 1, 0], [], []>} : vector<8x8xbf16>, vector<8x8xbf16>, vector<8x8xf32> -> vector<8x8xf32>
    %cst_100 = arith.constant 0.353553385 : f32
    %188 = vector.broadcast %cst_100 : f32 to vector<8x8xf32>
    %189 = arith.mulf %187, %188 : vector<8x8xf32>
    %190 = vector.extract_strided_slice %7 {offsets = [0, 0, 0], sizes = [1, 8, 8], strides = [1, 1, 1]} : vector<2x8x8xf32> to vector<1x8x8xf32>
    %191 = vector.shape_cast %190 : vector<1x8x8xf32> to vector<8x8xf32>
    %192 = arith.addf %189, %191 : vector<8x8xf32>
    %cst_101 = arith.constant dense<0xFF800000> : vector<8xf32>
    %193 = vector.multi_reduction <maximumf>, %192, %cst_101 [1] : vector<8x8xf32> to vector<8xf32>
    %194 = vector.shape_cast %193 : vector<8xf32> to vector<8x1xf32>
    %195 = vector.broadcast %194 : vector<8x1xf32> to vector<8x8xf32>
    %196 = arith.subf %192, %195 : vector<8x8xf32>
    %197 = math.exp %196 : vector<8x8xf32>
    %cst_102 = arith.constant dense<0.000000e+00> : vector<8xf32>
    %198 = vector.multi_reduction <add>, %197, %cst_102 [1] : vector<8x8xf32> to vector<8xf32>
    %199 = vector.shape_cast %198 : vector<8xf32> to vector<8x1xf32>
    %200 = tpu.reciprocal %199 {approx = true} : vector<8x1xf32> -> vector<8x1xf32>
    %201 = vector.broadcast %200 : vector<8x1xf32> to vector<8x8xf32>
    %202 = arith.mulf %197, %201 : vector<8x8xf32>
    %203 = arith.truncf %202 : vector<8x8xf32> to vector<8x8xbf16>
    %cst_103 = arith.constant dense<0.000000e+00> : vector<8x8xf32>
    %204 = tpu.matmul %203, %186, %cst_103 {dimension_numbers = #tpu.dot_dimension_numbers<[1], [0], [0], [1], [0, 0, 1, 1], [], []>} : vector<8x8xbf16>, vector<8x8xbf16>, vector<8x8xf32> -> vector<8x8xf32>
    %205 = vector.extract_strided_slice %175 {offsets = [8, 0], sizes = [8, 8], strides = [1, 1]} : vector<16x8xbf16> to vector<8x8xbf16>
    %206 = vector.extract_strided_slice %179 {offsets = [8, 0], sizes = [8, 8], strides = [1, 1]} : vector<16x8xbf16> to vector<8x8xbf16>
    %207 = vector.extract_strided_slice %183 {offsets = [8, 0], sizes = [8, 8], strides = [1, 1]} : vector<16x8xbf16> to vector<8x8xbf16>
    %cst_104 = arith.constant dense<0.000000e+00> : vector<8x8xf32>
    %208 = tpu.matmul %205, %206, %cst_104 {dimension_numbers = #tpu.dot_dimension_numbers<[1], [1], [0], [0], [0, 0, 1, 0], [], []>} : vector<8x8xbf16>, vector<8x8xbf16>, vector<8x8xf32> -> vector<8x8xf32>
    %cst_105 = arith.constant 0.353553385 : f32
    %209 = vector.broadcast %cst_105 : f32 to vector<8x8xf32>
    %210 = arith.mulf %208, %209 : vector<8x8xf32>
    %211 = vector.extract_strided_slice %7 {offsets = [1, 0, 0], sizes = [1, 8, 8], strides = [1, 1, 1]} : vector<2x8x8xf32> to vector<1x8x8xf32>
    %212 = vector.shape_cast %211 : vector<1x8x8xf32> to vector<8x8xf32>
    %213 = arith.addf %210, %212 : vector<8x8xf32>
    %cst_106 = arith.constant dense<0xFF800000> : vector<8xf32>
    %214 = vector.multi_reduction <maximumf>, %213, %cst_106 [1] : vector<8x8xf32> to vector<8xf32>
    %215 = vector.shape_cast %214 : vector<8xf32> to vector<8x1xf32>
    %216 = vector.broadcast %215 : vector<8x1xf32> to vector<8x8xf32>
    %217 = arith.subf %213, %216 : vector<8x8xf32>
    %218 = math.exp %217 : vector<8x8xf32>
    %cst_107 = arith.constant dense<0.000000e+00> : vector<8xf32>
    %219 = vector.multi_reduction <add>, %218, %cst_107 [1] : vector<8x8xf32> to vector<8xf32>
    %220 = vector.shape_cast %219 : vector<8xf32> to vector<8x1xf32>
    %221 = tpu.reciprocal %220 {approx = true} : vector<8x1xf32> -> vector<8x1xf32>
    %222 = vector.broadcast %221 : vector<8x1xf32> to vector<8x8xf32>
    %223 = arith.mulf %218, %222 : vector<8x8xf32>
    %224 = arith.truncf %223 : vector<8x8xf32> to vector<8x8xbf16>
    %cst_108 = arith.constant dense<0.000000e+00> : vector<8x8xf32>
    %225 = tpu.matmul %224, %207, %cst_108 {dimension_numbers = #tpu.dot_dimension_numbers<[1], [0], [0], [1], [0, 0, 1, 1], [], []>} : vector<8x8xbf16>, vector<8x8xbf16>, vector<8x8xf32> -> vector<8x8xf32>
    %226 = tpu.concatenate %204, %225 in 0 : vector<8x8xf32>, vector<8x8xf32> -> vector<16x8xf32>
    %227 = arith.truncf %226 : vector<16x8xf32> to vector<16x8xbf16>
    %c2_109 = arith.constant 2 : index
    %c0_110 = arith.constant 0 : index
    %c0_111 = arith.constant 0 : index
    %228 = vector.load %arg6[%c2_109, %c0_110, %c0_111] : memref<4x8x32xbf16, #tpu.memory_space<vmem>>, vector<1x8x32xbf16>
    %229 = vector.shape_cast %228 : vector<1x8x32xbf16> to vector<8x32xbf16>
    %cst_112 = arith.constant dense<0.000000e+00> : vector<16x32xf32>
    %230 = tpu.matmul %227, %229, %cst_112 {dimension_numbers = #tpu.dot_dimension_numbers<[1], [0], [0], [1], [0, 0, 1, 1], [], []>} : vector<16x8xbf16>, vector<8x32xbf16>, vector<16x32xf32> -> vector<16x32xf32>
    %231 = arith.addf %159, %230 : vector<16x32xf32>
    %c3 = arith.constant 3 : index
    %c0_113 = arith.constant 0 : index
    %c0_114 = arith.constant 0 : index
    %232 = vector.load %arg4[%c3, %c0_113, %c0_114] : memref<12x32x8xbf16, #tpu.memory_space<vmem>>, vector<1x32x8xbf16>
    %233 = vector.shape_cast %232 : vector<1x32x8xbf16> to vector<32x8xbf16>
    %c7 = arith.constant 7 : index
    %c0_115 = arith.constant 0 : index
    %c0_116 = arith.constant 0 : index
    %234 = vector.load %arg4[%c7, %c0_115, %c0_116] : memref<12x32x8xbf16, #tpu.memory_space<vmem>>, vector<1x32x8xbf16>
    %235 = vector.shape_cast %234 : vector<1x32x8xbf16> to vector<32x8xbf16>
    %c11 = arith.constant 11 : index
    %c0_117 = arith.constant 0 : index
    %c0_118 = arith.constant 0 : index
    %236 = vector.load %arg4[%c11, %c0_117, %c0_118] : memref<12x32x8xbf16, #tpu.memory_space<vmem>>, vector<1x32x8xbf16>
    %237 = vector.shape_cast %236 : vector<1x32x8xbf16> to vector<32x8xbf16>
    %c3_119 = arith.constant 3 : index
    %c0_120 = arith.constant 0 : index
    %c0_121 = arith.constant 0 : index
    %238 = vector.load %arg5[%c3_119, %c0_120, %c0_121] : memref<12x1x8xf32, #tpu.memory_space<vmem>>, vector<1x1x8xf32>
    %239 = vector.shape_cast %238 : vector<1x1x8xf32> to vector<1x8xf32>
    %c7_122 = arith.constant 7 : index
    %c0_123 = arith.constant 0 : index
    %c0_124 = arith.constant 0 : index
    %240 = vector.load %arg5[%c7_122, %c0_123, %c0_124] : memref<12x1x8xf32, #tpu.memory_space<vmem>>, vector<1x1x8xf32>
    %241 = vector.shape_cast %240 : vector<1x1x8xf32> to vector<1x8xf32>
    %c11_125 = arith.constant 11 : index
    %c0_126 = arith.constant 0 : index
    %c0_127 = arith.constant 0 : index
    %242 = vector.load %arg5[%c11_125, %c0_126, %c0_127] : memref<12x1x8xf32, #tpu.memory_space<vmem>>, vector<1x1x8xf32>
    %243 = vector.shape_cast %242 : vector<1x1x8xf32> to vector<1x8xf32>
    %cst_128 = arith.constant dense<0.000000e+00> : vector<16x8xf32>
    %244 = tpu.matmul %15, %233, %cst_128 {dimension_numbers = #tpu.dot_dimension_numbers<[1], [0], [0], [1], [0, 0, 1, 1], [], []>} : vector<16x32xbf16>, vector<32x8xbf16>, vector<16x8xf32> -> vector<16x8xf32>
    %245 = vector.broadcast %239 : vector<1x8xf32> to vector<16x8xf32>
    %246 = arith.addf %244, %245 : vector<16x8xf32>
    %247 = arith.truncf %246 : vector<16x8xf32> to vector<16x8xbf16>
    %cst_129 = arith.constant dense<0.000000e+00> : vector<16x8xf32>
    %248 = tpu.matmul %16, %235, %cst_129 {dimension_numbers = #tpu.dot_dimension_numbers<[1], [0], [0], [1], [0, 0, 1, 1], [], []>} : vector<16x32xbf16>, vector<32x8xbf16>, vector<16x8xf32> -> vector<16x8xf32>
    %249 = vector.broadcast %241 : vector<1x8xf32> to vector<16x8xf32>
    %250 = arith.addf %248, %249 : vector<16x8xf32>
    %251 = arith.truncf %250 : vector<16x8xf32> to vector<16x8xbf16>
    %cst_130 = arith.constant dense<0.000000e+00> : vector<16x8xf32>
    %252 = tpu.matmul %16, %237, %cst_130 {dimension_numbers = #tpu.dot_dimension_numbers<[1], [0], [0], [1], [0, 0, 1, 1], [], []>} : vector<16x32xbf16>, vector<32x8xbf16>, vector<16x8xf32> -> vector<16x8xf32>
    %253 = vector.broadcast %243 : vector<1x8xf32> to vector<16x8xf32>
    %254 = arith.addf %252, %253 : vector<16x8xf32>
    %255 = arith.truncf %254 : vector<16x8xf32> to vector<16x8xbf16>
    %256 = vector.extract_strided_slice %247 {offsets = [0, 0], sizes = [8, 8], strides = [1, 1]} : vector<16x8xbf16> to vector<8x8xbf16>
    %257 = vector.extract_strided_slice %251 {offsets = [0, 0], sizes = [8, 8], strides = [1, 1]} : vector<16x8xbf16> to vector<8x8xbf16>
    %258 = vector.extract_strided_slice %255 {offsets = [0, 0], sizes = [8, 8], strides = [1, 1]} : vector<16x8xbf16> to vector<8x8xbf16>
    %cst_131 = arith.constant dense<0.000000e+00> : vector<8x8xf32>
    %259 = tpu.matmul %256, %257, %cst_131 {dimension_numbers = #tpu.dot_dimension_numbers<[1], [1], [0], [0], [0, 0, 1, 0], [], []>} : vector<8x8xbf16>, vector<8x8xbf16>, vector<8x8xf32> -> vector<8x8xf32>
    %cst_132 = arith.constant 0.353553385 : f32
    %260 = vector.broadcast %cst_132 : f32 to vector<8x8xf32>
    %261 = arith.mulf %259, %260 : vector<8x8xf32>
    %262 = vector.extract_strided_slice %7 {offsets = [0, 0, 0], sizes = [1, 8, 8], strides = [1, 1, 1]} : vector<2x8x8xf32> to vector<1x8x8xf32>
    %263 = vector.shape_cast %262 : vector<1x8x8xf32> to vector<8x8xf32>
    %264 = arith.addf %261, %263 : vector<8x8xf32>
    %cst_133 = arith.constant dense<0xFF800000> : vector<8xf32>
    %265 = vector.multi_reduction <maximumf>, %264, %cst_133 [1] : vector<8x8xf32> to vector<8xf32>
    %266 = vector.shape_cast %265 : vector<8xf32> to vector<8x1xf32>
    %267 = vector.broadcast %266 : vector<8x1xf32> to vector<8x8xf32>
    %268 = arith.subf %264, %267 : vector<8x8xf32>
    %269 = math.exp %268 : vector<8x8xf32>
    %cst_134 = arith.constant dense<0.000000e+00> : vector<8xf32>
    %270 = vector.multi_reduction <add>, %269, %cst_134 [1] : vector<8x8xf32> to vector<8xf32>
    %271 = vector.shape_cast %270 : vector<8xf32> to vector<8x1xf32>
    %272 = tpu.reciprocal %271 {approx = true} : vector<8x1xf32> -> vector<8x1xf32>
    %273 = vector.broadcast %272 : vector<8x1xf32> to vector<8x8xf32>
    %274 = arith.mulf %269, %273 : vector<8x8xf32>
    %275 = arith.truncf %274 : vector<8x8xf32> to vector<8x8xbf16>
    %cst_135 = arith.constant dense<0.000000e+00> : vector<8x8xf32>
    %276 = tpu.matmul %275, %258, %cst_135 {dimension_numbers = #tpu.dot_dimension_numbers<[1], [0], [0], [1], [0, 0, 1, 1], [], []>} : vector<8x8xbf16>, vector<8x8xbf16>, vector<8x8xf32> -> vector<8x8xf32>
    %277 = vector.extract_strided_slice %247 {offsets = [8, 0], sizes = [8, 8], strides = [1, 1]} : vector<16x8xbf16> to vector<8x8xbf16>
    %278 = vector.extract_strided_slice %251 {offsets = [8, 0], sizes = [8, 8], strides = [1, 1]} : vector<16x8xbf16> to vector<8x8xbf16>
    %279 = vector.extract_strided_slice %255 {offsets = [8, 0], sizes = [8, 8], strides = [1, 1]} : vector<16x8xbf16> to vector<8x8xbf16>
    %cst_136 = arith.constant dense<0.000000e+00> : vector<8x8xf32>
    %280 = tpu.matmul %277, %278, %cst_136 {dimension_numbers = #tpu.dot_dimension_numbers<[1], [1], [0], [0], [0, 0, 1, 0], [], []>} : vector<8x8xbf16>, vector<8x8xbf16>, vector<8x8xf32> -> vector<8x8xf32>
    %cst_137 = arith.constant 0.353553385 : f32
    %281 = vector.broadcast %cst_137 : f32 to vector<8x8xf32>
    %282 = arith.mulf %280, %281 : vector<8x8xf32>
    %283 = vector.extract_strided_slice %7 {offsets = [1, 0, 0], sizes = [1, 8, 8], strides = [1, 1, 1]} : vector<2x8x8xf32> to vector<1x8x8xf32>
    %284 = vector.shape_cast %283 : vector<1x8x8xf32> to vector<8x8xf32>
    %285 = arith.addf %282, %284 : vector<8x8xf32>
    %cst_138 = arith.constant dense<0xFF800000> : vector<8xf32>
    %286 = vector.multi_reduction <maximumf>, %285, %cst_138 [1] : vector<8x8xf32> to vector<8xf32>
    %287 = vector.shape_cast %286 : vector<8xf32> to vector<8x1xf32>
    %288 = vector.broadcast %287 : vector<8x1xf32> to vector<8x8xf32>
    %289 = arith.subf %285, %288 : vector<8x8xf32>
    %290 = math.exp %289 : vector<8x8xf32>
    %cst_139 = arith.constant dense<0.000000e+00> : vector<8xf32>
    %291 = vector.multi_reduction <add>, %290, %cst_139 [1] : vector<8x8xf32> to vector<8xf32>
    %292 = vector.shape_cast %291 : vector<8xf32> to vector<8x1xf32>
    %293 = tpu.reciprocal %292 {approx = true} : vector<8x1xf32> -> vector<8x1xf32>
    %294 = vector.broadcast %293 : vector<8x1xf32> to vector<8x8xf32>
    %295 = arith.mulf %290, %294 : vector<8x8xf32>
    %296 = arith.truncf %295 : vector<8x8xf32> to vector<8x8xbf16>
    %cst_140 = arith.constant dense<0.000000e+00> : vector<8x8xf32>
    %297 = tpu.matmul %296, %279, %cst_140 {dimension_numbers = #tpu.dot_dimension_numbers<[1], [0], [0], [1], [0, 0, 1, 1], [], []>} : vector<8x8xbf16>, vector<8x8xbf16>, vector<8x8xf32> -> vector<8x8xf32>
    %298 = tpu.concatenate %276, %297 in 0 : vector<8x8xf32>, vector<8x8xf32> -> vector<16x8xf32>
    %299 = arith.truncf %298 : vector<16x8xf32> to vector<16x8xbf16>
    %c3_141 = arith.constant 3 : index
    %c0_142 = arith.constant 0 : index
    %c0_143 = arith.constant 0 : index
    %300 = vector.load %arg6[%c3_141, %c0_142, %c0_143] : memref<4x8x32xbf16, #tpu.memory_space<vmem>>, vector<1x8x32xbf16>
    %301 = vector.shape_cast %300 : vector<1x8x32xbf16> to vector<8x32xbf16>
    %cst_144 = arith.constant dense<0.000000e+00> : vector<16x32xf32>
    %302 = tpu.matmul %299, %301, %cst_144 {dimension_numbers = #tpu.dot_dimension_numbers<[1], [0], [0], [1], [0, 0, 1, 1], [], []>} : vector<16x8xbf16>, vector<8x32xbf16>, vector<16x32xf32> -> vector<16x32xf32>
    %303 = arith.addf %231, %302 : vector<16x32xf32>
    %304 = vector.broadcast %14 : vector<1x32xf32> to vector<16x32xf32>
    %305 = arith.addf %303, %304 : vector<16x32xf32>
    %306 = arith.addf %0, %305 : vector<16x32xf32>
    %c0_145 = arith.constant 0 : index
    %c0_146 = arith.constant 0 : index
    %c0_147 = arith.constant 0 : index
    %307 = vector.load %arg12[%c0_145, %c0_146, %c0_147] : memref<3x1x32xf32, #tpu.memory_space<vmem>>, vector<1x1x32xf32>
    %308 = vector.shape_cast %307 : vector<1x1x32xf32> to vector<1x32xf32>
    %c0_148 = arith.constant 0 : index
    %c0_149 = arith.constant 0 : index
    %c0_150 = arith.constant 0 : index
    %309 = vector.load %arg13[%c0_148, %c0_149, %c0_150] : memref<3x1x32xf32, #tpu.memory_space<vmem>>, vector<1x1x32xf32>
    %310 = vector.shape_cast %309 : vector<1x1x32xf32> to vector<1x32xf32>
    %cst_151 = arith.constant dense<0.000000e+00> : vector<16xf32>
    %311 = vector.multi_reduction <add>, %306, %cst_151 [1] : vector<16x32xf32> to vector<16xf32>
    %312 = vector.shape_cast %311 : vector<16xf32> to vector<16x1xf32>
    %cst_152 = arith.constant 3.200000e+01 : f32
    %313 = vector.broadcast %cst_152 : f32 to vector<16x1xf32>
    %314 = arith.divf %312, %313 : vector<16x1xf32>
    %315 = vector.broadcast %314 : vector<16x1xf32> to vector<16x32xf32>
    %316 = arith.subf %306, %315 : vector<16x32xf32>
    %317 = vector.broadcast %314 : vector<16x1xf32> to vector<16x32xf32>
    %318 = arith.subf %306, %317 : vector<16x32xf32>
    %319 = arith.mulf %316, %318 : vector<16x32xf32>
    %cst_153 = arith.constant dense<0.000000e+00> : vector<16xf32>
    %320 = vector.multi_reduction <add>, %319, %cst_153 [1] : vector<16x32xf32> to vector<16xf32>
    %321 = vector.shape_cast %320 : vector<16xf32> to vector<16x1xf32>
    %cst_154 = arith.constant 3.200000e+01 : f32
    %322 = vector.broadcast %cst_154 : f32 to vector<16x1xf32>
    %323 = arith.divf %321, %322 : vector<16x1xf32>
    %324 = vector.broadcast %314 : vector<16x1xf32> to vector<16x32xf32>
    %325 = arith.subf %306, %324 : vector<16x32xf32>
    %326 = vector.broadcast %308 : vector<1x32xf32> to vector<16x32xf32>
    %327 = arith.mulf %326, %325 : vector<16x32xf32>
    %cst_155 = arith.constant 9.99999997E-7 : f32
    %328 = vector.broadcast %cst_155 : f32 to vector<16x1xf32>
    %329 = arith.addf %323, %328 : vector<16x1xf32>
    %330 = math.rsqrt %329 : vector<16x1xf32>
    %331 = vector.broadcast %330 : vector<16x1xf32> to vector<16x32xf32>
    %332 = arith.mulf %327, %331 : vector<16x32xf32>
    %333 = vector.broadcast %310 : vector<1x32xf32> to vector<16x32xf32>
    %334 = arith.addf %332, %333 : vector<16x32xf32>
    %335 = arith.truncf %334 : vector<16x32xf32> to vector<16x32xbf16>
    %336 = arith.truncf %1 : vector<16x32xf32> to vector<16x32xbf16>
    %c0_156 = arith.constant 0 : index
    %c0_157 = arith.constant 0 : index
    %c0_158 = arith.constant 0 : index
    %337 = vector.load %arg4[%c0_156, %c0_157, %c0_158] : memref<12x32x8xbf16, #tpu.memory_space<vmem>>, vector<1x32x8xbf16>
    %338 = vector.shape_cast %337 : vector<1x32x8xbf16> to vector<32x8xbf16>
    %c4_159 = arith.constant 4 : index
    %c0_160 = arith.constant 0 : index
    %c0_161 = arith.constant 0 : index
    %339 = vector.load %arg4[%c4_159, %c0_160, %c0_161] : memref<12x32x8xbf16, #tpu.memory_space<vmem>>, vector<1x32x8xbf16>
    %340 = vector.shape_cast %339 : vector<1x32x8xbf16> to vector<32x8xbf16>
    %c8_162 = arith.constant 8 : index
    %c0_163 = arith.constant 0 : index
    %c0_164 = arith.constant 0 : index
    %341 = vector.load %arg4[%c8_162, %c0_163, %c0_164] : memref<12x32x8xbf16, #tpu.memory_space<vmem>>, vector<1x32x8xbf16>
    %342 = vector.shape_cast %341 : vector<1x32x8xbf16> to vector<32x8xbf16>
    %c0_165 = arith.constant 0 : index
    %c0_166 = arith.constant 0 : index
    %c0_167 = arith.constant 0 : index
    %343 = vector.load %arg5[%c0_165, %c0_166, %c0_167] : memref<12x1x8xf32, #tpu.memory_space<vmem>>, vector<1x1x8xf32>
    %344 = vector.shape_cast %343 : vector<1x1x8xf32> to vector<1x8xf32>
    %c4_168 = arith.constant 4 : index
    %c0_169 = arith.constant 0 : index
    %c0_170 = arith.constant 0 : index
    %345 = vector.load %arg5[%c4_168, %c0_169, %c0_170] : memref<12x1x8xf32, #tpu.memory_space<vmem>>, vector<1x1x8xf32>
    %346 = vector.shape_cast %345 : vector<1x1x8xf32> to vector<1x8xf32>
    %c8_171 = arith.constant 8 : index
    %c0_172 = arith.constant 0 : index
    %c0_173 = arith.constant 0 : index
    %347 = vector.load %arg5[%c8_171, %c0_172, %c0_173] : memref<12x1x8xf32, #tpu.memory_space<vmem>>, vector<1x1x8xf32>
    %348 = vector.shape_cast %347 : vector<1x1x8xf32> to vector<1x8xf32>
    %cst_174 = arith.constant dense<0.000000e+00> : vector<16x8xf32>
    %349 = tpu.matmul %335, %338, %cst_174 {dimension_numbers = #tpu.dot_dimension_numbers<[1], [0], [0], [1], [0, 0, 1, 1], [], []>} : vector<16x32xbf16>, vector<32x8xbf16>, vector<16x8xf32> -> vector<16x8xf32>
    %350 = vector.broadcast %344 : vector<1x8xf32> to vector<16x8xf32>
    %351 = arith.addf %349, %350 : vector<16x8xf32>
    %352 = arith.truncf %351 : vector<16x8xf32> to vector<16x8xbf16>
    %cst_175 = arith.constant dense<0.000000e+00> : vector<16x8xf32>
    %353 = tpu.matmul %336, %340, %cst_175 {dimension_numbers = #tpu.dot_dimension_numbers<[1], [0], [0], [1], [0, 0, 1, 1], [], []>} : vector<16x32xbf16>, vector<32x8xbf16>, vector<16x8xf32> -> vector<16x8xf32>
    %354 = vector.broadcast %346 : vector<1x8xf32> to vector<16x8xf32>
    %355 = arith.addf %353, %354 : vector<16x8xf32>
    %356 = arith.truncf %355 : vector<16x8xf32> to vector<16x8xbf16>
    %cst_176 = arith.constant dense<0.000000e+00> : vector<16x8xf32>
    %357 = tpu.matmul %336, %342, %cst_176 {dimension_numbers = #tpu.dot_dimension_numbers<[1], [0], [0], [1], [0, 0, 1, 1], [], []>} : vector<16x32xbf16>, vector<32x8xbf16>, vector<16x8xf32> -> vector<16x8xf32>
    %358 = vector.broadcast %348 : vector<1x8xf32> to vector<16x8xf32>
    %359 = arith.addf %357, %358 : vector<16x8xf32>
    %360 = arith.truncf %359 : vector<16x8xf32> to vector<16x8xbf16>
    %361 = vector.extract_strided_slice %352 {offsets = [0, 0], sizes = [8, 8], strides = [1, 1]} : vector<16x8xbf16> to vector<8x8xbf16>
    %362 = vector.extract_strided_slice %356 {offsets = [0, 0], sizes = [8, 8], strides = [1, 1]} : vector<16x8xbf16> to vector<8x8xbf16>
    %363 = vector.extract_strided_slice %360 {offsets = [0, 0], sizes = [8, 8], strides = [1, 1]} : vector<16x8xbf16> to vector<8x8xbf16>
    %cst_177 = arith.constant dense<0.000000e+00> : vector<8x8xf32>
    %364 = tpu.matmul %361, %362, %cst_177 {dimension_numbers = #tpu.dot_dimension_numbers<[1], [1], [0], [0], [0, 0, 1, 0], [], []>} : vector<8x8xbf16>, vector<8x8xbf16>, vector<8x8xf32> -> vector<8x8xf32>
    %cst_178 = arith.constant 0.353553385 : f32
    %365 = vector.broadcast %cst_178 : f32 to vector<8x8xf32>
    %366 = arith.mulf %364, %365 : vector<8x8xf32>
    %367 = vector.extract_strided_slice %13 {offsets = [0, 0, 0], sizes = [1, 1, 8], strides = [1, 1, 1]} : vector<2x1x8xf32> to vector<1x1x8xf32>
    %368 = vector.shape_cast %367 : vector<1x1x8xf32> to vector<1x8xf32>
    %369 = vector.broadcast %368 : vector<1x8xf32> to vector<8x8xf32>
    %370 = arith.addf %366, %369 : vector<8x8xf32>
    %cst_179 = arith.constant dense<0xFF800000> : vector<8xf32>
    %371 = vector.multi_reduction <maximumf>, %370, %cst_179 [1] : vector<8x8xf32> to vector<8xf32>
    %372 = vector.shape_cast %371 : vector<8xf32> to vector<8x1xf32>
    %373 = vector.broadcast %372 : vector<8x1xf32> to vector<8x8xf32>
    %374 = arith.subf %370, %373 : vector<8x8xf32>
    %375 = math.exp %374 : vector<8x8xf32>
    %cst_180 = arith.constant dense<0.000000e+00> : vector<8xf32>
    %376 = vector.multi_reduction <add>, %375, %cst_180 [1] : vector<8x8xf32> to vector<8xf32>
    %377 = vector.shape_cast %376 : vector<8xf32> to vector<8x1xf32>
    %378 = tpu.reciprocal %377 {approx = true} : vector<8x1xf32> -> vector<8x1xf32>
    %379 = vector.broadcast %378 : vector<8x1xf32> to vector<8x8xf32>
    %380 = arith.mulf %375, %379 : vector<8x8xf32>
    %381 = arith.truncf %380 : vector<8x8xf32> to vector<8x8xbf16>
    %cst_181 = arith.constant dense<0.000000e+00> : vector<8x8xf32>
    %382 = tpu.matmul %381, %363, %cst_181 {dimension_numbers = #tpu.dot_dimension_numbers<[1], [0], [0], [1], [0, 0, 1, 1], [], []>} : vector<8x8xbf16>, vector<8x8xbf16>, vector<8x8xf32> -> vector<8x8xf32>
    %383 = vector.extract_strided_slice %352 {offsets = [8, 0], sizes = [8, 8], strides = [1, 1]} : vector<16x8xbf16> to vector<8x8xbf16>
    %384 = vector.extract_strided_slice %356 {offsets = [8, 0], sizes = [8, 8], strides = [1, 1]} : vector<16x8xbf16> to vector<8x8xbf16>
    %385 = vector.extract_strided_slice %360 {offsets = [8, 0], sizes = [8, 8], strides = [1, 1]} : vector<16x8xbf16> to vector<8x8xbf16>
    %cst_182 = arith.constant dense<0.000000e+00> : vector<8x8xf32>
    %386 = tpu.matmul %383, %384, %cst_182 {dimension_numbers = #tpu.dot_dimension_numbers<[1], [1], [0], [0], [0, 0, 1, 0], [], []>} : vector<8x8xbf16>, vector<8x8xbf16>, vector<8x8xf32> -> vector<8x8xf32>
    %cst_183 = arith.constant 0.353553385 : f32
    %387 = vector.broadcast %cst_183 : f32 to vector<8x8xf32>
    %388 = arith.mulf %386, %387 : vector<8x8xf32>
    %389 = vector.extract_strided_slice %13 {offsets = [1, 0, 0], sizes = [1, 1, 8], strides = [1, 1, 1]} : vector<2x1x8xf32> to vector<1x1x8xf32>
    %390 = vector.shape_cast %389 : vector<1x1x8xf32> to vector<1x8xf32>
    %391 = vector.broadcast %390 : vector<1x8xf32> to vector<8x8xf32>
    %392 = arith.addf %388, %391 : vector<8x8xf32>
    %cst_184 = arith.constant dense<0xFF800000> : vector<8xf32>
    %393 = vector.multi_reduction <maximumf>, %392, %cst_184 [1] : vector<8x8xf32> to vector<8xf32>
    %394 = vector.shape_cast %393 : vector<8xf32> to vector<8x1xf32>
    %395 = vector.broadcast %394 : vector<8x1xf32> to vector<8x8xf32>
    %396 = arith.subf %392, %395 : vector<8x8xf32>
    %397 = math.exp %396 : vector<8x8xf32>
    %cst_185 = arith.constant dense<0.000000e+00> : vector<8xf32>
    %398 = vector.multi_reduction <add>, %397, %cst_185 [1] : vector<8x8xf32> to vector<8xf32>
    %399 = vector.shape_cast %398 : vector<8xf32> to vector<8x1xf32>
    %400 = tpu.reciprocal %399 {approx = true} : vector<8x1xf32> -> vector<8x1xf32>
    %401 = vector.broadcast %400 : vector<8x1xf32> to vector<8x8xf32>
    %402 = arith.mulf %397, %401 : vector<8x8xf32>
    %403 = arith.truncf %402 : vector<8x8xf32> to vector<8x8xbf16>
    %cst_186 = arith.constant dense<0.000000e+00> : vector<8x8xf32>
    %404 = tpu.matmul %403, %385, %cst_186 {dimension_numbers = #tpu.dot_dimension_numbers<[1], [0], [0], [1], [0, 0, 1, 1], [], []>} : vector<8x8xbf16>, vector<8x8xbf16>, vector<8x8xf32> -> vector<8x8xf32>
    %405 = tpu.concatenate %382, %404 in 0 : vector<8x8xf32>, vector<8x8xf32> -> vector<16x8xf32>
    %406 = arith.truncf %405 : vector<16x8xf32> to vector<16x8xbf16>
    %c0_187 = arith.constant 0 : index
    %c0_188 = arith.constant 0 : index
    %c0_189 = arith.constant 0 : index
    %407 = vector.load %arg6[%c0_187, %c0_188, %c0_189] : memref<4x8x32xbf16, #tpu.memory_space<vmem>>, vector<1x8x32xbf16>
    %408 = vector.shape_cast %407 : vector<1x8x32xbf16> to vector<8x32xbf16>
    %cst_190 = arith.constant dense<0.000000e+00> : vector<16x32xf32>
    %409 = tpu.matmul %406, %408, %cst_190 {dimension_numbers = #tpu.dot_dimension_numbers<[1], [0], [0], [1], [0, 0, 1, 1], [], []>} : vector<16x8xbf16>, vector<8x32xbf16>, vector<16x32xf32> -> vector<16x32xf32>
    %c1_191 = arith.constant 1 : index
    %c0_192 = arith.constant 0 : index
    %c0_193 = arith.constant 0 : index
    %410 = vector.load %arg4[%c1_191, %c0_192, %c0_193] : memref<12x32x8xbf16, #tpu.memory_space<vmem>>, vector<1x32x8xbf16>
    %411 = vector.shape_cast %410 : vector<1x32x8xbf16> to vector<32x8xbf16>
    %c5_194 = arith.constant 5 : index
    %c0_195 = arith.constant 0 : index
    %c0_196 = arith.constant 0 : index
    %412 = vector.load %arg4[%c5_194, %c0_195, %c0_196] : memref<12x32x8xbf16, #tpu.memory_space<vmem>>, vector<1x32x8xbf16>
    %413 = vector.shape_cast %412 : vector<1x32x8xbf16> to vector<32x8xbf16>
    %c9_197 = arith.constant 9 : index
    %c0_198 = arith.constant 0 : index
    %c0_199 = arith.constant 0 : index
    %414 = vector.load %arg4[%c9_197, %c0_198, %c0_199] : memref<12x32x8xbf16, #tpu.memory_space<vmem>>, vector<1x32x8xbf16>
    %415 = vector.shape_cast %414 : vector<1x32x8xbf16> to vector<32x8xbf16>
    %c1_200 = arith.constant 1 : index
    %c0_201 = arith.constant 0 : index
    %c0_202 = arith.constant 0 : index
    %416 = vector.load %arg5[%c1_200, %c0_201, %c0_202] : memref<12x1x8xf32, #tpu.memory_space<vmem>>, vector<1x1x8xf32>
    %417 = vector.shape_cast %416 : vector<1x1x8xf32> to vector<1x8xf32>
    %c5_203 = arith.constant 5 : index
    %c0_204 = arith.constant 0 : index
    %c0_205 = arith.constant 0 : index
    %418 = vector.load %arg5[%c5_203, %c0_204, %c0_205] : memref<12x1x8xf32, #tpu.memory_space<vmem>>, vector<1x1x8xf32>
    %419 = vector.shape_cast %418 : vector<1x1x8xf32> to vector<1x8xf32>
    %c9_206 = arith.constant 9 : index
    %c0_207 = arith.constant 0 : index
    %c0_208 = arith.constant 0 : index
    %420 = vector.load %arg5[%c9_206, %c0_207, %c0_208] : memref<12x1x8xf32, #tpu.memory_space<vmem>>, vector<1x1x8xf32>
    %421 = vector.shape_cast %420 : vector<1x1x8xf32> to vector<1x8xf32>
    %cst_209 = arith.constant dense<0.000000e+00> : vector<16x8xf32>
    %422 = tpu.matmul %335, %411, %cst_209 {dimension_numbers = #tpu.dot_dimension_numbers<[1], [0], [0], [1], [0, 0, 1, 1], [], []>} : vector<16x32xbf16>, vector<32x8xbf16>, vector<16x8xf32> -> vector<16x8xf32>
    %423 = vector.broadcast %417 : vector<1x8xf32> to vector<16x8xf32>
    %424 = arith.addf %422, %423 : vector<16x8xf32>
    %425 = arith.truncf %424 : vector<16x8xf32> to vector<16x8xbf16>
    %cst_210 = arith.constant dense<0.000000e+00> : vector<16x8xf32>
    %426 = tpu.matmul %336, %413, %cst_210 {dimension_numbers = #tpu.dot_dimension_numbers<[1], [0], [0], [1], [0, 0, 1, 1], [], []>} : vector<16x32xbf16>, vector<32x8xbf16>, vector<16x8xf32> -> vector<16x8xf32>
    %427 = vector.broadcast %419 : vector<1x8xf32> to vector<16x8xf32>
    %428 = arith.addf %426, %427 : vector<16x8xf32>
    %429 = arith.truncf %428 : vector<16x8xf32> to vector<16x8xbf16>
    %cst_211 = arith.constant dense<0.000000e+00> : vector<16x8xf32>
    %430 = tpu.matmul %336, %415, %cst_211 {dimension_numbers = #tpu.dot_dimension_numbers<[1], [0], [0], [1], [0, 0, 1, 1], [], []>} : vector<16x32xbf16>, vector<32x8xbf16>, vector<16x8xf32> -> vector<16x8xf32>
    %431 = vector.broadcast %421 : vector<1x8xf32> to vector<16x8xf32>
    %432 = arith.addf %430, %431 : vector<16x8xf32>
    %433 = arith.truncf %432 : vector<16x8xf32> to vector<16x8xbf16>
    %434 = vector.extract_strided_slice %425 {offsets = [0, 0], sizes = [8, 8], strides = [1, 1]} : vector<16x8xbf16> to vector<8x8xbf16>
    %435 = vector.extract_strided_slice %429 {offsets = [0, 0], sizes = [8, 8], strides = [1, 1]} : vector<16x8xbf16> to vector<8x8xbf16>
    %436 = vector.extract_strided_slice %433 {offsets = [0, 0], sizes = [8, 8], strides = [1, 1]} : vector<16x8xbf16> to vector<8x8xbf16>
    %cst_212 = arith.constant dense<0.000000e+00> : vector<8x8xf32>
    %437 = tpu.matmul %434, %435, %cst_212 {dimension_numbers = #tpu.dot_dimension_numbers<[1], [1], [0], [0], [0, 0, 1, 0], [], []>} : vector<8x8xbf16>, vector<8x8xbf16>, vector<8x8xf32> -> vector<8x8xf32>
    %cst_213 = arith.constant 0.353553385 : f32
    %438 = vector.broadcast %cst_213 : f32 to vector<8x8xf32>
    %439 = arith.mulf %437, %438 : vector<8x8xf32>
    %440 = vector.extract_strided_slice %13 {offsets = [0, 0, 0], sizes = [1, 1, 8], strides = [1, 1, 1]} : vector<2x1x8xf32> to vector<1x1x8xf32>
    %441 = vector.shape_cast %440 : vector<1x1x8xf32> to vector<1x8xf32>
    %442 = vector.broadcast %441 : vector<1x8xf32> to vector<8x8xf32>
    %443 = arith.addf %439, %442 : vector<8x8xf32>
    %cst_214 = arith.constant dense<0xFF800000> : vector<8xf32>
    %444 = vector.multi_reduction <maximumf>, %443, %cst_214 [1] : vector<8x8xf32> to vector<8xf32>
    %445 = vector.shape_cast %444 : vector<8xf32> to vector<8x1xf32>
    %446 = vector.broadcast %445 : vector<8x1xf32> to vector<8x8xf32>
    %447 = arith.subf %443, %446 : vector<8x8xf32>
    %448 = math.exp %447 : vector<8x8xf32>
    %cst_215 = arith.constant dense<0.000000e+00> : vector<8xf32>
    %449 = vector.multi_reduction <add>, %448, %cst_215 [1] : vector<8x8xf32> to vector<8xf32>
    %450 = vector.shape_cast %449 : vector<8xf32> to vector<8x1xf32>
    %451 = tpu.reciprocal %450 {approx = true} : vector<8x1xf32> -> vector<8x1xf32>
    %452 = vector.broadcast %451 : vector<8x1xf32> to vector<8x8xf32>
    %453 = arith.mulf %448, %452 : vector<8x8xf32>
    %454 = arith.truncf %453 : vector<8x8xf32> to vector<8x8xbf16>
    %cst_216 = arith.constant dense<0.000000e+00> : vector<8x8xf32>
    %455 = tpu.matmul %454, %436, %cst_216 {dimension_numbers = #tpu.dot_dimension_numbers<[1], [0], [0], [1], [0, 0, 1, 1], [], []>} : vector<8x8xbf16>, vector<8x8xbf16>, vector<8x8xf32> -> vector<8x8xf32>
    %456 = vector.extract_strided_slice %425 {offsets = [8, 0], sizes = [8, 8], strides = [1, 1]} : vector<16x8xbf16> to vector<8x8xbf16>
    %457 = vector.extract_strided_slice %429 {offsets = [8, 0], sizes = [8, 8], strides = [1, 1]} : vector<16x8xbf16> to vector<8x8xbf16>
    %458 = vector.extract_strided_slice %433 {offsets = [8, 0], sizes = [8, 8], strides = [1, 1]} : vector<16x8xbf16> to vector<8x8xbf16>
    %cst_217 = arith.constant dense<0.000000e+00> : vector<8x8xf32>
    %459 = tpu.matmul %456, %457, %cst_217 {dimension_numbers = #tpu.dot_dimension_numbers<[1], [1], [0], [0], [0, 0, 1, 0], [], []>} : vector<8x8xbf16>, vector<8x8xbf16>, vector<8x8xf32> -> vector<8x8xf32>
    %cst_218 = arith.constant 0.353553385 : f32
    %460 = vector.broadcast %cst_218 : f32 to vector<8x8xf32>
    %461 = arith.mulf %459, %460 : vector<8x8xf32>
    %462 = vector.extract_strided_slice %13 {offsets = [1, 0, 0], sizes = [1, 1, 8], strides = [1, 1, 1]} : vector<2x1x8xf32> to vector<1x1x8xf32>
    %463 = vector.shape_cast %462 : vector<1x1x8xf32> to vector<1x8xf32>
    %464 = vector.broadcast %463 : vector<1x8xf32> to vector<8x8xf32>
    %465 = arith.addf %461, %464 : vector<8x8xf32>
    %cst_219 = arith.constant dense<0xFF800000> : vector<8xf32>
    %466 = vector.multi_reduction <maximumf>, %465, %cst_219 [1] : vector<8x8xf32> to vector<8xf32>
    %467 = vector.shape_cast %466 : vector<8xf32> to vector<8x1xf32>
    %468 = vector.broadcast %467 : vector<8x1xf32> to vector<8x8xf32>
    %469 = arith.subf %465, %468 : vector<8x8xf32>
    %470 = math.exp %469 : vector<8x8xf32>
    %cst_220 = arith.constant dense<0.000000e+00> : vector<8xf32>
    %471 = vector.multi_reduction <add>, %470, %cst_220 [1] : vector<8x8xf32> to vector<8xf32>
    %472 = vector.shape_cast %471 : vector<8xf32> to vector<8x1xf32>
    %473 = tpu.reciprocal %472 {approx = true} : vector<8x1xf32> -> vector<8x1xf32>
    %474 = vector.broadcast %473 : vector<8x1xf32> to vector<8x8xf32>
    %475 = arith.mulf %470, %474 : vector<8x8xf32>
    %476 = arith.truncf %475 : vector<8x8xf32> to vector<8x8xbf16>
    %cst_221 = arith.constant dense<0.000000e+00> : vector<8x8xf32>
    %477 = tpu.matmul %476, %458, %cst_221 {dimension_numbers = #tpu.dot_dimension_numbers<[1], [0], [0], [1], [0, 0, 1, 1], [], []>} : vector<8x8xbf16>, vector<8x8xbf16>, vector<8x8xf32> -> vector<8x8xf32>
    %478 = tpu.concatenate %455, %477 in 0 : vector<8x8xf32>, vector<8x8xf32> -> vector<16x8xf32>
    %479 = arith.truncf %478 : vector<16x8xf32> to vector<16x8xbf16>
    %c1_222 = arith.constant 1 : index
    %c0_223 = arith.constant 0 : index
    %c0_224 = arith.constant 0 : index
    %480 = vector.load %arg6[%c1_222, %c0_223, %c0_224] : memref<4x8x32xbf16, #tpu.memory_space<vmem>>, vector<1x8x32xbf16>
    %481 = vector.shape_cast %480 : vector<1x8x32xbf16> to vector<8x32xbf16>
    %cst_225 = arith.constant dense<0.000000e+00> : vector<16x32xf32>
    %482 = tpu.matmul %479, %481, %cst_225 {dimension_numbers = #tpu.dot_dimension_numbers<[1], [0], [0], [1], [0, 0, 1, 1], [], []>} : vector<16x8xbf16>, vector<8x32xbf16>, vector<16x32xf32> -> vector<16x32xf32>
    %483 = arith.addf %409, %482 : vector<16x32xf32>
    %c2_226 = arith.constant 2 : index
    %c0_227 = arith.constant 0 : index
    %c0_228 = arith.constant 0 : index
    %484 = vector.load %arg4[%c2_226, %c0_227, %c0_228] : memref<12x32x8xbf16, #tpu.memory_space<vmem>>, vector<1x32x8xbf16>
    %485 = vector.shape_cast %484 : vector<1x32x8xbf16> to vector<32x8xbf16>
    %c6_229 = arith.constant 6 : index
    %c0_230 = arith.constant 0 : index
    %c0_231 = arith.constant 0 : index
    %486 = vector.load %arg4[%c6_229, %c0_230, %c0_231] : memref<12x32x8xbf16, #tpu.memory_space<vmem>>, vector<1x32x8xbf16>
    %487 = vector.shape_cast %486 : vector<1x32x8xbf16> to vector<32x8xbf16>
    %c10_232 = arith.constant 10 : index
    %c0_233 = arith.constant 0 : index
    %c0_234 = arith.constant 0 : index
    %488 = vector.load %arg4[%c10_232, %c0_233, %c0_234] : memref<12x32x8xbf16, #tpu.memory_space<vmem>>, vector<1x32x8xbf16>
    %489 = vector.shape_cast %488 : vector<1x32x8xbf16> to vector<32x8xbf16>
    %c2_235 = arith.constant 2 : index
    %c0_236 = arith.constant 0 : index
    %c0_237 = arith.constant 0 : index
    %490 = vector.load %arg5[%c2_235, %c0_236, %c0_237] : memref<12x1x8xf32, #tpu.memory_space<vmem>>, vector<1x1x8xf32>
    %491 = vector.shape_cast %490 : vector<1x1x8xf32> to vector<1x8xf32>
    %c6_238 = arith.constant 6 : index
    %c0_239 = arith.constant 0 : index
    %c0_240 = arith.constant 0 : index
    %492 = vector.load %arg5[%c6_238, %c0_239, %c0_240] : memref<12x1x8xf32, #tpu.memory_space<vmem>>, vector<1x1x8xf32>
    %493 = vector.shape_cast %492 : vector<1x1x8xf32> to vector<1x8xf32>
    %c10_241 = arith.constant 10 : index
    %c0_242 = arith.constant 0 : index
    %c0_243 = arith.constant 0 : index
    %494 = vector.load %arg5[%c10_241, %c0_242, %c0_243] : memref<12x1x8xf32, #tpu.memory_space<vmem>>, vector<1x1x8xf32>
    %495 = vector.shape_cast %494 : vector<1x1x8xf32> to vector<1x8xf32>
    %cst_244 = arith.constant dense<0.000000e+00> : vector<16x8xf32>
    %496 = tpu.matmul %335, %485, %cst_244 {dimension_numbers = #tpu.dot_dimension_numbers<[1], [0], [0], [1], [0, 0, 1, 1], [], []>} : vector<16x32xbf16>, vector<32x8xbf16>, vector<16x8xf32> -> vector<16x8xf32>
    %497 = vector.broadcast %491 : vector<1x8xf32> to vector<16x8xf32>
    %498 = arith.addf %496, %497 : vector<16x8xf32>
    %499 = arith.truncf %498 : vector<16x8xf32> to vector<16x8xbf16>
    %cst_245 = arith.constant dense<0.000000e+00> : vector<16x8xf32>
    %500 = tpu.matmul %336, %487, %cst_245 {dimension_numbers = #tpu.dot_dimension_numbers<[1], [0], [0], [1], [0, 0, 1, 1], [], []>} : vector<16x32xbf16>, vector<32x8xbf16>, vector<16x8xf32> -> vector<16x8xf32>
    %501 = vector.broadcast %493 : vector<1x8xf32> to vector<16x8xf32>
    %502 = arith.addf %500, %501 : vector<16x8xf32>
    %503 = arith.truncf %502 : vector<16x8xf32> to vector<16x8xbf16>
    %cst_246 = arith.constant dense<0.000000e+00> : vector<16x8xf32>
    %504 = tpu.matmul %336, %489, %cst_246 {dimension_numbers = #tpu.dot_dimension_numbers<[1], [0], [0], [1], [0, 0, 1, 1], [], []>} : vector<16x32xbf16>, vector<32x8xbf16>, vector<16x8xf32> -> vector<16x8xf32>
    %505 = vector.broadcast %495 : vector<1x8xf32> to vector<16x8xf32>
    %506 = arith.addf %504, %505 : vector<16x8xf32>
    %507 = arith.truncf %506 : vector<16x8xf32> to vector<16x8xbf16>
    %508 = vector.extract_strided_slice %499 {offsets = [0, 0], sizes = [8, 8], strides = [1, 1]} : vector<16x8xbf16> to vector<8x8xbf16>
    %509 = vector.extract_strided_slice %503 {offsets = [0, 0], sizes = [8, 8], strides = [1, 1]} : vector<16x8xbf16> to vector<8x8xbf16>
    %510 = vector.extract_strided_slice %507 {offsets = [0, 0], sizes = [8, 8], strides = [1, 1]} : vector<16x8xbf16> to vector<8x8xbf16>
    %cst_247 = arith.constant dense<0.000000e+00> : vector<8x8xf32>
    %511 = tpu.matmul %508, %509, %cst_247 {dimension_numbers = #tpu.dot_dimension_numbers<[1], [1], [0], [0], [0, 0, 1, 0], [], []>} : vector<8x8xbf16>, vector<8x8xbf16>, vector<8x8xf32> -> vector<8x8xf32>
    %cst_248 = arith.constant 0.353553385 : f32
    %512 = vector.broadcast %cst_248 : f32 to vector<8x8xf32>
    %513 = arith.mulf %511, %512 : vector<8x8xf32>
    %514 = vector.extract_strided_slice %13 {offsets = [0, 0, 0], sizes = [1, 1, 8], strides = [1, 1, 1]} : vector<2x1x8xf32> to vector<1x1x8xf32>
    %515 = vector.shape_cast %514 : vector<1x1x8xf32> to vector<1x8xf32>
    %516 = vector.broadcast %515 : vector<1x8xf32> to vector<8x8xf32>
    %517 = arith.addf %513, %516 : vector<8x8xf32>
    %cst_249 = arith.constant dense<0xFF800000> : vector<8xf32>
    %518 = vector.multi_reduction <maximumf>, %517, %cst_249 [1] : vector<8x8xf32> to vector<8xf32>
    %519 = vector.shape_cast %518 : vector<8xf32> to vector<8x1xf32>
    %520 = vector.broadcast %519 : vector<8x1xf32> to vector<8x8xf32>
    %521 = arith.subf %517, %520 : vector<8x8xf32>
    %522 = math.exp %521 : vector<8x8xf32>
    %cst_250 = arith.constant dense<0.000000e+00> : vector<8xf32>
    %523 = vector.multi_reduction <add>, %522, %cst_250 [1] : vector<8x8xf32> to vector<8xf32>
    %524 = vector.shape_cast %523 : vector<8xf32> to vector<8x1xf32>
    %525 = tpu.reciprocal %524 {approx = true} : vector<8x1xf32> -> vector<8x1xf32>
    %526 = vector.broadcast %525 : vector<8x1xf32> to vector<8x8xf32>
    %527 = arith.mulf %522, %526 : vector<8x8xf32>
    %528 = arith.truncf %527 : vector<8x8xf32> to vector<8x8xbf16>
    %cst_251 = arith.constant dense<0.000000e+00> : vector<8x8xf32>
    %529 = tpu.matmul %528, %510, %cst_251 {dimension_numbers = #tpu.dot_dimension_numbers<[1], [0], [0], [1], [0, 0, 1, 1], [], []>} : vector<8x8xbf16>, vector<8x8xbf16>, vector<8x8xf32> -> vector<8x8xf32>
    %530 = vector.extract_strided_slice %499 {offsets = [8, 0], sizes = [8, 8], strides = [1, 1]} : vector<16x8xbf16> to vector<8x8xbf16>
    %531 = vector.extract_strided_slice %503 {offsets = [8, 0], sizes = [8, 8], strides = [1, 1]} : vector<16x8xbf16> to vector<8x8xbf16>
    %532 = vector.extract_strided_slice %507 {offsets = [8, 0], sizes = [8, 8], strides = [1, 1]} : vector<16x8xbf16> to vector<8x8xbf16>
    %cst_252 = arith.constant dense<0.000000e+00> : vector<8x8xf32>
    %533 = tpu.matmul %530, %531, %cst_252 {dimension_numbers = #tpu.dot_dimension_numbers<[1], [1], [0], [0], [0, 0, 1, 0], [], []>} : vector<8x8xbf16>, vector<8x8xbf16>, vector<8x8xf32> -> vector<8x8xf32>
    %cst_253 = arith.constant 0.353553385 : f32
    %534 = vector.broadcast %cst_253 : f32 to vector<8x8xf32>
    %535 = arith.mulf %533, %534 : vector<8x8xf32>
    %536 = vector.extract_strided_slice %13 {offsets = [1, 0, 0], sizes = [1, 1, 8], strides = [1, 1, 1]} : vector<2x1x8xf32> to vector<1x1x8xf32>
    %537 = vector.shape_cast %536 : vector<1x1x8xf32> to vector<1x8xf32>
    %538 = vector.broadcast %537 : vector<1x8xf32> to vector<8x8xf32>
    %539 = arith.addf %535, %538 : vector<8x8xf32>
    %cst_254 = arith.constant dense<0xFF800000> : vector<8xf32>
    %540 = vector.multi_reduction <maximumf>, %539, %cst_254 [1] : vector<8x8xf32> to vector<8xf32>
    %541 = vector.shape_cast %540 : vector<8xf32> to vector<8x1xf32>
    %542 = vector.broadcast %541 : vector<8x1xf32> to vector<8x8xf32>
    %543 = arith.subf %539, %542 : vector<8x8xf32>
    %544 = math.exp %543 : vector<8x8xf32>
    %cst_255 = arith.constant dense<0.000000e+00> : vector<8xf32>
    %545 = vector.multi_reduction <add>, %544, %cst_255 [1] : vector<8x8xf32> to vector<8xf32>
    %546 = vector.shape_cast %545 : vector<8xf32> to vector<8x1xf32>
    %547 = tpu.reciprocal %546 {approx = true} : vector<8x1xf32> -> vector<8x1xf32>
    %548 = vector.broadcast %547 : vector<8x1xf32> to vector<8x8xf32>
    %549 = arith.mulf %544, %548 : vector<8x8xf32>
    %550 = arith.truncf %549 : vector<8x8xf32> to vector<8x8xbf16>
    %cst_256 = arith.constant dense<0.000000e+00> : vector<8x8xf32>
    %551 = tpu.matmul %550, %532, %cst_256 {dimension_numbers = #tpu.dot_dimension_numbers<[1], [0], [0], [1], [0, 0, 1, 1], [], []>} : vector<8x8xbf16>, vector<8x8xbf16>, vector<8x8xf32> -> vector<8x8xf32>
    %552 = tpu.concatenate %529, %551 in 0 : vector<8x8xf32>, vector<8x8xf32> -> vector<16x8xf32>
    %553 = arith.truncf %552 : vector<16x8xf32> to vector<16x8xbf16>
    %c2_257 = arith.constant 2 : index
    %c0_258 = arith.constant 0 : index
    %c0_259 = arith.constant 0 : index
    %554 = vector.load %arg6[%c2_257, %c0_258, %c0_259] : memref<4x8x32xbf16, #tpu.memory_space<vmem>>, vector<1x8x32xbf16>
    %555 = vector.shape_cast %554 : vector<1x8x32xbf16> to vector<8x32xbf16>
    %cst_260 = arith.constant dense<0.000000e+00> : vector<16x32xf32>
    %556 = tpu.matmul %553, %555, %cst_260 {dimension_numbers = #tpu.dot_dimension_numbers<[1], [0], [0], [1], [0, 0, 1, 1], [], []>} : vector<16x8xbf16>, vector<8x32xbf16>, vector<16x32xf32> -> vector<16x32xf32>
    %557 = arith.addf %483, %556 : vector<16x32xf32>
    %c3_261 = arith.constant 3 : index
    %c0_262 = arith.constant 0 : index
    %c0_263 = arith.constant 0 : index
    %558 = vector.load %arg4[%c3_261, %c0_262, %c0_263] : memref<12x32x8xbf16, #tpu.memory_space<vmem>>, vector<1x32x8xbf16>
    %559 = vector.shape_cast %558 : vector<1x32x8xbf16> to vector<32x8xbf16>
    %c7_264 = arith.constant 7 : index
    %c0_265 = arith.constant 0 : index
    %c0_266 = arith.constant 0 : index
    %560 = vector.load %arg4[%c7_264, %c0_265, %c0_266] : memref<12x32x8xbf16, #tpu.memory_space<vmem>>, vector<1x32x8xbf16>
    %561 = vector.shape_cast %560 : vector<1x32x8xbf16> to vector<32x8xbf16>
    %c11_267 = arith.constant 11 : index
    %c0_268 = arith.constant 0 : index
    %c0_269 = arith.constant 0 : index
    %562 = vector.load %arg4[%c11_267, %c0_268, %c0_269] : memref<12x32x8xbf16, #tpu.memory_space<vmem>>, vector<1x32x8xbf16>
    %563 = vector.shape_cast %562 : vector<1x32x8xbf16> to vector<32x8xbf16>
    %c3_270 = arith.constant 3 : index
    %c0_271 = arith.constant 0 : index
    %c0_272 = arith.constant 0 : index
    %564 = vector.load %arg5[%c3_270, %c0_271, %c0_272] : memref<12x1x8xf32, #tpu.memory_space<vmem>>, vector<1x1x8xf32>
    %565 = vector.shape_cast %564 : vector<1x1x8xf32> to vector<1x8xf32>
    %c7_273 = arith.constant 7 : index
    %c0_274 = arith.constant 0 : index
    %c0_275 = arith.constant 0 : index
    %566 = vector.load %arg5[%c7_273, %c0_274, %c0_275] : memref<12x1x8xf32, #tpu.memory_space<vmem>>, vector<1x1x8xf32>
    %567 = vector.shape_cast %566 : vector<1x1x8xf32> to vector<1x8xf32>
    %c11_276 = arith.constant 11 : index
    %c0_277 = arith.constant 0 : index
    %c0_278 = arith.constant 0 : index
    %568 = vector.load %arg5[%c11_276, %c0_277, %c0_278] : memref<12x1x8xf32, #tpu.memory_space<vmem>>, vector<1x1x8xf32>
    %569 = vector.shape_cast %568 : vector<1x1x8xf32> to vector<1x8xf32>
    %cst_279 = arith.constant dense<0.000000e+00> : vector<16x8xf32>
    %570 = tpu.matmul %335, %559, %cst_279 {dimension_numbers = #tpu.dot_dimension_numbers<[1], [0], [0], [1], [0, 0, 1, 1], [], []>} : vector<16x32xbf16>, vector<32x8xbf16>, vector<16x8xf32> -> vector<16x8xf32>
    %571 = vector.broadcast %565 : vector<1x8xf32> to vector<16x8xf32>
    %572 = arith.addf %570, %571 : vector<16x8xf32>
    %573 = arith.truncf %572 : vector<16x8xf32> to vector<16x8xbf16>
    %cst_280 = arith.constant dense<0.000000e+00> : vector<16x8xf32>
    %574 = tpu.matmul %336, %561, %cst_280 {dimension_numbers = #tpu.dot_dimension_numbers<[1], [0], [0], [1], [0, 0, 1, 1], [], []>} : vector<16x32xbf16>, vector<32x8xbf16>, vector<16x8xf32> -> vector<16x8xf32>
    %575 = vector.broadcast %567 : vector<1x8xf32> to vector<16x8xf32>
    %576 = arith.addf %574, %575 : vector<16x8xf32>
    %577 = arith.truncf %576 : vector<16x8xf32> to vector<16x8xbf16>
    %cst_281 = arith.constant dense<0.000000e+00> : vector<16x8xf32>
    %578 = tpu.matmul %336, %563, %cst_281 {dimension_numbers = #tpu.dot_dimension_numbers<[1], [0], [0], [1], [0, 0, 1, 1], [], []>} : vector<16x32xbf16>, vector<32x8xbf16>, vector<16x8xf32> -> vector<16x8xf32>
    %579 = vector.broadcast %569 : vector<1x8xf32> to vector<16x8xf32>
    %580 = arith.addf %578, %579 : vector<16x8xf32>
    %581 = arith.truncf %580 : vector<16x8xf32> to vector<16x8xbf16>
    %582 = vector.extract_strided_slice %573 {offsets = [0, 0], sizes = [8, 8], strides = [1, 1]} : vector<16x8xbf16> to vector<8x8xbf16>
    %583 = vector.extract_strided_slice %577 {offsets = [0, 0], sizes = [8, 8], strides = [1, 1]} : vector<16x8xbf16> to vector<8x8xbf16>
    %584 = vector.extract_strided_slice %581 {offsets = [0, 0], sizes = [8, 8], strides = [1, 1]} : vector<16x8xbf16> to vector<8x8xbf16>
    %cst_282 = arith.constant dense<0.000000e+00> : vector<8x8xf32>
    %585 = tpu.matmul %582, %583, %cst_282 {dimension_numbers = #tpu.dot_dimension_numbers<[1], [1], [0], [0], [0, 0, 1, 0], [], []>} : vector<8x8xbf16>, vector<8x8xbf16>, vector<8x8xf32> -> vector<8x8xf32>
    %cst_283 = arith.constant 0.353553385 : f32
    %586 = vector.broadcast %cst_283 : f32 to vector<8x8xf32>
    %587 = arith.mulf %585, %586 : vector<8x8xf32>
    %588 = vector.extract_strided_slice %13 {offsets = [0, 0, 0], sizes = [1, 1, 8], strides = [1, 1, 1]} : vector<2x1x8xf32> to vector<1x1x8xf32>
    %589 = vector.shape_cast %588 : vector<1x1x8xf32> to vector<1x8xf32>
    %590 = vector.broadcast %589 : vector<1x8xf32> to vector<8x8xf32>
    %591 = arith.addf %587, %590 : vector<8x8xf32>
    %cst_284 = arith.constant dense<0xFF800000> : vector<8xf32>
    %592 = vector.multi_reduction <maximumf>, %591, %cst_284 [1] : vector<8x8xf32> to vector<8xf32>
    %593 = vector.shape_cast %592 : vector<8xf32> to vector<8x1xf32>
    %594 = vector.broadcast %593 : vector<8x1xf32> to vector<8x8xf32>
    %595 = arith.subf %591, %594 : vector<8x8xf32>
    %596 = math.exp %595 : vector<8x8xf32>
    %cst_285 = arith.constant dense<0.000000e+00> : vector<8xf32>
    %597 = vector.multi_reduction <add>, %596, %cst_285 [1] : vector<8x8xf32> to vector<8xf32>
    %598 = vector.shape_cast %597 : vector<8xf32> to vector<8x1xf32>
    %599 = tpu.reciprocal %598 {approx = true} : vector<8x1xf32> -> vector<8x1xf32>
    %600 = vector.broadcast %599 : vector<8x1xf32> to vector<8x8xf32>
    %601 = arith.mulf %596, %600 : vector<8x8xf32>
    %602 = arith.truncf %601 : vector<8x8xf32> to vector<8x8xbf16>
    %cst_286 = arith.constant dense<0.000000e+00> : vector<8x8xf32>
    %603 = tpu.matmul %602, %584, %cst_286 {dimension_numbers = #tpu.dot_dimension_numbers<[1], [0], [0], [1], [0, 0, 1, 1], [], []>} : vector<8x8xbf16>, vector<8x8xbf16>, vector<8x8xf32> -> vector<8x8xf32>
    %604 = vector.extract_strided_slice %573 {offsets = [8, 0], sizes = [8, 8], strides = [1, 1]} : vector<16x8xbf16> to vector<8x8xbf16>
    %605 = vector.extract_strided_slice %577 {offsets = [8, 0], sizes = [8, 8], strides = [1, 1]} : vector<16x8xbf16> to vector<8x8xbf16>
    %606 = vector.extract_strided_slice %581 {offsets = [8, 0], sizes = [8, 8], strides = [1, 1]} : vector<16x8xbf16> to vector<8x8xbf16>
    %cst_287 = arith.constant dense<0.000000e+00> : vector<8x8xf32>
    %607 = tpu.matmul %604, %605, %cst_287 {dimension_numbers = #tpu.dot_dimension_numbers<[1], [1], [0], [0], [0, 0, 1, 0], [], []>} : vector<8x8xbf16>, vector<8x8xbf16>, vector<8x8xf32> -> vector<8x8xf32>
    %cst_288 = arith.constant 0.353553385 : f32
    %608 = vector.broadcast %cst_288 : f32 to vector<8x8xf32>
    %609 = arith.mulf %607, %608 : vector<8x8xf32>
    %610 = vector.extract_strided_slice %13 {offsets = [1, 0, 0], sizes = [1, 1, 8], strides = [1, 1, 1]} : vector<2x1x8xf32> to vector<1x1x8xf32>
    %611 = vector.shape_cast %610 : vector<1x1x8xf32> to vector<1x8xf32>
    %612 = vector.broadcast %611 : vector<1x8xf32> to vector<8x8xf32>
    %613 = arith.addf %609, %612 : vector<8x8xf32>
    %cst_289 = arith.constant dense<0xFF800000> : vector<8xf32>
    %614 = vector.multi_reduction <maximumf>, %613, %cst_289 [1] : vector<8x8xf32> to vector<8xf32>
    %615 = vector.shape_cast %614 : vector<8xf32> to vector<8x1xf32>
    %616 = vector.broadcast %615 : vector<8x1xf32> to vector<8x8xf32>
    %617 = arith.subf %613, %616 : vector<8x8xf32>
    %618 = math.exp %617 : vector<8x8xf32>
    %cst_290 = arith.constant dense<0.000000e+00> : vector<8xf32>
    %619 = vector.multi_reduction <add>, %618, %cst_290 [1] : vector<8x8xf32> to vector<8xf32>
    %620 = vector.shape_cast %619 : vector<8xf32> to vector<8x1xf32>
    %621 = tpu.reciprocal %620 {approx = true} : vector<8x1xf32> -> vector<8x1xf32>
    %622 = vector.broadcast %621 : vector<8x1xf32> to vector<8x8xf32>
    %623 = arith.mulf %618, %622 : vector<8x8xf32>
    %624 = arith.truncf %623 : vector<8x8xf32> to vector<8x8xbf16>
    %cst_291 = arith.constant dense<0.000000e+00> : vector<8x8xf32>
    %625 = tpu.matmul %624, %606, %cst_291 {dimension_numbers = #tpu.dot_dimension_numbers<[1], [0], [0], [1], [0, 0, 1, 1], [], []>} : vector<8x8xbf16>, vector<8x8xbf16>, vector<8x8xf32> -> vector<8x8xf32>
    %626 = tpu.concatenate %603, %625 in 0 : vector<8x8xf32>, vector<8x8xf32> -> vector<16x8xf32>
    %627 = arith.truncf %626 : vector<16x8xf32> to vector<16x8xbf16>
    %c3_292 = arith.constant 3 : index
    %c0_293 = arith.constant 0 : index
    %c0_294 = arith.constant 0 : index
    %628 = vector.load %arg6[%c3_292, %c0_293, %c0_294] : memref<4x8x32xbf16, #tpu.memory_space<vmem>>, vector<1x8x32xbf16>
    %629 = vector.shape_cast %628 : vector<1x8x32xbf16> to vector<8x32xbf16>
    %cst_295 = arith.constant dense<0.000000e+00> : vector<16x32xf32>
    %630 = tpu.matmul %627, %629, %cst_295 {dimension_numbers = #tpu.dot_dimension_numbers<[1], [0], [0], [1], [0, 0, 1, 1], [], []>} : vector<16x8xbf16>, vector<8x32xbf16>, vector<16x32xf32> -> vector<16x32xf32>
    %631 = arith.addf %557, %630 : vector<16x32xf32>
    %632 = vector.broadcast %14 : vector<1x32xf32> to vector<16x32xf32>
    %633 = arith.addf %631, %632 : vector<16x32xf32>
    %634 = arith.addf %334, %633 : vector<16x32xf32>
    %c1_296 = arith.constant 1 : index
    %c0_297 = arith.constant 0 : index
    %c0_298 = arith.constant 0 : index
    %635 = vector.load %arg12[%c1_296, %c0_297, %c0_298] : memref<3x1x32xf32, #tpu.memory_space<vmem>>, vector<1x1x32xf32>
    %636 = vector.shape_cast %635 : vector<1x1x32xf32> to vector<1x32xf32>
    %c1_299 = arith.constant 1 : index
    %c0_300 = arith.constant 0 : index
    %c0_301 = arith.constant 0 : index
    %637 = vector.load %arg13[%c1_299, %c0_300, %c0_301] : memref<3x1x32xf32, #tpu.memory_space<vmem>>, vector<1x1x32xf32>
    %638 = vector.shape_cast %637 : vector<1x1x32xf32> to vector<1x32xf32>
    %cst_302 = arith.constant dense<0.000000e+00> : vector<16xf32>
    %639 = vector.multi_reduction <add>, %634, %cst_302 [1] : vector<16x32xf32> to vector<16xf32>
    %640 = vector.shape_cast %639 : vector<16xf32> to vector<16x1xf32>
    %cst_303 = arith.constant 3.200000e+01 : f32
    %641 = vector.broadcast %cst_303 : f32 to vector<16x1xf32>
    %642 = arith.divf %640, %641 : vector<16x1xf32>
    %643 = vector.broadcast %642 : vector<16x1xf32> to vector<16x32xf32>
    %644 = arith.subf %634, %643 : vector<16x32xf32>
    %645 = vector.broadcast %642 : vector<16x1xf32> to vector<16x32xf32>
    %646 = arith.subf %634, %645 : vector<16x32xf32>
    %647 = arith.mulf %644, %646 : vector<16x32xf32>
    %cst_304 = arith.constant dense<0.000000e+00> : vector<16xf32>
    %648 = vector.multi_reduction <add>, %647, %cst_304 [1] : vector<16x32xf32> to vector<16xf32>
    %649 = vector.shape_cast %648 : vector<16xf32> to vector<16x1xf32>
    %cst_305 = arith.constant 3.200000e+01 : f32
    %650 = vector.broadcast %cst_305 : f32 to vector<16x1xf32>
    %651 = arith.divf %649, %650 : vector<16x1xf32>
    %652 = vector.broadcast %642 : vector<16x1xf32> to vector<16x32xf32>
    %653 = arith.subf %634, %652 : vector<16x32xf32>
    %654 = vector.broadcast %636 : vector<1x32xf32> to vector<16x32xf32>
    %655 = arith.mulf %654, %653 : vector<16x32xf32>
    %cst_306 = arith.constant 9.99999997E-7 : f32
    %656 = vector.broadcast %cst_306 : f32 to vector<16x1xf32>
    %657 = arith.addf %651, %656 : vector<16x1xf32>
    %658 = math.rsqrt %657 : vector<16x1xf32>
    %659 = vector.broadcast %658 : vector<16x1xf32> to vector<16x32xf32>
    %660 = arith.mulf %655, %659 : vector<16x32xf32>
    %661 = vector.broadcast %638 : vector<1x32xf32> to vector<16x32xf32>
    %662 = arith.addf %660, %661 : vector<16x32xf32>
    %663 = arith.truncf %662 : vector<16x32xf32> to vector<16x32xbf16>
    %c0_307 = arith.constant 0 : index
    %c0_308 = arith.constant 0 : index
    %664 = vector.load %arg8[%c0_307, %c0_308] : memref<32x64xbf16, #tpu.memory_space<vmem>>, vector<32x64xbf16>
    %cst_309 = arith.constant dense<0.000000e+00> : vector<16x64xf32>
    %665 = tpu.matmul %663, %664, %cst_309 {dimension_numbers = #tpu.dot_dimension_numbers<[1], [0], [0], [1], [0, 0, 1, 1], [], []>} : vector<16x32xbf16>, vector<32x64xbf16>, vector<16x64xf32> -> vector<16x64xf32>
    %c0_310 = arith.constant 0 : index
    %c0_311 = arith.constant 0 : index
    %666 = vector.load %arg9[%c0_310, %c0_311] : memref<1x64xf32, #tpu.memory_space<vmem>>, vector<1x64xf32>
    %667 = vector.broadcast %666 : vector<1x64xf32> to vector<16x64xf32>
    %668 = arith.addf %665, %667 : vector<16x64xf32>
    %cst_312 = arith.constant 0.000000e+00 : f32
    %669 = vector.broadcast %cst_312 : f32 to vector<16x64xf32>
    %670 = arith.maximumf %668, %669 : vector<16x64xf32>
    %671 = arith.truncf %670 : vector<16x64xf32> to vector<16x64xbf16>
    %c0_313 = arith.constant 0 : index
    %c0_314 = arith.constant 0 : index
    %672 = vector.load %arg10[%c0_313, %c0_314] : memref<64x32xbf16, #tpu.memory_space<vmem>>, vector<64x32xbf16>
    %cst_315 = arith.constant dense<0.000000e+00> : vector<16x32xf32>
    %673 = tpu.matmul %671, %672, %cst_315 {dimension_numbers = #tpu.dot_dimension_numbers<[1], [0], [0], [1], [0, 0, 1, 1], [], []>} : vector<16x64xbf16>, vector<64x32xbf16>, vector<16x32xf32> -> vector<16x32xf32>
    %c0_316 = arith.constant 0 : index
    %c0_317 = arith.constant 0 : index
    %674 = vector.load %arg11[%c0_316, %c0_317] : memref<1x32xf32, #tpu.memory_space<vmem>>, vector<1x32xf32>
    %675 = vector.broadcast %674 : vector<1x32xf32> to vector<16x32xf32>
    %676 = arith.addf %673, %675 : vector<16x32xf32>
    %677 = arith.addf %662, %676 : vector<16x32xf32>
    %c2_318 = arith.constant 2 : index
    %c0_319 = arith.constant 0 : index
    %c0_320 = arith.constant 0 : index
    %678 = vector.load %arg12[%c2_318, %c0_319, %c0_320] : memref<3x1x32xf32, #tpu.memory_space<vmem>>, vector<1x1x32xf32>
    %679 = vector.shape_cast %678 : vector<1x1x32xf32> to vector<1x32xf32>
    %c2_321 = arith.constant 2 : index
    %c0_322 = arith.constant 0 : index
    %c0_323 = arith.constant 0 : index
    %680 = vector.load %arg13[%c2_321, %c0_322, %c0_323] : memref<3x1x32xf32, #tpu.memory_space<vmem>>, vector<1x1x32xf32>
    %681 = vector.shape_cast %680 : vector<1x1x32xf32> to vector<1x32xf32>
    %cst_324 = arith.constant dense<0.000000e+00> : vector<16xf32>
    %682 = vector.multi_reduction <add>, %677, %cst_324 [1] : vector<16x32xf32> to vector<16xf32>
    %683 = vector.shape_cast %682 : vector<16xf32> to vector<16x1xf32>
    %cst_325 = arith.constant 3.200000e+01 : f32
    %684 = vector.broadcast %cst_325 : f32 to vector<16x1xf32>
    %685 = arith.divf %683, %684 : vector<16x1xf32>
    %686 = vector.broadcast %685 : vector<16x1xf32> to vector<16x32xf32>
    %687 = arith.subf %677, %686 : vector<16x32xf32>
    %688 = vector.broadcast %685 : vector<16x1xf32> to vector<16x32xf32>
    %689 = arith.subf %677, %688 : vector<16x32xf32>
    %690 = arith.mulf %687, %689 : vector<16x32xf32>
    %cst_326 = arith.constant dense<0.000000e+00> : vector<16xf32>
    %691 = vector.multi_reduction <add>, %690, %cst_326 [1] : vector<16x32xf32> to vector<16xf32>
    %692 = vector.shape_cast %691 : vector<16xf32> to vector<16x1xf32>
    %cst_327 = arith.constant 3.200000e+01 : f32
    %693 = vector.broadcast %cst_327 : f32 to vector<16x1xf32>
    %694 = arith.divf %692, %693 : vector<16x1xf32>
    %695 = vector.broadcast %685 : vector<16x1xf32> to vector<16x32xf32>
    %696 = arith.subf %677, %695 : vector<16x32xf32>
    %697 = vector.broadcast %679 : vector<1x32xf32> to vector<16x32xf32>
    %698 = arith.mulf %697, %696 : vector<16x32xf32>
    %cst_328 = arith.constant 9.99999997E-7 : f32
    %699 = vector.broadcast %cst_328 : f32 to vector<16x1xf32>
    %700 = arith.addf %694, %699 : vector<16x1xf32>
    %701 = math.rsqrt %700 : vector<16x1xf32>
    %702 = vector.broadcast %701 : vector<16x1xf32> to vector<16x32xf32>
    %703 = arith.mulf %698, %702 : vector<16x32xf32>
    %704 = vector.broadcast %681 : vector<1x32xf32> to vector<16x32xf32>
    %705 = arith.addf %703, %704 : vector<16x32xf32>
    %c0_329 = arith.constant 0 : index
    %c0_330 = arith.constant 0 : index
    %706 = vector.load %arg14[%c0_329, %c0_330] : memref<16x32xf32, #tpu.memory_space<vmem>>, vector<16x32xf32>
    tpu.vector_store %arg14[%c0_329, %c0_330], %705 {strides = array<i32>} : memref<16x32xf32, #tpu.memory_space<vmem>>, vector<16x32xf32>,
    return
  }
}

</mosaic_0001>

<bundles_post_ra>
// kernel: tpu_custom_call.1
= control target key start
LH: loop header
LB: loop body
LE: loop exit
PB: predicated region body
PF: predicated region fallthrough
CT: control target
= control target key end

     0   :  { %vm101_vm0 = vcmask 261120   ;;  %s3196_s0 = inlined_call_operand.vmem [shape: f32[16,32], index: 0, kind: input, shape index: {}]   ;;  %s3197_s1 = inlined_call_operand.vmem [shape: f32[16,32], index: 1, kind: input, shape index: {}]   ;;  %s3198_s2 = inlined_call_operand.vmem [shape: f32[2,8,8], index: 2, kind: input, shape index: {}]   ;;  %s3199_s3 = inlined_call_operand.vmem [shape: f32[2,1,8], index: 3, kind: input, shape index: {}]   ;;  %s3200_s4 = inlined_call_operand.vmem [shape: bf16[12,32,8], index: 4, kind: input, shape index: {}]   ;;  %s3201_s5 = inlined_call_operand.vmem [shape: f32[12,1,8], index: 5, kind: input, shape index: {}]   ;;  %s3202_s6 = inlined_call_operand.vmem [shape: bf16[4,8,32], index: 6, kind: input, shape index: {}]   ;;  %s3203_s7 = inlined_call_operand.vmem [shape: f32[1,32], index: 7, kind: input, shape index: {}]   ;;  %s3204_s8 = inlined_call_operand.vmem [shape: bf16[32,64], index: 8, kind: input, shape index: {}]   ;;  %s3205_s9 = inlined_call_operand.vmem [shape: f32[1,64], index: 9, kind: input, shape index: {}]   ;;  %s3206_s10 = inlined_call_operand.vmem [shape: bf16[64,32], index: 10, kind: input, shape index: {}]   ;;  %s3207_s11 = inlined_call_operand.vmem [shape: f32[1,32], index: 11, kind: input, shape index: {}]   ;;  %s3208_s12 = inlined_call_operand.vmem [shape: f32[3,1,32], index: 12, kind: input, shape index: {}]   ;;  %s3209_s13 = inlined_call_operand.vmem [shape: f32[3,1,32], index: 13, kind: input, shape index: {}]   ;;  %s3210_s14 = inlined_call_operand.hbm [shape: f32[16,32], index: 14, kind: output, shape index: {}]  }
   0x1   :  { %v2534_v0 = vld [vmem:[%s3200_s4 + $0x8] sm:$0xff]  ;;  %v2544_v2 = vld [vmem:[%s3200_s4] sm:$0xff] }
   0x2   :  { %v2539_v1 = vld [vmem:[%s3200_s4 + $0x48] sm:$0xff]  ;;  %v2549_v3 = vld [vmem:[%s3200_s4 + $0x40] sm:$0xff]  ;;  %111 = vmatpush.bf16.msra.mxu0 %v2534_v0 }
   0x3   :  { %v2554_v4 = vld [vmem:[%s3196_s0] sm:$0xff]  ;;  %142 = vmatpush.bf16.msra.mxu1 %v2539_v1  ;;  %v2561_v5 = vld [vmem:[%s3196_s0 + $0x8] sm:$0xff] }
   0x4   :  { %v2565_v6 = vpack.c.bf16 %v2561_v5, %v2554_v4 }
   0x6   :  { %112 = vmatpush.bf16.msra.mxu0 %v2544_v2 }
   0x7   :  { %143 = vmatpush.bf16.msra.mxu1 %v2549_v3 }
   0x9   :  { %2061 = vmatmul.msk.bf16.vlgmr.msra.gmra.mxu0 %vm101_vm0, %v2565_v6 }
   0xa   :  { %2070 = vmatmul.msk.bf16.vlgmr.msra.gmra.mxu1 %vm101_vm0, %v2565_v6 }
   0xb   :  { %19 = vsyncpa [#allocation3], 0  ;;  %v2576_v7 = vld [vmem:[%s3201_s5 + $0x4] ss:$0 sm:$0xff]  ;;  %v2581_v9 = vld [vmem:[%s3201_s5] ss:$0 sm:$0xff] }
   0xc   :  { %vm183_vm1 = vcmask 64512   ;;  %v2594_v23 = vld [vmem:[%s3200_s4 + $0x88] sm:$0xff]  ;;  %v2600_v24 = vld [vmem:[%s3200_s4 + $0x80] sm:$0xff]  ;;  %v2451_v28 = vmov 0.0   ;;  %vm220_vm4 = vcmask 1043456   ;;  %v2635_v59 = vld [vmem:[%s3200_s4 + $0x18] sm:$0xff] }
   0xd   :  { %173 = vmatpush.bf16.msra.mxu2 %v2594_v23  ;;  %v53_v25 = vld [vmem:[%s3198_s2] sm:$0xff]  ;;  %v54_v26 = vld [vmem:[%s3198_s2 + $0x8] sm:$0xff]  ;;  %v2640_v60 = vld [vmem:[%s3200_s4 + $0x58] sm:$0xff]  ;;  %s2454_s2 = smov 128  }
   0xe   :  { %vm55_vm2 = vcmp.lt.f32.partialorder %v53_v25, 0.5  ;;  %vm56_vm3 = vcmp.lt.f32.partialorder %v54_v26, 0.5  ;;  %v2626_v51 = vld [vmem:[%s3201_s5 + $0x8] ss:$0 sm:$0xff]  ;;  %v2646_v61 = vld [vmem:[%s3200_s4 + $0x10] sm:$0xff] }
   0xf   :  { %v2612_v29 = vsel %vm55_vm2, -1e+09, %v2451_v28  ;;  %v2615_v32 = vsel %vm56_vm3, -1e+09, %v2451_v28  ;;  %v2652_v62 = vld [vmem:[%s3200_s4 + $0x50] sm:$0xff] }
  0x10   :  { %v2676_v25 = vld [vmem:[%s3201_s5 + $0x1] ss:$0 sm:$0xff] }
  0x11   :  { %174 = vmatpush.bf16.msra.mxu2 %v2600_v24 }
  0x14   :  { %2079 = vmatmul.msk.bf16.vlgmr.msra.gmra.mxu2 %vm101_vm0, %v2565_v6 }
  0x86   :  { %v114_v11 = vpop.f32.mrf.mxu0 }
  0x87   :  { %v145_v8 = vpop.f32.mrf.mxu1  ;;  %v115_v13 = vadd.f32 %v2581_v9, %v114_v11 }
  0x88   :  { %v146_v10 = vadd.f32 %v2576_v7, %v145_v8 }
  0x89   :  { %v119_v16 = vpack.c.bf16 %v115_v13, %v115_v13 }
  0x8a   :  { %v150_v12 = vpack.c.bf16 %v146_v10, %v146_v10 }
  0x8c   :  { %v188_v14 = vsel %vm183_vm1, %v150_v12, 0 }
  0x8d   :  { %197 = vmatpush.bf16.xpose.msra.mxu3 %v188_v14 }
  0x8e   :  { %v116_v19 = vpop.f32.mrf.mxu0 }
  0x8f   :  { %v147_v15 = vpop.f32.mrf.mxu1  ;;  %v117_v21 = vadd.f32 %v2581_v9, %v116_v19 }
  0x90   :  { %v148_v17 = vadd.f32 %v2576_v7, %v147_v15 }
  0x91   :  { %v120_v22 = vpack.c.bf16 %v117_v21, %v117_v21 }
  0x92   :  { %v151_v18 = vpack.c.bf16 %v148_v17, %v148_v17 }
  0x94   :  { %2080 = vmatmul.msk.bf16.vlgmr.msra.gmra.mxu3 %vm183_vm1, %v119_v16  ;;  %v241_v20 = vsel %vm183_vm1, %v151_v18, 0 }
  0x95   :  { %250 = vmatpush.bf16.xpose.msrb.mxu1 %v241_v20  ;;  %333 = vmatpush.bf16.msrb.mxu3 %v2635_v59  ;;  %v2671_v20 = vld [vmem:[%s3201_s5 + $0x5] ss:$0 sm:$0xff] }
  0x97   :  { %v176_v50 = vpop.f32.mrf.mxu2 }
  0x98   :  { %v177_v53 = vadd.f32 %v2626_v51, %v176_v50 }
  0x99   :  { %334 = vmatpush.bf16.msrb.mxu3 %v2646_v61 }
  0x9a   :  { %v181_v55 = vpack.c.bf16 %v177_v53, %v177_v53 }
  0x9c   :  { %2082 = vmatmul.msk.bf16.vlgmr.msrb.gmra.mxu1 %vm183_vm1, %v120_v22  ;;  %v222_v57 = vsel %vm220_vm4, %v181_v55, 0  ;;  %v2707_v55 = vld [vmem:[%s3201_s5 + $0x9] ss:$0 sm:$0xff] }
  0x9d   :  { %231 = vmatpush.bf16.msrb.mxu0 %v222_v57 }
  0x9f   :  { %v178_v52 = vpop.f32.mrf.mxu2 }
  0xa0   :  { %v179_v54 = vadd.f32 %v2626_v51, %v178_v52 }
  0xa1   :  { %364 = vmatpush.bf16.msra.mxu0 %v2640_v60 }
  0xa2   :  { %v182_v56 = vpack.c.bf16 %v179_v54, %v179_v54 }
  0xa4   :  { %v274_v58 = vsel %vm220_vm4, %v182_v56, 0  ;;  %2107 = vmatmul.msk.bf16.vlgmr.msrb.gmra.mxu3 %vm101_vm0, %v2565_v6 }
  0xa5   :  { %283 = vmatpush.bf16.msrb.mxu2 %v274_v58  ;;  %365 = vmatpush.bf16.msra.mxu0 %v2652_v62 }
 0x117   :  { %v199_v27 = vpop.f32.mrf.mxu3 }
 0x118   :  { %v203_v30 = vmul.f32 0.35355338, %v199_v27 }
 0x119   :  { %v252_v31 = vpop.f32.mrf.mxu1 }
 0x11a   :  { %v256_v33 = vmul.f32 0.35355338, %v252_v31  ;;  %v204_v34 = vadd.f32 %v203_v30, %v2612_v29 }
 0x11c   :  { %v205_v35 = vsel %vm183_vm1, %v204_v34, -inf  ;;  %v257_v36 = vadd.f32 %v256_v33, %v2615_v32 }
 0x11d   :  { %206 = vmax.xlane.f32.xlu0 %v205_v35 }
 0x11e   :  { %v258_v37 = vsel %vm183_vm1, %v257_v36, -inf }
 0x11f   :  { %259 = vmax.xlane.f32.xlu1 %v258_v37  ;;  %v201_v38 = vpop.f32.mrf.mxu3 }
 0x121   :  { %v254_v39 = vpop.f32.mrf.mxu1 }
 0x127   :  { %v336_v27 = vpop.f32.mrf.mxu3 }
 0x128   :  { %v337_v31 = vadd.f32 %v2676_v25, %v336_v27 }
 0x12a   :  { %v341_v35 = vpack.c.bf16 %v337_v31, %v337_v31 }
 0x12f   :  { %v338_v38 = vpop.f32.mrf.mxu3 }
 0x190   :  { %v207_v40 = vpop.xlane.xlu0 %206 }
 0x191   :  { %v208_v41 = vsub.f32 %v204_v34, %v207_v40  ;;  %v339_v40 = vadd.f32 %v2676_v25, %v338_v38  ;;  %v2741_v38 = vld [vmem:[%s3200_s4 + $0x60] sm:$0xff] }
 0x192   :  { %v260_v42 = vpop.xlane.xlu1 %259 }
 0x193   :  { %v209_v43 = vmul.f32 1.442695, %v208_v41  ;;  %v261_v44 = vsub.f32 %v257_v36, %v260_v42  ;;  %v342_v41 = vpack.c.bf16 %v339_v40, %v339_v40  ;;  %v2689_v42 = vld [vmem:[%s3200_s4 + $0x98] sm:$0xff] }
 0x194   :  { %395 = vmatpush.bf16.msra.mxu1 %v2689_v42 }
 0x195   :  { %2347 = vpow2.f32 %v209_v43  ;;  %v262_v45 = vmul.f32 1.442695, %v261_v44  ;;  %v2695_v43 = vld [vmem:[%s3200_s4 + $0x90] sm:$0xff] }
 0x197   :  { %2349 = vpow2.f32 %v262_v45 }
 0x198   :  { %396 = vmatpush.bf16.msra.mxu1 %v2695_v43 }
 0x19b   :  { %v2348_v46 = vpop.eup %2347  ;;  %2125 = vmatmul.msk.bf16.vlgmr.msra.gmra.mxu1 %vm101_vm0, %v2565_v6 }
 0x19c   :  { %v211_v47 = vsel %vm183_vm1, %v2348_v46, 0.0 }
 0x19d   :  { %v2350_v48 = vpop.eup %2349  ;;  %212 = vadd.xlane.f32.xlu0 %v211_v47 }
 0x19e   :  { %v264_v49 = vsel %vm183_vm1, %v2350_v48, 0.0 }
 0x19f   :  { %265 = vadd.xlane.f32.xlu1 %v264_v49 }
 0x210   :  { %v213_v63 = vpop.xlane.xlu0 %212 }
 0x211   :  { %2351 = vrcp.f32 %v213_v63 }
 0x212   :  { %v266_v8 = vpop.xlane.xlu1 %265 }
 0x213   :  { %2353 = vrcp.f32 %v266_v8 }
 0x217   :  { %v2352_v10 = vpop.eup %2351 }
 0x218   :  { %v215_v11 = vmul.f32 %v2352_v10, %v2348_v46  ;;  %v398_v56 = vpop.f32.mrf.mxu1 }
 0x219   :  { %v2354_v12 = vpop.eup %2353  ;;  %v399_v57 = vadd.f32 %v2707_v55, %v398_v56 }
 0x21a   :  { %v268_v13 = vmul.f32 %v2354_v12, %v2350_v48  ;;  %v216_v14 = vpack.c.bf16 %v215_v11, %v215_v11 }
 0x21b   :  { %v403_v58 = vpack.c.bf16 %v399_v57, %v399_v57  ;;  %v2772_v57 = vld [vmem:[%s3201_s5 + $0x2] ss:$0 sm:$0xff] }
 0x21c   :  { %2081 = vmatmul.msk.bf16.vlgmr.msrb.gmra.mxu0 %vm183_vm1, %v216_v14  ;;  %v269_v15 = vpack.c.bf16 %v268_v13, %v268_v13 }
 0x21d   :  { %v442_v63 = vsel %vm220_vm4, %v403_v58, 0 }
 0x21e   :  { %2083 = vmatmul.msk.bf16.vlgmr.msrb.gmra.mxu2 %vm183_vm1, %v269_v15  ;;  %451 = vmatpush.bf16.msra.mxu3 %v442_v63 }
 0x220   :  { %v400_v8 = vpop.f32.mrf.mxu1 }
 0x221   :  { %v401_v11 = vadd.f32 %v2707_v55, %v400_v8 }
 0x223   :  { %v404_v14 = vpack.c.bf16 %v401_v11, %v401_v11 }
 0x22c   :  { %2116 = vmatmul.msk.bf16.vlgmr.msra.gmra.mxu0 %vm101_vm0, %v2565_v6 }
 0x299   :  { %v2662_v16 = vpop.f32.mrf.mxu0 }
 0x2a1   :  { %v235_v17 = vpop.f32.mrf.mxu0  ;;  %v2664_v18 = vpop.f32.mrf.mxu2 }
 0x2a2   :  { %v289_v19 = vpack.c.bf16 %v2664_v18, %v2662_v16 }
 0x2a9   :  { %v287_v21 = vpop.f32.mrf.mxu2  ;;  %v367_v22 = vpop.f32.mrf.mxu0 }
 0x2aa   :  { %v368_v26 = vadd.f32 %v2671_v20, %v367_v22  ;;  %v494_v21 = vsel %vm220_vm4, %v404_v14, 0 }
 0x2ab   :  { %503 = vmatpush.bf16.msrb.mxu1 %v494_v21 }
 0x2ac   :  { %v372_v30 = vpack.c.bf16 %v368_v26, %v368_v26 }
 0x2ae   :  { %v409_v33 = vsel %vm183_vm1, %v372_v30, 0 }
 0x2af   :  { %418 = vmatpush.bf16.xpose.msra.mxu2 %v409_v33  ;;  %v2718_v33 = vld [vmem:[%s3200_s4 + $0x28] sm:$0xff] }
 0x2b1   :  { %v369_v34 = vpop.f32.mrf.mxu0 }
 0x2b2   :  { %v370_v36 = vadd.f32 %v2671_v20, %v369_v34  ;;  %v2723_v34 = vld [vmem:[%s3200_s4 + $0x68] sm:$0xff] }
 0x2b3   :  { %625 = vmatpush.bf16.msra.mxu1 %v2723_v34 }
 0x2b4   :  { %v373_v37 = vpack.c.bf16 %v370_v36, %v370_v36 }
 0x2b6   :  { %2126 = vmatmul.msk.bf16.vlgmr.msra.gmra.mxu2 %vm183_vm1, %v341_v35  ;;  %v461_v39 = vsel %vm183_vm1, %v373_v37, 0  ;;  %v290_v35 = vld [vmem:[%s3202_s6] sm:$0xf] }
 0x2b7   :  { %470 = vmatpush.bf16.xpose.msrb.mxu0 %v461_v39  ;;  %v2729_v36 = vsel %vm220_vm4, %v290_v35, 0  ;;  %v2736_v37 = vld [vmem:[%s3200_s4 + $0x20] sm:$0xff]  ;;  %626 = vmatpush.bf16.msra.mxu1 %v2741_v38 }
 0x2b8   :  { %545 = vmatpush.bf16.msrb.mxu3 %v2729_v36 }
 0x2be   :  { %2128 = vmatmul.msk.bf16.vlgmr.msrb.gmra.mxu0 %vm183_vm1, %v342_v41 }
 0x2bf   :  { %594 = vmatpush.bf16.msra.mxu0 %v2718_v33 }
 0x2c3   :  { %595 = vmatpush.bf16.msra.mxu0 %v2736_v37 }
 0x2ce   :  { %2156 = vmatmul.msk.bf16.vlgmr.msra.gmra.mxu0 %vm101_vm0, %v2565_v6 }
 0x339   :  { %v420_v44 = vpop.f32.mrf.mxu2 }
 0x33a   :  { %v424_v45 = vmul.f32 0.35355338, %v420_v44 }
 0x33b   :  { %v472_v46 = vpop.f32.mrf.mxu0 }
 0x33c   :  { %v476_v47 = vmul.f32 0.35355338, %v472_v46  ;;  %v425_v48 = vadd.f32 %v424_v45, %v2612_v29 }
 0x33e   :  { %v426_v49 = vsel %vm183_vm1, %v425_v48, -inf  ;;  %v477_v50 = vadd.f32 %v476_v47, %v2615_v32 }
 0x33f   :  { %427 = vmax.xlane.f32.xlu0 %v426_v49  ;;  %v2130_v49 = vld [vmem:[%s3202_s6 + $0x4] sm:$0xf] }
 0x340   :  { %v478_v52 = vsel %vm183_vm1, %v477_v50, -inf }
 0x341   :  { %479 = vmax.xlane.f32.xlu2 %v478_v52  ;;  %v422_v53 = vpop.f32.mrf.mxu2 }
 0x343   :  { %v474_v54 = vpop.f32.mrf.mxu0 }
 0x34b   :  { %v597_v63 = vpop.f32.mrf.mxu0 }
 0x3b2   :  { %v428_v10 = vpop.xlane.xlu0 %427 }
 0x3b3   :  { %v429_v12 = vsub.f32 %v425_v48, %v428_v10  ;;  %v598_v10 = vadd.f32 %v2772_v57, %v597_v63 }
 0x3b4   :  { %v480_v13 = vpop.xlane.xlu2 %479 }
 0x3b5   :  { %v430_v15 = vmul.f32 1.442695, %v429_v12  ;;  %v481_v17 = vsub.f32 %v477_v50, %v480_v13  ;;  %v2760_v50 = vsel %vm220_vm4, %v2130_v49, 0  ;;  %v602_v13 = vpack.c.bf16 %v598_v10, %v598_v10 }
 0x3b6   :  { %525 = vmatpush.bf16.msrb.mxu2 %v2760_v50 }
 0x3b7   :  { %2355 = vpow2.f32 %v430_v15  ;;  %v482_v22 = vmul.f32 1.442695, %v481_v17  ;;  %v599_v17 = vpop.f32.mrf.mxu0 }
 0x3b9   :  { %2357 = vpow2.f32 %v482_v22  ;;  %v600_v22 = vadd.f32 %v2772_v57, %v599_v17 }
 0x3bd   :  { %v2356_v26 = vpop.eup %2355 }
 0x3be   :  { %v432_v27 = vsel %vm183_vm1, %v2356_v26, 0.0 }
 0x3bf   :  { %v2358_v30 = vpop.eup %2357  ;;  %433 = vadd.xlane.f32.xlu1 %v432_v27  ;;  %v2785_v27 = vld [vmem:[%s3200_s4 + $0xa8] sm:$0xff] }
 0x3c0   :  { %v484_v31 = vsel %vm183_vm1, %v2358_v30, 0.0  ;;  %656 = vmatpush.bf16.msra.mxu2 %v2785_v27 }
 0x3c1   :  { %485 = vadd.xlane.f32.xlu2 %v484_v31 }
 0x432   :  { %v434_v39 = vpop.xlane.xlu1 %433 }
 0x433   :  { %2359 = vrcp.f32 %v434_v39 }
 0x434   :  { %v486_v40 = vpop.xlane.xlu2 %485 }
 0x435   :  { %2361 = vrcp.f32 %v486_v40 }
 0x439   :  { %v2360_v41 = vpop.eup %2359 }
 0x43a   :  { %v436_v44 = vmul.f32 %v2360_v41, %v2356_v26  ;;  %v603_v26 = vpack.c.bf16 %v600_v22, %v600_v22 }
 0x43b   :  { %v2362_v45 = vpop.eup %2361 }
 0x43c   :  { %v437_v46 = vpack.c.bf16 %v436_v44, %v436_v44  ;;  %v488_v47 = vmul.f32 %v2362_v45, %v2358_v30  ;;  %v2791_v30 = vld [vmem:[%s3200_s4 + $0xa0] sm:$0xff] }
 0x43d   :  { %657 = vmatpush.bf16.msra.mxu2 %v2791_v30 }
 0x43e   :  { %v489_v48 = vpack.c.bf16 %v488_v47, %v488_v47  ;;  %2127 = vmatmul.msk.bf16.vlgmr.msra.gmra.mxu3 %vm183_vm1, %v437_v46 }
 0x440   :  { %2129 = vmatmul.msk.bf16.vlgmr.msrb.gmra.mxu1 %vm183_vm1, %v489_v48 }
 0x44e   :  { %2132 = vmatmul.msk.bf16.vlgmr.msrb.gmra.mxu3 %vm183_vm1, %v289_v19  ;;  %v2767_v19 = vld [vmem:[%s3201_s5 + $0x6] ss:$0 sm:$0xff] }
 0x450   :  { %2165 = vmatmul.msk.bf16.vlgmr.msra.gmra.mxu1 %vm101_vm0, %v2565_v6 }
 0x4bd   :  { %v505_v52 = vpop.f32.mrf.mxu1 }
 0x4c1   :  { %v453_v53 = vpop.f32.mrf.mxu3 }
 0x4c2   :  { %v509_v54 = vpack.c.bf16 %v505_v52, %v453_v53 }
 0x4c4   :  { %2131 = vmatmul.msk.bf16.vlgmr.msrb.gmra.mxu2 %vm183_vm1, %v509_v54 }
 0x4c5   :  { %v507_v16 = vpop.f32.mrf.mxu1 }
 0x4c6   :  { %v2811_v16 = vld [vmem:[%s3201_s5 + $0xa] ss:$0 sm:$0xff] }
 0x4c9   :  { %v455_v18 = vpop.f32.mrf.mxu3 }
 0x4cd   :  { %v628_v56 = vpop.f32.mrf.mxu1 }
 0x4ce   :  { %v629_v58 = vadd.f32 %v2767_v19, %v628_v56 }
 0x4d0   :  { %v633_v8 = vpack.c.bf16 %v629_v58, %v629_v58 }
 0x4d1   :  { %v2793_v31 = vpop.f32.mrf.mxu3 }
 0x4d2   :  { %v670_v11 = vsel %vm183_vm1, %v633_v8, 0 }
 0x4d3   :  { %679 = vmatpush.bf16.xpose.msra.mxu3 %v670_v11 }
 0x4d4   :  { %2174 = vmatmul.msk.bf16.vlgmr.msra.gmra.mxu2 %vm101_vm0, %v2565_v6 }
 0x4d5   :  { %v630_v12 = vpop.f32.mrf.mxu1 }
 0x4d6   :  { %v631_v14 = vadd.f32 %v2767_v19, %v630_v12 }
 0x4d8   :  { %v634_v15 = vpack.c.bf16 %v631_v14, %v631_v14 }
 0x4d9   :  { %v2798_v35 = vpop.f32.mrf.mxu3 }
 0x4da   :  { %2175 = vmatmul.msk.bf16.vlgmr.msra.gmra.mxu3 %vm183_vm1, %v602_v13  ;;  %v722_v21 = vsel %vm183_vm1, %v634_v15, 0 }
 0x4db   :  { %731 = vmatpush.bf16.xpose.msrb.mxu1 %v722_v21 }
 0x4e2   :  { %2177 = vmatmul.msk.bf16.vlgmr.msrb.gmra.mxu1 %vm183_vm1, %v603_v26 }
 0x547   :  { %v2804_v53 = vpop.f32.mrf.mxu2 }
 0x54f   :  { %v2806_v54 = vpop.f32.mrf.mxu2 }
 0x557   :  { %v659_v18 = vpop.f32.mrf.mxu2 }
 0x558   :  { %v660_v56 = vadd.f32 %v2811_v16, %v659_v18 }
 0x55a   :  { %v664_v63 = vpack.c.bf16 %v660_v56, %v660_v56 }
 0x55c   :  { %v703_v11 = vsel %vm220_vm4, %v664_v63, 0 }
 0x55d   :  { %v681_v39 = vpop.f32.mrf.mxu3  ;;  %712 = vmatpush.bf16.msrb.mxu0 %v703_v11 }
 0x55e   :  { %v685_v40 = vmul.f32 0.35355338, %v681_v39 }
 0x55f   :  { %v733_v41 = vpop.f32.mrf.mxu1  ;;  %v661_v15 = vpop.f32.mrf.mxu2 }
 0x560   :  { %v737_v44 = vmul.f32 0.35355338, %v733_v41  ;;  %v686_v45 = vadd.f32 %v685_v40, %v2612_v29  ;;  %v662_v17 = vadd.f32 %v2811_v16, %v661_v15 }
 0x562   :  { %v687_v46 = vsel %vm183_vm1, %v686_v45, -inf  ;;  %v738_v47 = vadd.f32 %v737_v44, %v2615_v32  ;;  %v665_v21 = vpack.c.bf16 %v662_v17, %v662_v17  ;;  %v2822_v44 = vld [vmem:[%s3200_s4 + $0x78] sm:$0xff] }
 0x563   :  { %688 = vmax.xlane.f32.xlu2 %v687_v46  ;;  %868 = vmatpush.bf16.msra.mxu1 %v2822_v44  ;;  %v2836_v46 = vld [vmem:[%s3200_s4 + $0x38] sm:$0xff] }
 0x564   :  { %v739_v48 = vsel %vm183_vm1, %v738_v47, -inf  ;;  %v755_v22 = vsel %vm220_vm4, %v665_v21, 0  ;;  %837 = vmatpush.bf16.msra.mxu0 %v2836_v46 }
 0x565   :  { %740 = vmax.xlane.f32.xlu0 %v739_v48  ;;  %v683_v49 = vpop.f32.mrf.mxu3  ;;  %764 = vmatpush.bf16.msrb.mxu2 %v755_v22 }
 0x567   :  { %v735_v52 = vpop.f32.mrf.mxu1 }
 0x5d6   :  { %v689_v58 = vpop.xlane.xlu2 %688 }
 0x5d7   :  { %v690_v8 = vsub.f32 %v686_v45, %v689_v58  ;;  %v2828_v45 = vld [vmem:[%s3200_s4 + $0x70] sm:$0xff] }
 0x5d8   :  { %v741_v10 = vpop.xlane.xlu0 %740  ;;  %869 = vmatpush.bf16.msra.mxu1 %v2828_v45 }
 0x5d9   :  { %v691_v12 = vmul.f32 1.442695, %v690_v8  ;;  %v742_v13 = vsub.f32 %v738_v47, %v741_v10  ;;  %v2842_v47 = vld [vmem:[%s3200_s4 + $0x30] sm:$0xff]  ;;  %v2852_v10 = vld [vmem:[%s3201_s5 + $0x7] ss:$0 sm:$0xff] }
 0x5da   :  { %838 = vmatpush.bf16.msra.mxu0 %v2842_v47 }
 0x5db   :  { %2363 = vpow2.f32 %v691_v12  ;;  %v743_v14 = vmul.f32 1.442695, %v742_v13  ;;  %2213 = vmatmul.msk.bf16.vlgmr.msra.gmra.mxu1 %vm101_vm0, %v2565_v6  ;;  %v2179_v12 = vld [vmem:[%s3202_s6 + $0x8] sm:$0xf] }
 0x5dc   :  { %v2858_v13 = vsel %vm220_vm4, %v2179_v12, 0  ;;  %v2886_v12 = vld [vmem:[%s3200_s4 + $0xb0] sm:$0xff] }
 0x5dd   :  { %2365 = vpow2.f32 %v743_v14  ;;  %786 = vmatpush.bf16.msrb.mxu3 %v2858_v13 }
 0x5e1   :  { %v2364_v26 = vpop.eup %2363 }
 0x5e2   :  { %v693_v39 = vsel %vm183_vm1, %v2364_v26, 0.0 }
 0x5e3   :  { %v2366_v40 = vpop.eup %2365  ;;  %694 = vadd.xlane.f32.xlu1 %v693_v39 }
 0x5e4   :  { %v745_v41 = vsel %vm183_vm1, %v2366_v40, 0.0 }
 0x5e5   :  { %746 = vadd.xlane.f32.xlu2 %v745_v41 }
 0x656   :  { %v695_v48 = vpop.xlane.xlu1 %694 }
 0x657   :  { %2367 = vrcp.f32 %v695_v48 }
 0x658   :  { %v747_v49 = vpop.xlane.xlu2 %746  ;;  %v871_v11 = vpop.f32.mrf.mxu1 }
 0x659   :  { %2369 = vrcp.f32 %v747_v49  ;;  %v872_v14 = vadd.f32 %v2852_v10, %v871_v11  ;;  %v2880_v11 = vld [vmem:[%s3200_s4 + $0xb8] sm:$0xff] }
 0x65a   :  { %899 = vmatpush.bf16.msra.mxu2 %v2880_v11 }
 0x65b   :  { %v876_v15 = vpack.c.bf16 %v872_v14, %v872_v14  ;;  %v548_v14 = vadd.f32 %v2793_v31, %v2804_v53 }
 0x65d   :  { %v2368_v52 = vpop.eup %2367  ;;  %v913_v17 = vsel %vm183_vm1, %v876_v15, 0 }
 0x65e   :  { %v697_v18 = vmul.f32 %v2368_v52, %v2364_v26  ;;  %922 = vmatpush.bf16.xpose.msra.mxu3 %v913_v17  ;;  %900 = vmatpush.bf16.msra.mxu2 %v2886_v12 }
 0x65f   :  { %v2370_v56 = vpop.eup %2369 }
 0x660   :  { %v698_v58 = vpack.c.bf16 %v697_v18, %v697_v18  ;;  %v749_v63 = vmul.f32 %v2370_v56, %v2366_v40  ;;  %v873_v21 = vpop.f32.mrf.mxu1  ;;  %v2871_v56 = vld [vmem:[%s3201_s5 + $0x3] ss:$0 sm:$0xff] }
 0x661   :  { %v874_v22 = vadd.f32 %v2852_v10, %v873_v21 }
 0x662   :  { %v750_v8 = vpack.c.bf16 %v749_v63, %v749_v63  ;;  %2176 = vmatmul.msk.bf16.vlgmr.msrb.gmra.mxu0 %vm183_vm1, %v698_v58 }
 0x663   :  { %v877_v26 = vpack.c.bf16 %v874_v22, %v874_v22 }
 0x664   :  { %2178 = vmatmul.msk.bf16.vlgmr.msrb.gmra.mxu2 %vm183_vm1, %v750_v8 }
 0x665   :  { %v965_v39 = vsel %vm183_vm1, %v877_v26, 0 }
 0x666   :  { %974 = vmatpush.bf16.xpose.msrb.mxu1 %v965_v39 }
 0x66e   :  { %1138 = vmatpush.bf16.msra.mxu1 %v2539_v1 }
 0x672   :  { %2204 = vmatmul.msk.bf16.vlgmr.msra.gmra.mxu0 %vm101_vm0, %v2565_v6  ;;  %1139 = vmatpush.bf16.msra.mxu1 %v2549_v3 }
 0x674   :  { %2222 = vmatmul.msk.bf16.vlgmr.msra.gmra.mxu2 %vm101_vm0, %v2565_v6  ;;  %v2904_v6 = vld [vmem:[%s3201_s5 + $0xb] ss:$0 sm:$0xff] }
 0x6df   :  { %v714_v40 = vpop.f32.mrf.mxu0 }
 0x6e7   :  { %v716_v41 = vpop.f32.mrf.mxu0  ;;  %v766_v48 = vpop.f32.mrf.mxu2 }
 0x6e8   :  { %v770_v49 = vpack.c.bf16 %v766_v48, %v714_v40 }
 0x6ea   :  { %2180 = vmatmul.msk.bf16.vlgmr.msrb.gmra.mxu3 %vm183_vm1, %v770_v49 }
 0x6ef   :  { %v768_v52 = vpop.f32.mrf.mxu2  ;;  %v840_v18 = vpop.f32.mrf.mxu0 }
 0x6f0   :  { %v841_v58 = vadd.f32 %v2871_v56, %v840_v18 }
 0x6f2   :  { %v845_v8 = vpack.c.bf16 %v841_v58, %v841_v58 }
 0x6f7   :  { %v842_v63 = vpop.f32.mrf.mxu0  ;;  %v902_v18 = vpop.f32.mrf.mxu2 }
 0x6f8   :  { %v843_v1 = vadd.f32 %v2871_v56, %v842_v63 }
 0x6fa   :  { %v846_v3 = vpack.c.bf16 %v843_v1, %v843_v1  ;;  %2223 = vmatmul.msk.bf16.vlgmr.msra.gmra.mxu3 %vm183_vm1, %v845_v8 }
 0x6fc   :  { %2225 = vmatmul.msk.bf16.vlgmr.msrb.gmra.mxu1 %vm183_vm1, %v846_v3 }
 0x76d   :  { %v788_v15 = vpop.f32.mrf.mxu3 }
 0x76e   :  { %v2891_v17 = vadd.f32 %v788_v15, %v548_v14 }
 0x775   :  { %v2895_v21 = vpop.f32.mrf.mxu3 }
 0x779   :  { %v976_v22 = vpop.f32.mrf.mxu1 }
 0x77a   :  { %v980_v26 = vmul.f32 0.35355338, %v976_v22  ;;  %v904_v22 = vpop.f32.mrf.mxu2 }
 0x77c   :  { %v981_v39 = vadd.f32 %v980_v26, %v2615_v32  ;;  %v903_v32 = vadd.f32 %v2904_v6, %v902_v18  ;;  %v905_v26 = vadd.f32 %v2904_v6, %v904_v22 }
 0x77d   :  { %v924_v40 = vpop.f32.mrf.mxu3 }
 0x77e   :  { %v928_v41 = vmul.f32 0.35355338, %v924_v40  ;;  %v982_v48 = vsel %vm183_vm1, %v981_v39, -inf  ;;  %v907_v8 = vpack.c.bf16 %v903_v32, %v903_v32  ;;  %v908_v40 = vpack.c.bf16 %v905_v26, %v905_v26 }
 0x77f   :  { %983 = vmax.xlane.f32.xlu0 %v982_v48 }
 0x780   :  { %v929_v49 = vadd.f32 %v928_v41, %v2612_v29  ;;  %v946_v29 = vsel %vm220_vm4, %v907_v8, 0  ;;  %v998_v48 = vsel %vm220_vm4, %v908_v40, 0 }
 0x781   :  { %v978_v31 = vpop.f32.mrf.mxu1  ;;  %955 = vmatpush.bf16.msrb.mxu0 %v946_v29  ;;  %1007 = vmatpush.bf16.msrb.mxu2 %v998_v48 }
 0x782   :  { %v930_v53 = vsel %vm183_vm1, %v929_v49, -inf  ;;  %v2227_v31 = vld [vmem:[%s3202_s6 + $0xc] sm:$0xf] }
 0x783   :  { %931 = vmax.xlane.f32.xlu1 %v930_v53 }
 0x785   :  { %v926_v52 = vpop.f32.mrf.mxu3  ;;  %1119 = vmatpush.bf16.msra.mxu0 %v2534_v0  ;;  %1154 = vmatpush.bf16.msra.mxu2 %v2594_v23 }
 0x789   :  { %1120 = vmatpush.bf16.msra.mxu0 %v2544_v2  ;;  %1155 = vmatpush.bf16.msra.mxu2 %v2600_v24  ;;  %v2920_v2 = vsel %vm220_vm4, %v2227_v31, 0 }
 0x78a   :  { %1029 = vmatpush.bf16.msrb.mxu3 %v2920_v2 }
 0x7f2   :  { %v984_v58 = vpop.xlane.xlu0 %983 }
 0x7f3   :  { %v985_v63 = vsub.f32 %v981_v39, %v984_v58 }
 0x7f5   :  { %v986_v1 = vmul.f32 1.442695, %v985_v63 }
 0x7f6   :  { %v932_v3 = vpop.xlane.xlu1 %931 }
 0x7f7   :  { %2371 = vpow2.f32 %v986_v1  ;;  %v933_v14 = vsub.f32 %v929_v49, %v932_v3 }
 0x7f9   :  { %v934_v15 = vmul.f32 1.442695, %v933_v14 }
 0x7fb   :  { %2373 = vpow2.f32 %v934_v15  ;;  %v2929_v15 = vld [vmem:[%s3203_s7] ss:$0 sm:$0xff] }
 0x7fd   :  { %v2372_v41 = vpop.eup %2371 }
 0x7fe   :  { %v988_v39 = vsel %vm183_vm1, %v2372_v41, 0.0 }
 0x7ff   :  { %989 = vadd.xlane.f32.xlu2 %v988_v39 }
 0x801   :  { %v2374_v49 = vpop.eup %2373 }
 0x802   :  { %v936_v0 = vsel %vm183_vm1, %v2374_v49, 0.0 }
 0x803   :  { %937 = vadd.xlane.f32.xlu0 %v936_v0 }
 0x872   :  { %v990_v53 = vpop.xlane.xlu2 %989 }
 0x873   :  { %2375 = vrcp.f32 %v990_v53 }
 0x876   :  { %v938_v52 = vpop.xlane.xlu0 %937 }
 0x877   :  { %2377 = vrcp.f32 %v938_v52 }
 0x879   :  { %v2376_v23 = vpop.eup %2375 }
 0x87a   :  { %v992_v18 = vmul.f32 %v2376_v23, %v2372_v41  ;;  %v550_v41 = vadd.f32 %v2798_v35, %v2806_v54  ;;  %v2452_v23 = vmov 32.0  }
 0x87b   :  { %2379 = vrcp.f32 %v2452_v23 }
 0x87c   :  { %v993_v58 = vpack.c.bf16 %v992_v18, %v992_v18  ;;  %v794_v48 = vadd.f32 %v2895_v21, %v550_v41 }
 0x87d   :  { %v2378_v32 = vpop.eup %2377 }
 0x87e   :  { %v940_v63 = vmul.f32 %v2378_v32, %v2374_v49  ;;  %2226 = vmatmul.msk.bf16.vlgmr.msrb.gmra.mxu2 %vm183_vm1, %v993_v58 }
 0x880   :  { %v941_v24 = vpack.c.bf16 %v940_v63, %v940_v63 }
 0x881   :  { %v2380_v18 = vpop.eup %2379 }
 0x882   :  { %2224 = vmatmul.msk.bf16.vlgmr.msrb.gmra.mxu0 %vm183_vm1, %v941_v24  ;;  %v1054_v35 = vmul.f32 32.0, %v2380_v18  ;;  %vm1058_vm5 = vweird.f32 %v2380_v18 }
 0x884   :  { %v1055_v54 = vsub.f32 1.0, %v1054_v35 }
 0x8ff   :  { %v957_v8 = vpop.f32.mrf.mxu0 }
 0x901   :  { %v1009_v1 = vpop.f32.mrf.mxu2 }
 0x902   :  { %v1013_v3 = vpack.c.bf16 %v1009_v1, %v957_v8 }
 0x904   :  { %2228 = vmatmul.msk.bf16.vlgmr.msrb.gmra.mxu3 %vm183_vm1, %v1013_v3 }
 0x907   :  { %v959_v29 = vpop.f32.mrf.mxu0 }
 0x909   :  { %v1011_v14 = vpop.f32.mrf.mxu2 }
 0x987   :  { %v1031_v22 = vpop.f32.mrf.mxu3 }
 0x988   :  { %v1036_v26 = vadd.f32 %v1031_v22, %v2891_v17 }
 0x98a   :  { %v1041_v40 = vadd.f32 %v2929_v15, %v1036_v26  ;;  %v51_v26 = vld [vmem:[%s3197_s1] sm:$0xff] }
 0x98c   :  { %v1043_v39 = vadd.f32 %v1041_v40, %v2554_v4  ;;  %v1056_v4 = vmul.f32 %v2380_v18, %v1055_v54  ;;  %v52_v40 = vld [vmem:[%s3197_s1 + $0x8] sm:$0xff] }
 0x98d   :  { %v2953_v41 = vpack.c.bf16 %v52_v40, %v51_v26  ;;  %v2340_v26 = vld [vmem:[%s3209_s13] ss:$0 sm:$0xff] }
 0x98e   :  { %v1047_v49 = vsel %vm101_vm0, %v1043_v39, 0.0  ;;  %v1057_v58 = vadd.f32 %v2380_v18, %v1056_v4 }
 0x98f   :  { %1048 = vadd.xlane.f32.xlu1 %v1047_v49  ;;  %v1033_v0 = vpop.f32.mrf.mxu3  ;;  %2230 = vmatmul.msk.bf16.vlgmr.msra.gmra.mxu1 %vm101_vm0, %v2953_v41 }
 0x990   :  { %v1037_v31 = vadd.f32 %v1033_v0, %v794_v48  ;;  %v2941_v21 = vsel %vm1058_vm5, %v2380_v18, %v1057_v58  ;;  %2231 = vmatmul.msk.bf16.vlgmr.msra.gmra.mxu2 %vm101_vm0, %v2953_v41  ;;  %vm1945_vm5 = vcmask 523264  }
 0x992   :  { %v1042_v53 = vadd.f32 %v2929_v15, %v1037_v31 }
 0x994   :  { %v1044_v52 = vadd.f32 %v1042_v53, %v2561_v5 }
 0x996   :  { %v1050_v17 = vsel %vm101_vm0, %v1044_v52, 0.0 }
 0x997   :  { %1051 = vadd.xlane.f32.xlu2 %v1050_v17 }
 0xa02   :  { %v1049_v32 = vpop.xlane.xlu1 %1048 }
 0xa03   :  { %v1060_v63 = vmul.f32 %v2941_v21, %v1049_v32 }
 0xa05   :  { %v1062_v24 = vsub.f32 %v1043_v39, %v1060_v63  ;;  %v2339_v63 = vld [vmem:[%s3208_s12] ss:$0 sm:$0xff] }
 0xa07   :  { %v1064_v8 = vmul.f32 %v1062_v24, %v1062_v24 }
 0xa09   :  { %v1066_v5 = vsel %vm101_vm0, %v1064_v8, 0.0 }
 0xa0a   :  { %1067 = vadd.xlane.f32.xlu0 %v1066_v5  ;;  %v1052_v1 = vpop.xlane.xlu2 %1051 }
 0xa0b   :  { %v1061_v3 = vmul.f32 %v2941_v21, %v1052_v1 }
 0xa0d   :  { %v1063_v29 = vsub.f32 %v1044_v52, %v1061_v3  ;;  %v1077_v3 = vmul.f32 %v2339_v63, %v1062_v24  ;;  %v1141_v24 = vpop.f32.mrf.mxu1 }
 0xa0f   :  { %v1065_v14 = vmul.f32 %v1063_v29, %v1063_v29 }
 0xa11   :  { %v1069_v22 = vsel %vm101_vm0, %v1065_v14, 0.0 }
 0xa12   :  { %1070 = vadd.xlane.f32.xlu1 %v1069_v22  ;;  %v1078_v22 = vmul.f32 %v2339_v63, %v1063_v29  ;;  %v1142_v29 = vadd.f32 %v2576_v7, %v1141_v24 }
 0xa13   :  { %v1157_v24 = vpop.f32.mrf.mxu2 }
 0xa7d   :  { %v1068_v39 = vpop.xlane.xlu0 %1067 }
 0xa7e   :  { %v1072_v48 = vmul.f32 %v1068_v39, %v2941_v21 }
 0xa80   :  { %v1079_v49 = vadd.f32 1e-06, %v1072_v48 }
 0xa82   :  { %2381 = vrsqrt.f32 %v1079_v49  ;;  %vm1087_vm7 = vweird.f32 %v1079_v49 }
 0xa85   :  { %v1071_v0 = vpop.xlane.xlu1 %1070 }
 0xa86   :  { %v1073_v31 = vmul.f32 %v1071_v0, %v2941_v21 }
 0xa88   :  { %v2382_v53 = vpop.eup %2381  ;;  %v1080_v52 = vadd.f32 1e-06, %v1073_v31 }
 0xa89   :  { %v1082_v17 = vmul.f32 %v2382_v53, %v1079_v49  ;;  %vm1088_vm6 = vweird.f32 %v2382_v53 }
 0xa8a   :  { %2383 = vrsqrt.f32 %v1080_v52  ;;  %vm1089_vm8 = vmor %vm1087_vm7, %vm1088_vm6  ;;  %vm1097_vm10 = vweird.f32 %v1080_v52 }
 0xa8b   :  { %v1083_v23 = vmul.f32 %v2382_v53, %v1082_v17  ;;  %v1143_v17 = vpop.f32.mrf.mxu1 }
 0xa8d   :  { %v1084_v18 = vmul.f32 0.5, %v1083_v23  ;;  %v1144_v23 = vadd.f32 %v2576_v7, %v1143_v17  ;;  %v1159_v17 = vpop.f32.mrf.mxu2 }
 0xa8f   :  { %v1085_v35 = vsub.f32 1.5, %v1084_v18  ;;  %v1147_v18 = vpack.c.bf16 %v1144_v23, %v1144_v23  ;;  %v1160_v23 = vadd.f32 %v2626_v51, %v1159_v17 }
 0xa90   :  { %v2384_v54 = vpop.eup %2383 }
 0xa91   :  { %v1092_v4 = vmul.f32 %v2384_v54, %v1080_v52  ;;  %v1086_v58 = vmul.f32 %v2382_v53, %v1085_v35  ;;  %vm1098_vm9 = vweird.f32 %v2384_v54  ;;  %v1223_v35 = vsel %vm183_vm1, %v1147_v18, 0 }
 0xa92   :  { %vm1099_vm11 = vmor %vm1097_vm10, %vm1098_vm9  ;;  %1232 = vmatpush.bf16.xpose.msrb.mxu1 %v1223_v35  ;;  %v1163_v18 = vpack.c.bf16 %v1160_v23, %v1160_v23 }
 0xa93   :  { %v1093_v32 = vmul.f32 %v2384_v54, %v1092_v4  ;;  %v1090_v5 = vsel %vm1089_vm8, %v2382_v53, %v1086_v58  ;;  %v1146_v53 = vpack.c.bf16 %v1142_v29, %v1142_v29  ;;  %v1158_v29 = vadd.f32 %v2626_v51, %v1157_v24 }
 0xa94   :  { %v1101_v40 = vmul.f32 %v1090_v5, %v1077_v3  ;;  %v1259_v35 = vsel %vm220_vm4, %v1163_v18, 0 }
 0xa95   :  { %v1094_v8 = vmul.f32 0.5, %v1093_v32  ;;  %v1168_v52 = vsel %vm183_vm1, %v1146_v53, 0  ;;  %v1162_v53 = vpack.c.bf16 %v1158_v29, %v1158_v29  ;;  %1268 = vmatpush.bf16.msrb.mxu2 %v1259_v35 }
 0xa96   :  { %v2967_v0 = vadd.f32 %v2340_v26, %v1101_v40  ;;  %1177 = vmatpush.bf16.xpose.msra.mxu3 %v1168_v52 }
 0xa97   :  { %v1095_v1 = vsub.f32 1.5, %v1094_v8  ;;  %v1204_v52 = vsel %vm220_vm4, %v1162_v53, 0 }
 0xa98   :  { %1213 = vmatpush.bf16.msrb.mxu0 %v1204_v52 }
 0xa99   :  { %v1096_v14 = vmul.f32 %v2384_v54, %v1095_v1 }
 0xa9a   :  { %1313 = vmatpush.bf16.msra.mxu1 %v2689_v42  ;;  %v60_v42 = vld [vmem:[%s3199_s3 + $0x1] sm:$0x1] }
 0xa9b   :  { %v1100_v39 = vsel %vm1099_vm11, %v2384_v54, %v1096_v14  ;;  %vm62_vm13 = vcmp.lt.f32.partialorder %v60_v42, 0.5 }
 0xa9c   :  { %v1102_v48 = vmul.f32 %v1100_v39, %v1078_v22 }
 0xa9e   :  { %v2969_v49 = vadd.f32 %v2340_v26, %v1102_v48  ;;  %1281 = vmatpush.bf16.msrb.mxu3 %v2635_v59  ;;  %1314 = vmatpush.bf16.msra.mxu1 %v2695_v43  ;;  %v64_v43 = vsel %vm62_vm13, -1e+09, %v2451_v28 }
 0xa9f   :  { %v3003_v1 = vperm.slane %v64_v43, 0 }
 0xaa0   :  { %v2973_v31 = vpack.c.bf16 %v2969_v49, %v2967_v0 }
 0xaa2   :  { %2229 = vmatmul.msk.bf16.vlgmr.msra.gmra.mxu0 %vm101_vm0, %v2973_v31  ;;  %1282 = vmatpush.bf16.msrb.mxu3 %v2646_v61  ;;  %v59_v61 = vld [vmem:[%s3199_s3] sm:$0x1]  ;;  %s2455_s3 = smov 8  }
 0xaa3   :  { %vm61_vm12 = vcmp.lt.f32.partialorder %v59_v61, 0.5  ;;  %1297 = vmatpush.bf16.msra.mxu0 %v2640_v60 }
 0xaa7   :  { %1298 = vmatpush.bf16.msra.mxu0 %v2652_v62 }
 0xb1f   :  { %v1122_v54 = vpop.f32.mrf.mxu0 }
 0xb20   :  { %v1123_v4 = vadd.f32 %v2581_v9, %v1122_v54 }
 0xb22   :  { %v1127_v58 = vpack.c.bf16 %v1123_v4, %v1123_v4 }
 0xb24   :  { %2232 = vmatmul.msk.bf16.vlgmr.msra.gmra.mxu3 %vm183_vm1, %v1127_v58 }
 0xb27   :  { %v1124_v59 = vpop.f32.mrf.mxu0 }
 0xb28   :  { %v1125_v32 = vadd.f32 %v2581_v9, %v1124_v59  ;;  %v63_v9 = vsel %vm61_vm12, -1e+09, %v2451_v28 }
 0xb29   :  { %v3001_v63 = vperm.slane %v63_v9, 0 }
 0xb2a   :  { %v1128_v7 = vpack.c.bf16 %v1125_v32, %v1125_v32 }
 0xb2c   :  { %2234 = vmatmul.msk.bf16.vlgmr.msrb.gmra.mxu1 %vm183_vm1, %v1128_v7 }
 0xb34   :  { %2236 = vmatmul.msk.bf16.vlgmr.msrb.gmra.mxu3 %vm101_vm0, %v2973_v31 }
 0xb3c   :  { %2238 = vmatmul.msk.bf16.vlgmr.msra.gmra.mxu1 %vm101_vm0, %v2953_v41 }
 0xba7   :  { %v1179_v8 = vpop.f32.mrf.mxu3 }
 0xba8   :  { %v1183_v5 = vmul.f32 0.35355338, %v1179_v8 }
 0xba9   :  { %v1234_v3 = vpop.f32.mrf.mxu1 }
 0xbaa   :  { %v1238_v14 = vmul.f32 0.35355338, %v1234_v3  ;;  %v1187_v22 = vadd.f32 %v3001_v63, %v1183_v5 }
 0xbac   :  { %v1188_v26 = vsel %vm183_vm1, %v1187_v22, -inf  ;;  %v1242_v40 = vadd.f32 %v3003_v1, %v1238_v14 }
 0xbad   :  { %1189 = vmax.xlane.f32.xlu2 %v1188_v26 }
 0xbae   :  { %v1243_v39 = vsel %vm183_vm1, %v1242_v40, -inf }
 0xbaf   :  { %1244 = vmax.xlane.f32.xlu1 %v1243_v39  ;;  %v1181_v48 = vpop.f32.mrf.mxu3 }
 0xbb1   :  { %v1236_v28 = vpop.f32.mrf.mxu1 }
 0xbb7   :  { %v1284_v53 = vpop.f32.mrf.mxu3 }
 0xbb8   :  { %v1285_v23 = vadd.f32 %v2676_v25, %v1284_v53 }
 0xc20   :  { %v1190_v54 = vpop.xlane.xlu2 %1189 }
 0xc21   :  { %v1191_v4 = vsub.f32 %v1187_v22, %v1190_v54  ;;  %v1289_v54 = vpack.c.bf16 %v1285_v23, %v1285_v23 }
 0xc22   :  { %v1245_v58 = vpop.xlane.xlu1 %1244 }
 0xc23   :  { %v1192_v59 = vmul.f32 1.442695, %v1191_v4  ;;  %v1246_v32 = vsub.f32 %v1242_v40, %v1245_v58  ;;  %v1286_v58 = vpop.f32.mrf.mxu3 }
 0xc25   :  { %2385 = vpow2.f32 %v1192_v59  ;;  %v1247_v7 = vmul.f32 1.442695, %v1246_v32  ;;  %v1287_v32 = vadd.f32 %v2676_v25, %v1286_v58 }
 0xc27   :  { %2387 = vpow2.f32 %v1247_v7 }
 0xc2b   :  { %v2386_v61 = vpop.eup %2385 }
 0xc2c   :  { %v1194_v60 = vsel %vm183_vm1, %v2386_v61, 0.0 }
 0xc2d   :  { %v2388_v42 = vpop.eup %2387  ;;  %1195 = vadd.xlane.f32.xlu0 %v1194_v60 }
 0xc2e   :  { %v1249_v51 = vsel %vm183_vm1, %v2388_v42, 0.0 }
 0xc2f   :  { %1250 = vadd.xlane.f32.xlu2 %v1249_v51  ;;  %v1316_v51 = vpop.f32.mrf.mxu1 }
 0xca0   :  { %v1196_v62 = vpop.xlane.xlu0 %1195 }
 0xca1   :  { %2389 = vrcp.f32 %v1196_v62  ;;  %v1317_v62 = vadd.f32 %v2707_v55, %v1316_v51 }
 0xca2   :  { %v1251_v9 = vpop.xlane.xlu2 %1250 }
 0xca3   :  { %2391 = vrcp.f32 %v1251_v9  ;;  %v1321_v9 = vpack.c.bf16 %v1317_v62, %v1317_v62 }
 0xca7   :  { %v2390_v43 = vpop.eup %2389 }
 0xca8   :  { %v1198_v8 = vmul.f32 %v2390_v43, %v2386_v61  ;;  %v1360_v43 = vsel %vm220_vm4, %v1321_v9, 0 }
 0xca9   :  { %v2392_v5 = vpop.eup %2391  ;;  %1369 = vmatpush.bf16.msra.mxu3 %v1360_v43 }
 0xcaa   :  { %v1199_v3 = vpack.c.bf16 %v1198_v8, %v1198_v8  ;;  %v1253_v14 = vmul.f32 %v2392_v5, %v2388_v42  ;;  %v1318_v8 = vpop.f32.mrf.mxu1 }
 0xcab   :  { %v1319_v5 = vadd.f32 %v2707_v55, %v1318_v8 }
 0xcac   :  { %v1254_v22 = vpack.c.bf16 %v1253_v14, %v1253_v14  ;;  %2233 = vmatmul.msk.bf16.vlgmr.msrb.gmra.mxu0 %vm183_vm1, %v1199_v3 }
 0xcad   :  { %1455 = vmatpush.bf16.msrb.mxu3 %v2729_v36  ;;  %v1322_v3 = vpack.c.bf16 %v1319_v5, %v1319_v5 }
 0xcae   :  { %2235 = vmatmul.msk.bf16.vlgmr.msrb.gmra.mxu2 %vm183_vm1, %v1254_v22 }
 0xcaf   :  { %v1412_v14 = vsel %vm220_vm4, %v1322_v3, 0 }
 0xcb0   :  { %1421 = vmatpush.bf16.msrb.mxu1 %v1412_v14 }
 0xcb4   :  { %1484 = vmatpush.bf16.msra.mxu1 %v2723_v34 }
 0xcb8   :  { %1485 = vmatpush.bf16.msra.mxu1 %v2741_v38 }
 0xcbc   :  { %2237 = vmatmul.msk.bf16.vlgmr.msra.gmra.mxu0 %vm101_vm0, %v2953_v41 }
 0xd29   :  { %v3021_v26 = vpop.f32.mrf.mxu0 }
 0xd31   :  { %v1217_v40 = vpop.f32.mrf.mxu0  ;;  %v3023_v39 = vpop.f32.mrf.mxu2 }
 0xd32   :  { %v1274_v48 = vpack.c.bf16 %v3023_v39, %v3021_v26 }
 0xd39   :  { %v1272_v28 = vpop.f32.mrf.mxu2  ;;  %v1300_v24 = vpop.f32.mrf.mxu0 }
 0xd3a   :  { %v1301_v29 = vadd.f32 %v2671_v20, %v1300_v24 }
 0xd3c   :  { %v1305_v52 = vpack.c.bf16 %v1301_v29, %v1301_v29 }
 0xd3e   :  { %v1327_v17 = vsel %vm183_vm1, %v1305_v52, 0 }
 0xd3f   :  { %1336 = vmatpush.bf16.xpose.msra.mxu2 %v1327_v17 }
 0xd41   :  { %v1302_v18 = vpop.f32.mrf.mxu0 }
 0xd42   :  { %v1303_v35 = vadd.f32 %v2671_v20, %v1302_v18 }
 0xd44   :  { %v1306_v4 = vpack.c.bf16 %v1303_v35, %v1303_v35 }
 0xd46   :  { %v1379_v59 = vsel %vm183_vm1, %v1306_v4, 0  ;;  %2239 = vmatmul.msk.bf16.vlgmr.msra.gmra.mxu2 %vm183_vm1, %v1289_v54 }
 0xd47   :  { %1438 = vmatpush.bf16.msrb.mxu2 %v2760_v50  ;;  %1388 = vmatpush.bf16.xpose.msrb.mxu0 %v1379_v59  ;;  %v1290_v50 = vpack.c.bf16 %v1287_v32, %v1287_v32 }
 0xd4b   :  { %1500 = vmatpush.bf16.msra.mxu2 %v2785_v27 }
 0xd4e   :  { %2241 = vmatmul.msk.bf16.vlgmr.msrb.gmra.mxu0 %vm183_vm1, %v1290_v50 }
 0xd4f   :  { %1468 = vmatpush.bf16.msra.mxu0 %v2718_v33  ;;  %1501 = vmatpush.bf16.msra.mxu2 %v2791_v30 }
 0xd53   :  { %1469 = vmatpush.bf16.msra.mxu0 %v2736_v37 }
 0xd5e   :  { %2245 = vmatmul.msk.bf16.vlgmr.msra.gmra.mxu0 %vm101_vm0, %v2973_v31 }
 0xdc9   :  { %v1338_v20 = vpop.f32.mrf.mxu2 }
 0xdca   :  { %v1342_v7 = vmul.f32 0.35355338, %v1338_v20 }
 0xdcb   :  { %v1390_v61 = vpop.f32.mrf.mxu0 }
 0xdcc   :  { %v1394_v60 = vmul.f32 0.35355338, %v1390_v61  ;;  %v1343_v27 = vadd.f32 %v1342_v7, %v3001_v63 }
 0xdce   :  { %v1344_v25 = vsel %vm183_vm1, %v1343_v27, -inf  ;;  %v1395_v33 = vadd.f32 %v1394_v60, %v3003_v1 }
 0xdcf   :  { %1345 = vmax.xlane.f32.xlu2 %v1344_v25 }
 0xdd0   :  { %v1396_v30 = vsel %vm183_vm1, %v1395_v33, -inf }
 0xdd1   :  { %1397 = vmax.xlane.f32.xlu0 %v1396_v30  ;;  %v1340_v37 = vpop.f32.mrf.mxu2 }
 0xdd3   :  { %v1392_v42 = vpop.f32.mrf.mxu0 }
 0xe42   :  { %v1346_v22 = vpop.xlane.xlu2 %1345 }
 0xe43   :  { %v1347_v40 = vsub.f32 %v1343_v27, %v1346_v22  ;;  %v1471_v27 = vpop.f32.mrf.mxu0 }
 0xe44   :  { %v1398_v28 = vpop.xlane.xlu0 %1397  ;;  %v1472_v26 = vadd.f32 %v2772_v57, %v1471_v27 }
 0xe45   :  { %v1348_v24 = vmul.f32 1.442695, %v1347_v40  ;;  %v1399_v29 = vsub.f32 %v1395_v33, %v1398_v28 }
 0xe46   :  { %v1476_v30 = vpack.c.bf16 %v1472_v26, %v1472_v26 }
 0xe47   :  { %2393 = vpow2.f32 %v1348_v24  ;;  %v1400_v53 = vmul.f32 1.442695, %v1399_v29 }
 0xe49   :  { %2395 = vpow2.f32 %v1400_v53 }
 0xe4b   :  { %v1473_v42 = vpop.f32.mrf.mxu0 }
 0xe4c   :  { %v1474_v62 = vadd.f32 %v2772_v57, %v1473_v42 }
 0xe4d   :  { %v2394_v36 = vpop.eup %2393 }
 0xe4e   :  { %v1350_v52 = vsel %vm183_vm1, %v2394_v36, 0.0  ;;  %v1477_v9 = vpack.c.bf16 %v1474_v62, %v1474_v62 }
 0xe4f   :  { %v2396_v55 = vpop.eup %2395  ;;  %1351 = vadd.xlane.f32.xlu0 %v1350_v52 }
 0xe50   :  { %v1402_v17 = vsel %vm183_vm1, %v2396_v55, 0.0 }
 0xe51   :  { %1403 = vadd.xlane.f32.xlu1 %v1402_v17 }
 0xec2   :  { %v1352_v23 = vpop.xlane.xlu0 %1351 }
 0xec3   :  { %2397 = vrcp.f32 %v1352_v23 }
 0xec4   :  { %v1404_v34 = vpop.xlane.xlu1 %1403 }
 0xec5   :  { %2399 = vrcp.f32 %v1404_v34 }
 0xec9   :  { %v2398_v18 = vpop.eup %2397 }
 0xeca   :  { %v1354_v35 = vmul.f32 %v2398_v18, %v2394_v36 }
 0xecb   :  { %v2400_v38 = vpop.eup %2399 }
 0xecc   :  { %v1355_v54 = vpack.c.bf16 %v1354_v35, %v1354_v35  ;;  %v1406_v4 = vmul.f32 %v2400_v38, %v2396_v55 }
 0xece   :  { %v1407_v58 = vpack.c.bf16 %v1406_v4, %v1406_v4  ;;  %2240 = vmatmul.msk.bf16.vlgmr.msra.gmra.mxu3 %vm183_vm1, %v1355_v54 }
 0xed0   :  { %2242 = vmatmul.msk.bf16.vlgmr.msrb.gmra.mxu1 %vm183_vm1, %v1407_v58 }
 0xede   :  { %2244 = vmatmul.msk.bf16.vlgmr.msrb.gmra.mxu3 %vm183_vm1, %v1274_v48 }
 0xee0   :  { %2246 = vmatmul.msk.bf16.vlgmr.msra.gmra.mxu1 %vm101_vm0, %v2953_v41 }
 0xf4d   :  { %v1423_v59 = vpop.f32.mrf.mxu1 }
 0xf51   :  { %v1371_v32 = vpop.f32.mrf.mxu3 }
 0xf52   :  { %v1427_v50 = vpack.c.bf16 %v1423_v59, %v1371_v32 }
 0xf54   :  { %2243 = vmatmul.msk.bf16.vlgmr.msrb.gmra.mxu2 %vm183_vm1, %v1427_v50 }
 0xf55   :  { %v1425_v20 = vpop.f32.mrf.mxu1 }
 0xf59   :  { %v1373_v7 = vpop.f32.mrf.mxu3 }
 0xf5d   :  { %v1487_v61 = vpop.f32.mrf.mxu1 }
 0xf5e   :  { %v1488_v60 = vadd.f32 %v2767_v19, %v1487_v61 }
 0xf60   :  { %v1492_v25 = vpack.c.bf16 %v1488_v60, %v1488_v60 }
 0xf62   :  { %v1514_v33 = vsel %vm183_vm1, %v1492_v25, 0 }
 0xf63   :  { %1523 = vmatpush.bf16.xpose.msra.mxu3 %v1514_v33 }
 0xf64   :  { %2247 = vmatmul.msk.bf16.vlgmr.msra.gmra.mxu2 %vm101_vm0, %v2953_v41 }
 0xf65   :  { %v1489_v39 = vpop.f32.mrf.mxu1 }
 0xf66   :  { %v1490_v48 = vadd.f32 %v2767_v19, %v1489_v39  ;;  %v3079_v19 = vpop.f32.mrf.mxu3 }
 0xf68   :  { %v1493_v37 = vpack.c.bf16 %v1490_v48, %v1490_v48 }
 0xf6a   :  { %v1566_v51 = vsel %vm183_vm1, %v1493_v37, 0  ;;  %2248 = vmatmul.msk.bf16.vlgmr.msra.gmra.mxu3 %vm183_vm1, %v1476_v30 }
 0xf6b   :  { %1625 = vmatpush.bf16.msrb.mxu3 %v2858_v13  ;;  %1575 = vmatpush.bf16.xpose.msrb.mxu1 %v1566_v51 }
 0xf6e   :  { %v3081_v13 = vpop.f32.mrf.mxu3 }
 0xf72   :  { %2250 = vmatmul.msk.bf16.vlgmr.msrb.gmra.mxu1 %vm183_vm1, %v1477_v9 }
 0xf73   :  { %1656 = vmatpush.bf16.msra.mxu1 %v2822_v44 }
 0xf77   :  { %1657 = vmatpush.bf16.msra.mxu1 %v2828_v45 }
 0xf82   :  { %2254 = vmatmul.msk.bf16.vlgmr.msra.gmra.mxu1 %vm101_vm0, %v2953_v41 }
 0xfd7   :  { %v3087_v28 = vpop.f32.mrf.mxu2 }
 0xfdf   :  { %v3089_v24 = vpop.f32.mrf.mxu2 }
 0xfe7   :  { %v1503_v29 = vpop.f32.mrf.mxu2 }
 0xfe8   :  { %v1504_v53 = vadd.f32 %v2811_v16, %v1503_v29 }
 0xfea   :  { %v1508_v36 = vpack.c.bf16 %v1504_v53, %v1504_v53 }
 0xfec   :  { %v1547_v52 = vsel %vm220_vm4, %v1508_v36, 0 }
 0xfed   :  { %v1525_v43 = vpop.f32.mrf.mxu3  ;;  %1556 = vmatpush.bf16.msrb.mxu0 %v1547_v52 }
 0xfee   :  { %v1529_v8 = vmul.f32 0.35355338, %v1525_v43 }
 0xfef   :  { %v1577_v5 = vpop.f32.mrf.mxu1  ;;  %v1505_v55 = vpop.f32.mrf.mxu2 }
 0xff0   :  { %v1581_v3 = vmul.f32 0.35355338, %v1577_v5  ;;  %v1530_v57 = vadd.f32 %v1529_v8, %v3001_v63  ;;  %v1506_v17 = vadd.f32 %v2811_v16, %v1505_v55 }
 0xff1   :  { %1640 = vmatpush.bf16.msra.mxu0 %v2836_v46 }
 0xff2   :  { %v1531_v44 = vsel %vm183_vm1, %v1530_v57, -inf  ;;  %v1582_v14 = vadd.f32 %v1581_v3, %v3003_v1  ;;  %v1509_v23 = vpack.c.bf16 %v1506_v17, %v1506_v17 }
 0xff3   :  { %1532 = vmax.xlane.f32.xlu1 %v1531_v44 }
 0xff4   :  { %v1583_v45 = vsel %vm183_vm1, %v1582_v14, -inf  ;;  %v1599_v34 = vsel %vm220_vm4, %v1509_v23, 0 }
 0xff5   :  { %1584 = vmax.xlane.f32.xlu2 %v1583_v45  ;;  %v1527_v22 = vpop.f32.mrf.mxu3  ;;  %1641 = vmatpush.bf16.msra.mxu0 %v2842_v47 }
 0xff6   :  { %1608 = vmatpush.bf16.msrb.mxu2 %v1599_v34 }
 0xff7   :  { %v1579_v40 = vpop.f32.mrf.mxu1 }
 0xffa   :  { %1672 = vmatpush.bf16.msra.mxu2 %v2880_v11 }
 0xffe   :  { %1673 = vmatpush.bf16.msra.mxu2 %v2886_v12 }
 0xfff   :  { %v1659_v27 = vpop.f32.mrf.mxu1 }
0x1000   :  { %v1660_v25 = vadd.f32 %v2852_v10, %v1659_v27 }
0x1002   :  { %v1664_v33 = vpack.c.bf16 %v1660_v25, %v1660_v25 }
0x1004   :  { %v1686_v26 = vsel %vm183_vm1, %v1664_v33, 0 }
0x1005   :  { %1695 = vmatpush.bf16.xpose.msra.mxu3 %v1686_v26 }
0x1007   :  { %v1661_v39 = vpop.f32.mrf.mxu1 }
0x1008   :  { %v1662_v48 = vadd.f32 %v2852_v10, %v1661_v39 }
0x100a   :  { %v1665_v30 = vpack.c.bf16 %v1662_v48, %v1662_v48 }
0x100c   :  { %v1738_v37 = vsel %vm183_vm1, %v1665_v30, 0 }
0x100d   :  { %1747 = vmatpush.bf16.xpose.msrb.mxu1 %v1738_v37 }
0x1066   :  { %v1533_v18 = vpop.xlane.xlu1 %1532 }
0x1067   :  { %v1534_v35 = vsub.f32 %v1530_v57, %v1533_v18  ;;  %v1458_v57 = vadd.f32 %v3079_v19, %v3087_v28 }
0x1068   :  { %v1585_v38 = vpop.xlane.xlu2 %1584 }
0x1069   :  { %v1535_v54 = vmul.f32 1.442695, %v1534_v35  ;;  %v1586_v4 = vsub.f32 %v1582_v14, %v1585_v38 }
0x106b   :  { %2401 = vpow2.f32 %v1535_v54  ;;  %v1587_v46 = vmul.f32 1.442695, %v1586_v4 }
0x106d   :  { %2403 = vpow2.f32 %v1587_v46 }
0x1071   :  { %v2402_v58 = vpop.eup %2401 }
0x1072   :  { %v1537_v16 = vsel %vm183_vm1, %v2402_v58, 0.0 }
0x1073   :  { %v2404_v59 = vpop.eup %2403  ;;  %1538 = vadd.xlane.f32.xlu0 %v1537_v16 }
0x1074   :  { %v1589_v47 = vsel %vm183_vm1, %v2404_v59, 0.0 }
0x1075   :  { %1590 = vadd.xlane.f32.xlu1 %v1589_v47 }
0x10e6   :  { %v1539_v32 = vpop.xlane.xlu0 %1538 }
0x10e7   :  { %2405 = vrcp.f32 %v1539_v32 }
0x10e8   :  { %v1591_v11 = vpop.xlane.xlu1 %1590 }
0x10e9   :  { %2407 = vrcp.f32 %v1591_v11 }
0x10ed   :  { %v2406_v50 = vpop.eup %2405 }
0x10ee   :  { %v1541_v20 = vmul.f32 %v2406_v50, %v2402_v58 }
0x10ef   :  { %v2408_v12 = vpop.eup %2407 }
0x10f0   :  { %v1542_v7 = vpack.c.bf16 %v1541_v20, %v1541_v20  ;;  %v1593_v61 = vmul.f32 %v2408_v12, %v2404_v59 }
0x10f2   :  { %v1594_v60 = vpack.c.bf16 %v1593_v61, %v1593_v61  ;;  %2249 = vmatmul.msk.bf16.vlgmr.msrb.gmra.mxu0 %vm183_vm1, %v1542_v7 }
0x10f4   :  { %2251 = vmatmul.msk.bf16.vlgmr.msrb.gmra.mxu2 %vm183_vm1, %v1594_v60 }
0x1102   :  { %2253 = vmatmul.msk.bf16.vlgmr.msra.gmra.mxu0 %vm101_vm0, %v2973_v31 }
0x1104   :  { %2255 = vmatmul.msk.bf16.vlgmr.msra.gmra.mxu2 %vm101_vm0, %v2953_v41 }
0x116f   :  { %v1558_v42 = vpop.f32.mrf.mxu0 }
0x1177   :  { %v1560_v51 = vpop.f32.mrf.mxu0  ;;  %v1610_v31 = vpop.f32.mrf.mxu2 }
0x1178   :  { %v1614_v62 = vpack.c.bf16 %v1610_v31, %v1558_v42 }
0x117a   :  { %2252 = vmatmul.msk.bf16.vlgmr.msrb.gmra.mxu3 %vm183_vm1, %v1614_v62 }
0x117b   :  { %1797 = vmatpush.bf16.msrb.mxu3 %v2920_v2  ;;  %v1460_v2 = vadd.f32 %v3081_v13, %v3089_v24 }
0x117f   :  { %v1612_v41 = vpop.f32.mrf.mxu2  ;;  %v1643_v9 = vpop.f32.mrf.mxu0 }
0x1180   :  { %v1644_v43 = vadd.f32 %v2871_v56, %v1643_v9 }
0x1182   :  { %v1648_v5 = vpack.c.bf16 %v1644_v43, %v1644_v43 }
0x1187   :  { %v1645_v8 = vpop.f32.mrf.mxu0  ;;  %v1675_v23 = vpop.f32.mrf.mxu2 }
0x1188   :  { %v1646_v10 = vadd.f32 %v2871_v56, %v1645_v8  ;;  %v1676_v13 = vadd.f32 %v2904_v6, %v1675_v23 }
0x118a   :  { %v1649_v3 = vpack.c.bf16 %v1646_v10, %v1646_v10  ;;  %2256 = vmatmul.msk.bf16.vlgmr.msra.gmra.mxu3 %vm183_vm1, %v1648_v5  ;;  %v1680_v24 = vpack.c.bf16 %v1676_v13, %v1676_v13 }
0x118c   :  { %2258 = vmatmul.msk.bf16.vlgmr.msrb.gmra.mxu1 %vm183_vm1, %v1649_v3  ;;  %v1719_v34 = vsel %vm220_vm4, %v1680_v24, 0 }
0x118d   :  { %1728 = vmatpush.bf16.msrb.mxu0 %v1719_v34 }
0x11fd   :  { %v1627_v44 = vpop.f32.mrf.mxu3 }
0x11fe   :  { %v1632_v14 = vadd.f32 %v1627_v44, %v1458_v57 }
0x1205   :  { %v1629_v45 = vpop.f32.mrf.mxu3 }
0x1206   :  { %v1633_v22 = vadd.f32 %v1629_v45, %v1460_v2 }
0x1209   :  { %v1749_v40 = vpop.f32.mrf.mxu1 }
0x120a   :  { %v1753_v29 = vmul.f32 0.35355338, %v1749_v40  ;;  %v2315_v40 = vld [vmem:[%s3204_s8] sm:$0xff] }
0x120c   :  { %v1754_v53 = vadd.f32 %v1753_v29, %v3003_v1  ;;  %v1677_v1 = vpop.f32.mrf.mxu2 }
0x120d   :  { %v1697_v56 = vpop.f32.mrf.mxu3  ;;  %v1678_v18 = vadd.f32 %v2904_v6, %v1677_v1 }
0x120e   :  { %v1701_v36 = vmul.f32 0.35355338, %v1697_v56  ;;  %v1755_v52 = vsel %vm183_vm1, %v1754_v53, -inf }
0x120f   :  { %1756 = vmax.xlane.f32.xlu2 %v1755_v52  ;;  %v1681_v35 = vpack.c.bf16 %v1678_v18, %v1678_v18  ;;  %v2341_v18 = vld [vmem:[%s3208_s12 + $0x1] ss:$0 sm:$0xff] }
0x1210   :  { %v1702_v55 = vadd.f32 %v1701_v36, %v3001_v63 }
0x1211   :  { %v1751_v17 = vpop.f32.mrf.mxu1  ;;  %v1771_v38 = vsel %vm220_vm4, %v1681_v35, 0 }
0x1212   :  { %v1703_v19 = vsel %vm183_vm1, %v1702_v55, -inf  ;;  %1780 = vmatpush.bf16.msrb.mxu2 %v1771_v38 }
0x1213   :  { %1704 = vmax.xlane.f32.xlu0 %v1703_v19 }
0x1215   :  { %v1699_v28 = vpop.f32.mrf.mxu3 }
0x1282   :  { %v1757_v63 = vpop.xlane.xlu2 %1756 }
0x1283   :  { %v1758_v54 = vsub.f32 %v1754_v53, %v1757_v63 }
0x1285   :  { %v1759_v4 = vmul.f32 1.442695, %v1758_v54 }
0x1286   :  { %v1705_v46 = vpop.xlane.xlu0 %1704 }
0x1287   :  { %2409 = vpow2.f32 %v1759_v4  ;;  %v1706_v58 = vsub.f32 %v1702_v55, %v1705_v46 }
0x1289   :  { %v1707_v16 = vmul.f32 1.442695, %v1706_v58  ;;  %v2342_v58 = vld [vmem:[%s3209_s13 + $0x1] ss:$0 sm:$0xff] }
0x128b   :  { %2411 = vpow2.f32 %v1707_v16 }
0x128d   :  { %v2410_v59 = vpop.eup %2409 }
0x128e   :  { %v1761_v47 = vsel %vm183_vm1, %v2410_v59, 0.0 }
0x128f   :  { %1762 = vadd.xlane.f32.xlu1 %v1761_v47 }
0x1291   :  { %v2412_v32 = vpop.eup %2411 }
0x1292   :  { %v1709_v11 = vsel %vm183_vm1, %v2412_v32, 0.0 }
0x1293   :  { %1710 = vadd.xlane.f32.xlu2 %v1709_v11 }
0x1302   :  { %v1763_v6 = vpop.xlane.xlu1 %1762 }
0x1303   :  { %2413 = vrcp.f32 %v1763_v6 }
0x1306   :  { %v1711_v50 = vpop.xlane.xlu2 %1710 }
0x1307   :  { %2415 = vrcp.f32 %v1711_v50  ;;  %v2320_v50 = vld [vmem:[%s3206_s10 + $0x18] sm:$0xff] }
0x1308   :  { %1953 = vmatpush.bf16.msra.mxu1 %v2320_v50 }
0x1309   :  { %v2414_v20 = vpop.eup %2413 }
0x130a   :  { %v1765_v12 = vmul.f32 %v2414_v20, %v2410_v59  ;;  %v2319_v20 = vld [vmem:[%s3206_s10 + $0x10] sm:$0xff] }
0x130c   :  { %v1766_v7 = vpack.c.bf16 %v1765_v12, %v1765_v12  ;;  %1954 = vmatpush.bf16.msra.mxu1 %v2319_v20  ;;  %v2318_v12 = vld [vmem:[%s3206_s10 + $0x8] sm:$0xff] }
0x130d   :  { %v2416_v61 = vpop.eup %2415 }
0x130e   :  { %v1713_v60 = vmul.f32 %v2416_v61, %v2412_v32  ;;  %2259 = vmatmul.msk.bf16.vlgmr.msrb.gmra.mxu2 %vm183_vm1, %v1766_v7  ;;  %v2317_v7 = vld [vmem:[%s3206_s10] sm:$0xff] }
0x1310   :  { %v1714_v27 = vpack.c.bf16 %v1713_v60, %v1713_v60  ;;  %1955 = vmatpush.bf16.msra.mxu1 %v2318_v12  ;;  %v2343_v60 = vld [vmem:[%s3205_s9] ss:$0 sm:$0xff] }
0x1312   :  { %2257 = vmatmul.msk.bf16.vlgmr.msrb.gmra.mxu0 %vm183_vm1, %v1714_v27 }
0x1314   :  { %1956 = vmatpush.bf16.msra.mxu1 %v2317_v7 }
0x138f   :  { %v1730_v25 = vpop.f32.mrf.mxu0 }
0x1391   :  { %v1782_v33 = vpop.f32.mrf.mxu2 }
0x1392   :  { %v1786_v26 = vpack.c.bf16 %v1782_v33, %v1730_v25 }
0x1394   :  { %2260 = vmatmul.msk.bf16.vlgmr.msrb.gmra.mxu3 %vm183_vm1, %v1786_v26 }
0x1397   :  { %v1732_v39 = vpop.f32.mrf.mxu0 }
0x1399   :  { %v1784_v48 = vpop.f32.mrf.mxu2 }
0x1417   :  { %v1799_v30 = vpop.f32.mrf.mxu3 }
0x1418   :  { %v1804_v37 = vadd.f32 %v1799_v30, %v1632_v14  ;;  %v2344_v30 = vld [vmem:[%s3207_s11] ss:$0 sm:$0xff] }
0x141a   :  { %v1806_v42 = vadd.f32 %v2929_v15, %v1804_v37 }
0x141c   :  { %v1808_v51 = vadd.f32 %v1806_v42, %v2967_v0 }
0x141e   :  { %v1814_v31 = vsel %vm101_vm0, %v1808_v51, 0.0 }
0x141f   :  { %1815 = vadd.xlane.f32.xlu0 %v1814_v31  ;;  %v1801_v62 = vpop.f32.mrf.mxu3 }
0x1420   :  { %v1805_v41 = vadd.f32 %v1801_v62, %v1633_v22 }
0x1422   :  { %v1807_v9 = vadd.f32 %v2929_v15, %v1805_v41 }
0x1424   :  { %v1809_v43 = vadd.f32 %v1807_v9, %v2969_v49  ;;  %v2316_v49 = vld [vmem:[%s3204_s8 + $0x8] sm:$0xff] }
0x1425   :  { %1898 = vmatpush.bf16.msra.mxu0 %v2316_v49 }
0x1426   :  { %v1817_v8 = vsel %vm101_vm0, %v1809_v43, 0.0 }
0x1427   :  { %1818 = vadd.xlane.f32.xlu1 %v1817_v8 }
0x1429   :  { %1899 = vmatpush.bf16.msra.mxu0 %v2315_v40 }
0x1492   :  { %v1816_v5 = vpop.xlane.xlu0 %1815 }
0x1493   :  { %v1820_v10 = vmul.f32 %v1816_v5, %v2941_v21 }
0x1495   :  { %v1822_v3 = vsub.f32 %v1808_v51, %v1820_v10 }
0x1497   :  { %v1824_v57 = vmul.f32 %v1822_v3, %v1822_v3  ;;  %v1837_v54 = vmul.f32 %v2341_v18, %v1822_v3 }
0x1499   :  { %v1826_v44 = vsel %vm101_vm0, %v1824_v57, 0.0 }
0x149a   :  { %1827 = vadd.xlane.f32.xlu2 %v1826_v44  ;;  %v1819_v0 = vpop.xlane.xlu1 %1818 }
0x149b   :  { %v1821_v14 = vmul.f32 %v1819_v0, %v2941_v21 }
0x149d   :  { %v1823_v2 = vsub.f32 %v1809_v43, %v1821_v14 }
0x149f   :  { %v1825_v45 = vmul.f32 %v1823_v2, %v1823_v2  ;;  %v1838_v46 = vmul.f32 %v2341_v18, %v1823_v2 }
0x14a1   :  { %v1829_v15 = vsel %vm101_vm0, %v1825_v45, 0.0 }
0x14a2   :  { %1830 = vadd.xlane.f32.xlu0 %v1829_v15 }
0x150d   :  { %v1828_v22 = vpop.xlane.xlu2 %1827 }
0x150e   :  { %v1832_v29 = vmul.f32 %v1828_v22, %v2941_v21 }
0x1510   :  { %v1839_v53 = vadd.f32 1e-06, %v1832_v29 }
0x1512   :  { %2417 = vrsqrt.f32 %v1839_v53  ;;  %vm1847_vm15 = vweird.f32 %v1839_v53 }
0x1515   :  { %v1831_v56 = vpop.xlane.xlu0 %1830 }
0x1516   :  { %v1833_v36 = vmul.f32 %v1831_v56, %v2941_v21 }
0x1518   :  { %v2418_v52 = vpop.eup %2417  ;;  %v1840_v55 = vadd.f32 1e-06, %v1833_v36 }
0x1519   :  { %v1842_v17 = vmul.f32 %v2418_v52, %v1839_v53  ;;  %vm1848_vm14 = vweird.f32 %v2418_v52 }
0x151a   :  { %2419 = vrsqrt.f32 %v1840_v55  ;;  %vm1849_vm1 = vmor %vm1847_vm15, %vm1848_vm14  ;;  %vm1857_vm3 = vweird.f32 %v1840_v55 }
0x151b   :  { %v1843_v19 = vmul.f32 %v2418_v52, %v1842_v17  ;;  %v2345_v17 = vld [vmem:[%s3208_s12 + $0x2] ss:$0 sm:$0xff]  ;;  %s2453_s12 = smov [#allocation2]  }
0x151c   :  { %s2029_s17 = sshll.u32 %s2453_s12, 4  ;;  %s2030_s17 = int_to_ptr.vmem [resolvable:$true] %s2029_s17 }
0x151d   :  { %v1844_v28 = vmul.f32 0.5, %v1843_v19 }
0x151f   :  { %v1845_v23 = vsub.f32 1.5, %v1844_v28 }
0x1520   :  { %v2420_v13 = vpop.eup %2419 }
0x1521   :  { %v1852_v24 = vmul.f32 %v2420_v13, %v1840_v55  ;;  %v1846_v34 = vmul.f32 %v2418_v52, %v1845_v23  ;;  %vm1858_vm2 = vweird.f32 %v2420_v13 }
0x1522   :  { %vm1859_vm4 = vmor %vm1857_vm3, %vm1858_vm2 }
0x1523   :  { %v1853_v1 = vmul.f32 %v2420_v13, %v1852_v24  ;;  %v1850_v38 = vsel %vm1849_vm1, %v2418_v52, %v1846_v34 }
0x1524   :  { %v1861_v16 = vmul.f32 %v1850_v38, %v1837_v54 }
0x1525   :  { %v1854_v35 = vmul.f32 0.5, %v1853_v1 }
0x1526   :  { %v1866_v32 = vadd.f32 %v2342_v58, %v1861_v16 }
0x1527   :  { %v1855_v63 = vsub.f32 1.5, %v1854_v35 }
0x1529   :  { %v1856_v4 = vmul.f32 %v2420_v13, %v1855_v63 }
0x152b   :  { %v1860_v59 = vsel %vm1859_vm4, %v2420_v13, %v1856_v4 }
0x152c   :  { %v1862_v47 = vmul.f32 %v1860_v59, %v1838_v46 }
0x152e   :  { %v1867_v11 = vadd.f32 %v2342_v58, %v1862_v47 }
0x1530   :  { %v1868_v6 = vpack.c.bf16 %v1867_v11, %v1866_v32 }
0x1532   :  { %2271 = vmatmul.msk.bf16.vlgmr.msra.gmra.mxu0 %vm101_vm0, %v1868_v6 }
0x15af   :  { %v1901_v61 = vpop.f32.mrf.mxu0 }
0x15b0   :  { %v1902_v27 = vadd.f32 %v2343_v60, %v1901_v61 }
0x15b2   :  { %v1906_v26 = vmax.f32 %v1902_v27, 0.0 }
0x15b7   :  { %v1903_v25 = vpop.f32.mrf.mxu0 }
0x15b8   :  { %v1904_v33 = vadd.f32 %v2343_v60, %v1903_v25 }
0x15ba   :  { %v1907_v39 = vmax.f32 %v1904_v33, 0.0 }
0x15bc   :  { %v1908_v48 = vpack.c.bf16 %v1907_v39, %v1906_v26 }
0x15be   :  { %2288 = vmatmul.msk.bf16.vlgmr.msra.gmra.mxu1 %vm1945_vm5, %v1908_v48 }
0x163b   :  { %v1958_v37 = vpop.f32.mrf.mxu1 }
0x163c   :  { %v1959_v42 = vadd.f32 %v2344_v30, %v1958_v37 }
0x163e   :  { %v1963_v51 = vadd.f32 %v1959_v42, %v1866_v32 }
0x1640   :  { %v1969_v31 = vsel %vm101_vm0, %v1963_v51, 0.0 }
0x1641   :  { %1970 = vadd.xlane.f32.xlu1 %v1969_v31 }
0x1643   :  { %v1960_v62 = vpop.f32.mrf.mxu1 }
0x1644   :  { %v1961_v41 = vadd.f32 %v2344_v30, %v1960_v62 }
0x1646   :  { %v1964_v9 = vadd.f32 %v1961_v41, %v1867_v11 }
0x1648   :  { %v1972_v43 = vsel %vm101_vm0, %v1964_v9, 0.0 }
0x1649   :  { %1973 = vadd.xlane.f32.xlu2 %v1972_v43 }
0x16b4   :  { %v1971_v8 = vpop.xlane.xlu1 %1970 }
0x16b5   :  { %v1975_v5 = vmul.f32 %v1971_v8, %v2941_v21 }
0x16b7   :  { %v1977_v10 = vsub.f32 %v1963_v51, %v1975_v5 }
0x16b9   :  { %v1979_v3 = vmul.f32 %v1977_v10, %v1977_v10  ;;  %v1992_v24 = vmul.f32 %v2345_v17, %v1977_v10 }
0x16bb   :  { %v1981_v57 = vsel %vm101_vm0, %v1979_v3, 0.0 }
0x16bc   :  { %v1974_v44 = vpop.xlane.xlu2 %1973  ;;  %1982 = vadd.xlane.f32.xlu0 %v1981_v57 }
0x16bd   :  { %v1976_v0 = vmul.f32 %v1974_v44, %v2941_v21 }
0x16bf   :  { %v1978_v14 = vsub.f32 %v1964_v9, %v1976_v0 }
0x16c1   :  { %v1980_v2 = vmul.f32 %v1978_v14, %v1978_v14  ;;  %v1993_v4 = vmul.f32 %v2345_v17, %v1978_v14 }
0x16c3   :  { %v1984_v45 = vsel %vm101_vm0, %v1980_v2, 0.0 }
0x16c4   :  { %1985 = vadd.xlane.f32.xlu1 %v1984_v45 }
0x172f   :  { %v1983_v15 = vpop.xlane.xlu0 %1982 }
0x1730   :  { %v1987_v49 = vmul.f32 %v1983_v15, %v2941_v21 }
0x1732   :  { %v1994_v22 = vadd.f32 1e-06, %v1987_v49 }
0x1734   :  { %2421 = vrsqrt.f32 %v1994_v22  ;;  %vm2002_vm7 = vweird.f32 %v1994_v22 }
0x1737   :  { %v1986_v40 = vpop.xlane.xlu1 %1985 }
0x1738   :  { %v1988_v29 = vmul.f32 %v1986_v40, %v2941_v21  ;;  %v2346_v21 = vld [vmem:[%s3209_s13 + $0x2] ss:$0 sm:$0xff]  ;;  %s2031_s13 = sshll.u32 %s3210_s14, 4  ;;  %s2032_s13 = int_to_ptr.hbm [resolvable:$true] %s2031_s13 }
0x173a   :  { %v2422_v53 = vpop.eup %2421  ;;  %v1995_v56 = vadd.f32 1e-06, %v1988_v29 }
0x173b   :  { %v1997_v36 = vmul.f32 %v2422_v53, %v1994_v22  ;;  %vm2003_vm6 = vweird.f32 %v2422_v53 }
0x173c   :  { %2423 = vrsqrt.f32 %v1995_v56  ;;  %vm2004_vm8 = vmor %vm2002_vm7, %vm2003_vm6  ;;  %vm2012_vm10 = vweird.f32 %v1995_v56 }
0x173d   :  { %v1998_v52 = vmul.f32 %v2422_v53, %v1997_v36 }
0x173f   :  { %v1999_v55 = vmul.f32 0.5, %v1998_v52 }
0x1741   :  { %v2000_v19 = vsub.f32 1.5, %v1999_v55 }
0x1742   :  { %v2424_v28 = vpop.eup %2423 }
0x1743   :  { %v2001_v23 = vmul.f32 %v2422_v53, %v2000_v19  ;;  %v2007_v13 = vmul.f32 %v2424_v28, %v1995_v56  ;;  %vm2013_vm9 = vweird.f32 %v2424_v28 }
0x1744   :  { %vm2014_vm11 = vmor %vm2012_vm10, %vm2013_vm9 }
0x1745   :  { %v2005_v34 = vsel %vm2004_vm8, %v2422_v53, %v2001_v23  ;;  %v2008_v1 = vmul.f32 %v2424_v28, %v2007_v13 }
0x1746   :  { %v2016_v18 = vmul.f32 %v2005_v34, %v1992_v24 }
0x1747   :  { %v2009_v35 = vmul.f32 0.5, %v2008_v1 }
0x1748   :  { %v2021_v38 = vadd.f32 %v2346_v21, %v2016_v18 }
0x1749   :  { %v2010_v63 = vsub.f32 1.5, %v2009_v35 }
0x174a   :  { %2023 = vst.msk [vmem:[#allocation2] sm:$0xff] %vm101_vm0, %v2021_v38 }
0x174b   :  { %v2011_v54 = vmul.f32 %v2424_v28, %v2010_v63 }
0x174d   :  { %v2015_v46 = vsel %vm2014_vm11, %v2424_v28, %v2011_v54 }
0x174e   :  { %v2017_v58 = vmul.f32 %v2015_v46, %v1993_v4 }
0x1750   :  { %v2022_v16 = vadd.f32 %v2346_v21, %v2017_v58 }
0x1752   :  { %2024 = vst.msk [vmem:[#allocation2 + $0x8] sm:$0xff] %vm101_vm0, %v2022_v16 }
0x1753   :  { %2037 = dma.vmem_to_hbm [thread:$0]  %s2030_s17, 256, %s2032_s13, [#allocation3], %s2454_s2, %s2454_s2, %s2455_s3  }
0x1754   :  { %2449 = dma.done.wait [#allocation3], 256  }
0x1755   :  { %2450 = vsyncadd [#allocation3], 4294967040 }
0x1756   :  { %2042 = vsyncpa [#allocation3], 1 }

</bundles_post_ra>
